<compile_context>
chip_gen: v5e
topology: v5e:2x2
jax: 0.10.0
libtpu: 0.0.40
codegen_flags: <defaults>
</compile_context>

<pallas_src>
import functools

import jax
import jax.numpy as jnp
from jax.experimental import pallas as pl
from jax.experimental.pallas import tpu as pltpu


def _round_up(x, m):
    return ((x + m - 1) // m) * m


# ------------------------------------------------------------------ Pallas kernel

def _matmul_bias_act_kernel(p_ref, w_ref, b_ref, o_ref, *, act):
    # p_ref: (TM, K_pad) bf16   w_ref: (K_pad, N_pad) bf16
    # b_ref: (1, N_pad) f32     o_ref: (TM, N_pad)
    acc = jnp.dot(p_ref[...], w_ref[...], preferred_element_type=jnp.float32)
    acc = acc + b_ref[...]                           # f32 bias add
    if act == "leaky_relu":
        acc = jnp.where(acc > 0, acc, 0.01 * acc)    # nn.LeakyReLU default slope
    elif act == "relu":
        acc = jnp.maximum(acc, 0.0)
    o_ref[...] = acc.astype(o_ref.dtype)


def matmul_bias_act(patches, w_packed, b_packed, n_logical, act, out_dtype):
    """out = act(patches @ W + b) with prepacked (K_pad, N_pad) bf16 weights."""
    M, K = patches.shape
    K_pad, N_pad = w_packed.shape

    # Row tiling: 256-row tiles for the big layers (grid=4 -> both v7x cores
    # get a 2-deep pipeline); otherwise one tile rounded up to 16 rows.
    TM = 256 if M >= 1024 else _round_up(max(M, 16), 16)
    M_pad = _round_up(M, TM)

    # Single pad covering both the M tail and the K alignment (one HBM pass,
    # only when something actually needs padding).
    if M_pad != M or K_pad != K:
        patches = jnp.pad(patches, ((0, M_pad - M), (0, K_pad - K)))

    out = pl.pallas_call(
        functools.partial(_matmul_bias_act_kernel, act=act),
        out_shape=jax.ShapeDtypeStruct((M_pad, N_pad), out_dtype),
        grid=(M_pad // TM,),
        in_specs=[
            pl.BlockSpec((TM, K_pad), lambda i: (i, 0)),
            pl.BlockSpec((K_pad, N_pad), lambda i: (0, 0)),   # grid-invariant
            pl.BlockSpec((1, N_pad), lambda i: (0, 0)),       # grid-invariant
        ],
        out_specs=pl.BlockSpec((TM, N_pad), lambda i: (i, 0)),
        compiler_params=pltpu.CompilerParams(
            dimension_semantics=("parallel",),
            vmem_limit_bytes=32 * 1024 * 1024,   # safe on v5e/v6e, fits v7x's 64 MiB
        ),
    )(patches, w_packed, b_packed)

    if M_pad != M or N_pad != n_logical:
        out = out[:M, :n_logical]
    return out


# ------------------------------------------------------------------ weight prepack
# Runs once at init time (outside the jitted forward).

def _pack_conv3d(w, b):
    # w: (Cout, Cin, 3, 3, 3) -- PyTorch Conv3d layout.
    Cout, Cin = w.shape[0], w.shape[1]
    K = 27 * Cin
    w2d = jnp.transpose(w, (2, 3, 4, 1, 0)).reshape(K, Cout)   # rows (kz,ky,kx,Cin)
    K_pad = _round_up(K, 128)
    N_pad = _round_up(Cout, 128)
    w2d = jnp.pad(w2d, ((0, K_pad - K), (0, N_pad - Cout))).astype(jnp.bfloat16)
    b2d = jnp.pad(b, (0, N_pad - Cout)).reshape(1, N_pad).astype(jnp.float32)
    return w2d, b2d


def _pack_conv_transpose3d(w, b):
    # w: (Cin, Cout, 3, 3, 3) -- PyTorch ConvTranspose3d layout (k=3,s=2,p=1,op=1).
    # Sub-pixel decomposition: combined weight holding all 8 output parities.
    # Per-dim selection S[a, r, t]: which kernel tap t parity r uses at offset a:
    #   r=0: a=0 -> t=1 ;  r=1: a=0 -> t=2, a=1 -> t=0
    Cin, Cout = w.shape[0], w.shape[1]
    S = jnp.array([[[0., 1., 0.], [0., 0., 1.]],
                   [[0., 0., 0.], [1., 0., 0.]]], dtype=jnp.float32)
    # Wc[az,ay,ax,ci, rz,ry,rx,co] = S[az,rz,tz] S[ay,ry,ty] S[ax,rx,tx] w[ci,co,tz,ty,tx]
    wc = jnp.einsum("apt,bqu,crv,iotuv->abcipqro", S, S, S, w.astype(jnp.float32))
    K = 8 * Cin
    N = 8 * Cout
    w2d = wc.reshape(K, N)
    K_pad = _round_up(K, 128)
    N_pad = _round_up(N, 128)
    w2d = jnp.pad(w2d, ((0, K_pad - K), (0, N_pad - N))).astype(jnp.bfloat16)
    bias_c = jnp.tile(b, 8)                          # column r*Cout+co gets bias[co]
    b2d = jnp.pad(bias_c, (0, N_pad - N)).reshape(1, N_pad).astype(jnp.float32)
    return w2d, b2d


# ------------------------------------------------------------------ conv lowering (glue)
# TODO(synk): the im2col gather below still materializes patches in XLA; a fully
# fused in-kernel gather (manual DMA of shifted row slices per M-tile) is the
# remaining HBM-traffic / launch-count optimization.

def _im2col3d_ndhwc(x, k, stride, pad):
    # x: (B, D, H, W, C) bf16 -> patches (B*Do*Ho*Wo, k^3*C), K ordered (kz,ky,kx,C)
    B, D, H, W, C = x.shape
    xp = jnp.pad(x, ((0, 0), (pad, pad), (pad, pad), (pad, pad), (0, 0)))
    Do = (D + 2 * pad - k) // stride + 1
    Ho = (H + 2 * pad - k) // stride + 1
    Wo = (W + 2 * pad - k) // stride + 1
    cols = []
    for kz in range(k):
        for ky in range(k):
            for kx in range(k):
                cols.append(
                    xp[:,
                       kz:kz + stride * (Do - 1) + 1:stride,
                       ky:ky + stride * (Ho - 1) + 1:stride,
                       kx:kx + stride * (Wo - 1) + 1:stride, :])
    pat = jnp.stack(cols, axis=4)                 # (B, Do, Ho, Wo, k^3, C)
    return pat.reshape(B * Do * Ho * Wo, k ** 3 * C), (B, Do, Ho, Wo)


def conv3d(x, w_packed, b_packed, cout, act, out_dtype):
    # x: NDHWC bf16. Conv3d k=3, stride=2, padding=1.
    patches, (B, Do, Ho, Wo) = _im2col3d_ndhwc(x, 3, 2, 1)
    out = matmul_bias_act(patches, w_packed, b_packed, cout, act, out_dtype)
    return out.reshape(B, Do, Ho, Wo, cout)


def conv_transpose3d(x, w_packed, b_packed, cout, act, out_dtype):
    # ConvTranspose3d k=3, stride=2, padding=1, output_padding=1 via sub-pixel
    # decomposition: one 2x2x2 im2col of the UNDILATED input (K = 8*Cin) against
    # the prepacked combined weight (all 8 output parities), then interleave.
    # Exact PyTorch semantics: y[2m+r] uses x[m] (+x[m+1] when r=1).
    B, Dz, Dy, Dx, Cin = x.shape

    # 2x2x2 patch window, zero-padded on the high side (x[m+1] at the boundary).
    xp = jnp.pad(x, ((0, 0), (0, 1), (0, 1), (0, 1), (0, 0)))
    cols = []
    for az in range(2):
        for ay in range(2):
            for ax in range(2):
                cols.append(xp[:, az:az + Dz, ay:ay + Dy, ax:ax + Dx, :])
    pat = jnp.stack(cols, axis=4).reshape(B * Dz * Dy * Dx, 8 * Cin)   # (a, Cin) rows

    out = matmul_bias_act(pat, w_packed, b_packed, 8 * cout, act, out_dtype)

    # TODO(synk): fold this interleave into the next layer's gather indices once
    # the im2col moves in-kernel.
    y = out.reshape(B, Dz, Dy, Dx, 2, 2, 2, cout)
    y = y.transpose(0, 1, 4, 2, 5, 3, 6, 7).reshape(B, 2 * Dz, 2 * Dy, 2 * Dx, cout)
    return y


# ------------------------------------------------------------------ model

def init_params(key, in_channels=1, base_channels=32):
    enc_specs = [(in_channels, base_channels),
                 (base_channels, base_channels * 2),
                 (base_channels * 2, base_channels * 2),
                 (base_channels * 2, base_channels)]
    dec_specs = [(base_channels, base_channels * 2),
                 (base_channels * 2, base_channels * 2),
                 (base_channels * 2, base_channels),
                 (base_channels, in_channels)]
    params = {"enc": [], "dec": []}
    keys = jax.random.split(key, 16)
    ki = 0
    for cin, cout in enc_specs:
        w = jax.random.normal(keys[ki], (cout, cin, 3, 3, 3), jnp.float32) / jnp.sqrt(cin * 27.0)
        ki += 1
        b = 0.01 * jax.random.normal(keys[ki], (cout,), jnp.float32)
        ki += 1
        params["enc"].append(_pack_conv3d(w, b))          # prepacked (K_pad,N_pad) bf16
    for cin, cout in dec_specs:
        w = jax.random.normal(keys[ki], (cin, cout, 3, 3, 3), jnp.float32) / jnp.sqrt(cin * 27.0)
        ki += 1
        b = 0.01 * jax.random.normal(keys[ki], (cout,), jnp.float32)
        ki += 1
        params["dec"].append(_pack_conv_transpose3d(w, b))
    return params


def autoencoder_pc_forward(params, x, *, in_channels=1, base_channels=32):
    # x: (B, C, D, H, W) NCDHW (PyTorch interface). Internally NDHWC + bf16.
    enc_cout = [base_channels, base_channels * 2, base_channels * 2, base_channels]
    dec_cout = [base_channels * 2, base_channels * 2, base_channels, in_channels]

    z = jnp.transpose(x, (0, 2, 3, 4, 1)).astype(jnp.bfloat16)

    # encoder: 4x (Conv3d k3 s2 p1 + LeakyReLU)
    for (w, b), cout in zip(params["enc"], enc_cout):
        z = conv3d(z, w, b, cout, act="leaky_relu", out_dtype=jnp.bfloat16)

    # decoder: 3x (ConvTranspose3d k3 s2 p1 op1 + LeakyReLU) + 1x (... + ReLU)
    dec_acts = ["leaky_relu", "leaky_relu", "leaky_relu", "relu"]
    dec_dtypes = [jnp.bfloat16, jnp.bfloat16, jnp.bfloat16, jnp.float32]
    y = z
    for (w, b), cout, act, dt in zip(params["dec"], dec_cout, dec_acts, dec_dtypes):
        y = conv_transpose3d(y, w, b, cout, act=act, out_dtype=dt)

    # TODO(synk): fold this NCDHW transpose into the last kernel's output store.
    return jnp.transpose(y, (0, 4, 1, 2, 3))


# ------------------------------------------------------------------ main

if __name__ == "__main__":
    key = jax.random.PRNGKey(0)
    pkey, xkey = jax.random.split(key)
    params = init_params(pkey, in_channels=1, base_channels=32)

    # small spatial size (16^3) instead of 128^3; batch=2, in_channels=1
    x = jax.random.normal(xkey, (2, 1, 16, 16, 16), jnp.float32)

    fwd = jax.jit(autoencoder_pc_forward)
    y = fwd(params, x)
    y = jax.block_until_ready(y)

    assert y.shape == (2, 1, 16, 16, 16), y.shape
    assert y.dtype == jnp.float32
    assert bool(jnp.all(y >= 0.0))  # final ReLU
    print("KERNEL_OK")
</pallas_src>

<mosaic_0001>
module attributes {stable_mosaic.version = 11 : i64} {
  func.func @_matmul_bias_act_kernel(%arg0: i32, %arg1: memref<256x128xbf16, #tpu.memory_space<vmem>>, %arg2: memref<128x128xbf16, #tpu.memory_space<vmem>>, %arg3: memref<1x128xf32, #tpu.memory_space<vmem>>, %arg4: memref<256x128xbf16, #tpu.memory_space<vmem>>) attributes {dimension_semantics = [#tpu.dimension_semantics<parallel>], iteration_bounds = array<i64: 4>, scalar_prefetch = 0 : i64, scratch_operands = 0 : i64, tpu.core_type = #tpu.core_type<tc>, window_params = [{transform_indices = @transform_0, window_bounds = array<i64: 256, 128>}, {pipeline_mode = #tpu.pipeline_mode<synchronous>, transform_indices = @transform_1, window_bounds = array<i64: 128, 128>}, {pipeline_mode = #tpu.pipeline_mode<synchronous>, transform_indices = @transform_2, window_bounds = array<i64: 1, 128>}, {transform_indices = @transform_3, window_bounds = array<i64: 256, 128>}]} {
    %c0 = arith.constant 0 : index
    %c0_0 = arith.constant 0 : index
    %0 = vector.load %arg1[%c0, %c0_0] : memref<256x128xbf16, #tpu.memory_space<vmem>>, vector<256x128xbf16>
    %c0_1 = arith.constant 0 : index
    %c0_2 = arith.constant 0 : index
    %1 = vector.load %arg2[%c0_1, %c0_2] : memref<128x128xbf16, #tpu.memory_space<vmem>>, vector<128x128xbf16>
    %cst = arith.constant dense<0.000000e+00> : vector<256x128xf32>
    %2 = tpu.matmul %0, %1, %cst {dimension_numbers = #tpu.dot_dimension_numbers<[1], [0], [0], [1], [0, 0, 1, 1], [], []>} : vector<256x128xbf16>, vector<128x128xbf16>, vector<256x128xf32> -> vector<256x128xf32>
    %c0_3 = arith.constant 0 : index
    %c0_4 = arith.constant 0 : index
    %3 = vector.load %arg3[%c0_3, %c0_4] : memref<1x128xf32, #tpu.memory_space<vmem>>, vector<1x128xf32>
    %4 = vector.broadcast %3 : vector<1x128xf32> to vector<256x128xf32>
    %5 = arith.addf %2, %4 : vector<256x128xf32>
    %cst_5 = arith.constant 0.000000e+00 : f32
    %6 = vector.broadcast %cst_5 : f32 to vector<256x128xf32>
    %7 = arith.cmpf ogt, %5, %6 : vector<256x128xf32>
    %cst_6 = arith.constant 0.00999999977 : f32
    %8 = vector.broadcast %cst_6 : f32 to vector<256x128xf32>
    %9 = arith.mulf %8, %5 : vector<256x128xf32>
    %10 = arith.select %7, %5, %9 : vector<256x128xi1>, vector<256x128xf32>
    %11 = arith.truncf %10 : vector<256x128xf32> to vector<256x128xbf16>
    %c0_7 = arith.constant 0 : index
    %c0_8 = arith.constant 0 : index
    %12 = vector.load %arg4[%c0_7, %c0_8] : memref<256x128xbf16, #tpu.memory_space<vmem>>, vector<256x128xbf16>
    tpu.vector_store %arg4[%c0_7, %c0_8], %11 {strides = array<i32>} : memref<256x128xbf16, #tpu.memory_space<vmem>>, vector<256x128xbf16>,
    return
  }
  func.func @transform_0(%arg0: i32) -> (i32, i32) {
    %c0_i32 = arith.constant 0 : i32
    %c0_i32_0 = arith.constant 0 : i32
    return %arg0, %c0_i32 : i32, i32
  }
  func.func @transform_1(%arg0: i32) -> (i32, i32) {
    %c0_i32 = arith.constant 0 : i32
    %c0_i32_0 = arith.constant 0 : i32
    %c0_i32_1 = arith.constant 0 : i32
    return %c0_i32, %c0_i32_0 : i32, i32
  }
  func.func @transform_2(%arg0: i32) -> (i32, i32) {
    %c0_i32 = arith.constant 0 : i32
    %c0_i32_0 = arith.constant 0 : i32
    %c0_i32_1 = arith.constant 0 : i32
    return %c0_i32, %c0_i32_0 : i32, i32
  }
  func.func @transform_3(%arg0: i32) -> (i32, i32) {
    %c0_i32 = arith.constant 0 : i32
    %c0_i32_0 = arith.constant 0 : i32
    return %arg0, %c0_i32 : i32, i32
  }
}

module attributes {stable_mosaic.version = 11 : i64} {
  func.func @_matmul_bias_act_kernel(%arg0: i32, %arg1: memref<128x896xbf16, #tpu.memory_space<vmem>>, %arg2: memref<896x128xbf16, #tpu.memory_space<vmem>>, %arg3: memref<1x128xf32, #tpu.memory_space<vmem>>, %arg4: memref<128x128xbf16, #tpu.memory_space<vmem>>) attributes {dimension_semantics = [#tpu.dimension_semantics<parallel>], iteration_bounds = array<i64: 1>, scalar_prefetch = 0 : i64, scratch_operands = 0 : i64, tpu.core_type = #tpu.core_type<tc>, window_params = [{transform_indices = @transform_0, window_bounds = array<i64: 128, 896>}, {pipeline_mode = #tpu.pipeline_mode<synchronous>, transform_indices = @transform_1, window_bounds = array<i64: 896, 128>}, {pipeline_mode = #tpu.pipeline_mode<synchronous>, transform_indices = @transform_2, window_bounds = array<i64: 1, 128>}, {transform_indices = @transform_3, window_bounds = array<i64: 128, 128>}]} {
    %c0 = arith.constant 0 : index
    %c0_0 = arith.constant 0 : index
    %0 = vector.load %arg1[%c0, %c0_0] : memref<128x896xbf16, #tpu.memory_space<vmem>>, vector<128x896xbf16>
    %c0_1 = arith.constant 0 : index
    %c0_2 = arith.constant 0 : index
    %1 = vector.load %arg2[%c0_1, %c0_2] : memref<896x128xbf16, #tpu.memory_space<vmem>>, vector<896x128xbf16>
    %cst = arith.constant dense<0.000000e+00> : vector<128x128xf32>
    %2 = tpu.matmul %0, %1, %cst {dimension_numbers = #tpu.dot_dimension_numbers<[1], [0], [0], [1], [0, 0, 1, 1], [], []>} : vector<128x896xbf16>, vector<896x128xbf16>, vector<128x128xf32> -> vector<128x128xf32>
    %c0_3 = arith.constant 0 : index
    %c0_4 = arith.constant 0 : index
    %3 = vector.load %arg3[%c0_3, %c0_4] : memref<1x128xf32, #tpu.memory_space<vmem>>, vector<1x128xf32>
    %4 = vector.broadcast %3 : vector<1x128xf32> to vector<128x128xf32>
    %5 = arith.addf %2, %4 : vector<128x128xf32>
    %cst_5 = arith.constant 0.000000e+00 : f32
    %6 = vector.broadcast %cst_5 : f32 to vector<128x128xf32>
    %7 = arith.cmpf ogt, %5, %6 : vector<128x128xf32>
    %cst_6 = arith.constant 0.00999999977 : f32
    %8 = vector.broadcast %cst_6 : f32 to vector<128x128xf32>
    %9 = arith.mulf %8, %5 : vector<128x128xf32>
    %10 = arith.select %7, %5, %9 : vector<128x128xi1>, vector<128x128xf32>
    %11 = arith.truncf %10 : vector<128x128xf32> to vector<128x128xbf16>
    %c0_7 = arith.constant 0 : index
    %c0_8 = arith.constant 0 : index
    %12 = vector.load %arg4[%c0_7, %c0_8] : memref<128x128xbf16, #tpu.memory_space<vmem>>, vector<128x128xbf16>
    tpu.vector_store %arg4[%c0_7, %c0_8], %11 {strides = array<i32>} : memref<128x128xbf16, #tpu.memory_space<vmem>>, vector<128x128xbf16>,
    return
  }
  func.func @transform_0(%arg0: i32) -> (i32, i32) {
    %c0_i32 = arith.constant 0 : i32
    %c0_i32_0 = arith.constant 0 : i32
    return %arg0, %c0_i32 : i32, i32
  }
  func.func @transform_1(%arg0: i32) -> (i32, i32) {
    %c0_i32 = arith.constant 0 : i32
    %c0_i32_0 = arith.constant 0 : i32
    %c0_i32_1 = arith.constant 0 : i32
    return %c0_i32, %c0_i32_0 : i32, i32
  }
  func.func @transform_2(%arg0: i32) -> (i32, i32) {
    %c0_i32 = arith.constant 0 : i32
    %c0_i32_0 = arith.constant 0 : i32
    %c0_i32_1 = arith.constant 0 : i32
    return %c0_i32, %c0_i32_0 : i32, i32
  }
  func.func @transform_3(%arg0: i32) -> (i32, i32) {
    %c0_i32 = arith.constant 0 : i32
    %c0_i32_0 = arith.constant 0 : i32
    return %arg0, %c0_i32 : i32, i32
  }
}

module attributes {stable_mosaic.version = 11 : i64} {
  func.func @_matmul_bias_act_kernel(%arg0: i32, %arg1: memref<16x1792xbf16, #tpu.memory_space<vmem>>, %arg2: memref<1792x128xbf16, #tpu.memory_space<vmem>>, %arg3: memref<1x128xf32, #tpu.memory_space<vmem>>, %arg4: memref<16x128xbf16, #tpu.memory_space<vmem>>) attributes {dimension_semantics = [#tpu.dimension_semantics<parallel>], iteration_bounds = array<i64: 1>, scalar_prefetch = 0 : i64, scratch_operands = 0 : i64, tpu.core_type = #tpu.core_type<tc>, window_params = [{transform_indices = @transform_0, window_bounds = array<i64: 16, 1792>}, {pipeline_mode = #tpu.pipeline_mode<synchronous>, transform_indices = @transform_1, window_bounds = array<i64: 1792, 128>}, {pipeline_mode = #tpu.pipeline_mode<synchronous>, transform_indices = @transform_2, window_bounds = array<i64: 1, 128>}, {transform_indices = @transform_3, window_bounds = array<i64: 16, 128>}]} {
    %c0 = arith.constant 0 : index
    %c0_0 = arith.constant 0 : index
    %0 = vector.load %arg1[%c0, %c0_0] : memref<16x1792xbf16, #tpu.memory_space<vmem>>, vector<16x1792xbf16>
    %c0_1 = arith.constant 0 : index
    %c0_2 = arith.constant 0 : index
    %1 = vector.load %arg2[%c0_1, %c0_2] : memref<1792x128xbf16, #tpu.memory_space<vmem>>, vector<1792x128xbf16>
    %cst = arith.constant dense<0.000000e+00> : vector<16x128xf32>
    %2 = tpu.matmul %0, %1, %cst {dimension_numbers = #tpu.dot_dimension_numbers<[1], [0], [0], [1], [0, 0, 1, 1], [], []>} : vector<16x1792xbf16>, vector<1792x128xbf16>, vector<16x128xf32> -> vector<16x128xf32>
    %c0_3 = arith.constant 0 : index
    %c0_4 = arith.constant 0 : index
    %3 = vector.load %arg3[%c0_3, %c0_4] : memref<1x128xf32, #tpu.memory_space<vmem>>, vector<1x128xf32>
    %4 = vector.broadcast %3 : vector<1x128xf32> to vector<16x128xf32>
    %5 = arith.addf %2, %4 : vector<16x128xf32>
    %cst_5 = arith.constant 0.000000e+00 : f32
    %6 = vector.broadcast %cst_5 : f32 to vector<16x128xf32>
    %7 = arith.cmpf ogt, %5, %6 : vector<16x128xf32>
    %cst_6 = arith.constant 0.00999999977 : f32
    %8 = vector.broadcast %cst_6 : f32 to vector<16x128xf32>
    %9 = arith.mulf %8, %5 : vector<16x128xf32>
    %10 = arith.select %7, %5, %9 : vector<16x128xi1>, vector<16x128xf32>
    %11 = arith.truncf %10 : vector<16x128xf32> to vector<16x128xbf16>
    %c0_7 = arith.constant 0 : index
    %c0_8 = arith.constant 0 : index
    %12 = vector.load %arg4[%c0_7, %c0_8] : memref<16x128xbf16, #tpu.memory_space<vmem>>, vector<16x128xbf16>
    tpu.vector_store %arg4[%c0_7, %c0_8], %11 {strides = array<i32>} : memref<16x128xbf16, #tpu.memory_space<vmem>>, vector<16x128xbf16>,
    return
  }
  func.func @transform_0(%arg0: i32) -> (i32, i32) {
    %c0_i32 = arith.constant 0 : i32
    %c0_i32_0 = arith.constant 0 : i32
    return %arg0, %c0_i32 : i32, i32
  }
  func.func @transform_1(%arg0: i32) -> (i32, i32) {
    %c0_i32 = arith.constant 0 : i32
    %c0_i32_0 = arith.constant 0 : i32
    %c0_i32_1 = arith.constant 0 : i32
    return %c0_i32, %c0_i32_0 : i32, i32
  }
  func.func @transform_2(%arg0: i32) -> (i32, i32) {
    %c0_i32 = arith.constant 0 : i32
    %c0_i32_0 = arith.constant 0 : i32
    %c0_i32_1 = arith.constant 0 : i32
    return %c0_i32, %c0_i32_0 : i32, i32
  }
  func.func @transform_3(%arg0: i32) -> (i32, i32) {
    %c0_i32 = arith.constant 0 : i32
    %c0_i32_0 = arith.constant 0 : i32
    return %arg0, %c0_i32 : i32, i32
  }
}

module attributes {stable_mosaic.version = 11 : i64} {
  func.func @_matmul_bias_act_kernel(%arg0: i32, %arg1: memref<16x256xbf16, #tpu.memory_space<vmem>>, %arg2: memref<256x512xbf16, #tpu.memory_space<vmem>>, %arg3: memref<1x512xf32, #tpu.memory_space<vmem>>, %arg4: memref<16x512xbf16, #tpu.memory_space<vmem>>) attributes {dimension_semantics = [#tpu.dimension_semantics<parallel>], iteration_bounds = array<i64: 1>, scalar_prefetch = 0 : i64, scratch_operands = 0 : i64, tpu.core_type = #tpu.core_type<tc>, window_params = [{transform_indices = @transform_0, window_bounds = array<i64: 16, 256>}, {pipeline_mode = #tpu.pipeline_mode<synchronous>, transform_indices = @transform_1, window_bounds = array<i64: 256, 512>}, {pipeline_mode = #tpu.pipeline_mode<synchronous>, transform_indices = @transform_2, window_bounds = array<i64: 1, 512>}, {transform_indices = @transform_3, window_bounds = array<i64: 16, 512>}]} {
    %c0 = arith.constant 0 : index
    %c0_0 = arith.constant 0 : index
    %0 = vector.load %arg1[%c0, %c0_0] : memref<16x256xbf16, #tpu.memory_space<vmem>>, vector<16x256xbf16>
    %c0_1 = arith.constant 0 : index
    %c0_2 = arith.constant 0 : index
    %1 = vector.load %arg2[%c0_1, %c0_2] : memref<256x512xbf16, #tpu.memory_space<vmem>>, vector<256x512xbf16>
    %cst = arith.constant dense<0.000000e+00> : vector<16x512xf32>
    %2 = tpu.matmul %0, %1, %cst {dimension_numbers = #tpu.dot_dimension_numbers<[1], [0], [0], [1], [0, 0, 1, 1], [], []>} : vector<16x256xbf16>, vector<256x512xbf16>, vector<16x512xf32> -> vector<16x512xf32>
    %c0_3 = arith.constant 0 : index
    %c0_4 = arith.constant 0 : index
    %3 = vector.load %arg3[%c0_3, %c0_4] : memref<1x512xf32, #tpu.memory_space<vmem>>, vector<1x512xf32>
    %4 = vector.broadcast %3 : vector<1x512xf32> to vector<16x512xf32>
    %5 = arith.addf %2, %4 : vector<16x512xf32>
    %cst_5 = arith.constant 0.000000e+00 : f32
    %6 = vector.broadcast %cst_5 : f32 to vector<16x512xf32>
    %7 = arith.cmpf ogt, %5, %6 : vector<16x512xf32>
    %cst_6 = arith.constant 0.00999999977 : f32
    %8 = vector.broadcast %cst_6 : f32 to vector<16x512xf32>
    %9 = arith.mulf %8, %5 : vector<16x512xf32>
    %10 = arith.select %7, %5, %9 : vector<16x512xi1>, vector<16x512xf32>
    %11 = arith.truncf %10 : vector<16x512xf32> to vector<16x512xbf16>
    %c0_7 = arith.constant 0 : index
    %c0_8 = arith.constant 0 : index
    %12 = vector.load %arg4[%c0_7, %c0_8] : memref<16x512xbf16, #tpu.memory_space<vmem>>, vector<16x512xbf16>
    tpu.vector_store %arg4[%c0_7, %c0_8], %11 {strides = array<i32>} : memref<16x512xbf16, #tpu.memory_space<vmem>>, vector<16x512xbf16>,
    return
  }
  func.func @transform_0(%arg0: i32) -> (i32, i32) {
    %c0_i32 = arith.constant 0 : i32
    %c0_i32_0 = arith.constant 0 : i32
    return %arg0, %c0_i32 : i32, i32
  }
  func.func @transform_1(%arg0: i32) -> (i32, i32) {
    %c0_i32 = arith.constant 0 : i32
    %c0_i32_0 = arith.constant 0 : i32
    %c0_i32_1 = arith.constant 0 : i32
    return %c0_i32, %c0_i32_0 : i32, i32
  }
  func.func @transform_2(%arg0: i32) -> (i32, i32) {
    %c0_i32 = arith.constant 0 : i32
    %c0_i32_0 = arith.constant 0 : i32
    %c0_i32_1 = arith.constant 0 : i32
    return %c0_i32, %c0_i32_0 : i32, i32
  }
  func.func @transform_3(%arg0: i32) -> (i32, i32) {
    %c0_i32 = arith.constant 0 : i32
    %c0_i32_0 = arith.constant 0 : i32
    return %arg0, %c0_i32 : i32, i32
  }
}

module attributes {stable_mosaic.version = 11 : i64} {
  func.func @_matmul_bias_act_kernel(%arg0: i32, %arg1: memref<16x512xbf16, #tpu.memory_space<vmem>>, %arg2: memref<512x512xbf16, #tpu.memory_space<vmem>>, %arg3: memref<1x512xf32, #tpu.memory_space<vmem>>, %arg4: memref<16x512xbf16, #tpu.memory_space<vmem>>) attributes {dimension_semantics = [#tpu.dimension_semantics<parallel>], iteration_bounds = array<i64: 1>, scalar_prefetch = 0 : i64, scratch_operands = 0 : i64, tpu.core_type = #tpu.core_type<tc>, window_params = [{transform_indices = @transform_0, window_bounds = array<i64: 16, 512>}, {pipeline_mode = #tpu.pipeline_mode<synchronous>, transform_indices = @transform_1, window_bounds = array<i64: 512, 512>}, {pipeline_mode = #tpu.pipeline_mode<synchronous>, transform_indices = @transform_2, window_bounds = array<i64: 1, 512>}, {transform_indices = @transform_3, window_bounds = array<i64: 16, 512>}]} {
    %c0 = arith.constant 0 : index
    %c0_0 = arith.constant 0 : index
    %0 = vector.load %arg1[%c0, %c0_0] : memref<16x512xbf16, #tpu.memory_space<vmem>>, vector<16x512xbf16>
    %c0_1 = arith.constant 0 : index
    %c0_2 = arith.constant 0 : index
    %1 = vector.load %arg2[%c0_1, %c0_2] : memref<512x512xbf16, #tpu.memory_space<vmem>>, vector<512x512xbf16>
    %cst = arith.constant dense<0.000000e+00> : vector<16x512xf32>
    %2 = tpu.matmul %0, %1, %cst {dimension_numbers = #tpu.dot_dimension_numbers<[1], [0], [0], [1], [0, 0, 1, 1], [], []>} : vector<16x512xbf16>, vector<512x512xbf16>, vector<16x512xf32> -> vector<16x512xf32>
    %c0_3 = arith.constant 0 : index
    %c0_4 = arith.constant 0 : index
    %3 = vector.load %arg3[%c0_3, %c0_4] : memref<1x512xf32, #tpu.memory_space<vmem>>, vector<1x512xf32>
    %4 = vector.broadcast %3 : vector<1x512xf32> to vector<16x512xf32>
    %5 = arith.addf %2, %4 : vector<16x512xf32>
    %cst_5 = arith.constant 0.000000e+00 : f32
    %6 = vector.broadcast %cst_5 : f32 to vector<16x512xf32>
    %7 = arith.cmpf ogt, %5, %6 : vector<16x512xf32>
    %cst_6 = arith.constant 0.00999999977 : f32
    %8 = vector.broadcast %cst_6 : f32 to vector<16x512xf32>
    %9 = arith.mulf %8, %5 : vector<16x512xf32>
    %10 = arith.select %7, %5, %9 : vector<16x512xi1>, vector<16x512xf32>
    %11 = arith.truncf %10 : vector<16x512xf32> to vector<16x512xbf16>
    %c0_7 = arith.constant 0 : index
    %c0_8 = arith.constant 0 : index
    %12 = vector.load %arg4[%c0_7, %c0_8] : memref<16x512xbf16, #tpu.memory_space<vmem>>, vector<16x512xbf16>
    tpu.vector_store %arg4[%c0_7, %c0_8], %11 {strides = array<i32>} : memref<16x512xbf16, #tpu.memory_space<vmem>>, vector<16x512xbf16>,
    return
  }
  func.func @transform_0(%arg0: i32) -> (i32, i32) {
    %c0_i32 = arith.constant 0 : i32
    %c0_i32_0 = arith.constant 0 : i32
    return %arg0, %c0_i32 : i32, i32
  }
  func.func @transform_1(%arg0: i32) -> (i32, i32) {
    %c0_i32 = arith.constant 0 : i32
    %c0_i32_0 = arith.constant 0 : i32
    %c0_i32_1 = arith.constant 0 : i32
    return %c0_i32, %c0_i32_0 : i32, i32
  }
  func.func @transform_2(%arg0: i32) -> (i32, i32) {
    %c0_i32 = arith.constant 0 : i32
    %c0_i32_0 = arith.constant 0 : i32
    %c0_i32_1 = arith.constant 0 : i32
    return %c0_i32, %c0_i32_0 : i32, i32
  }
  func.func @transform_3(%arg0: i32) -> (i32, i32) {
    %c0_i32 = arith.constant 0 : i32
    %c0_i32_0 = arith.constant 0 : i32
    return %arg0, %c0_i32 : i32, i32
  }
}

module attributes {stable_mosaic.version = 11 : i64} {
  func.func @_matmul_bias_act_kernel(%arg0: i32, %arg1: memref<128x512xbf16, #tpu.memory_space<vmem>>, %arg2: memref<512x256xbf16, #tpu.memory_space<vmem>>, %arg3: memref<1x256xf32, #tpu.memory_space<vmem>>, %arg4: memref<128x256xbf16, #tpu.memory_space<vmem>>) attributes {dimension_semantics = [#tpu.dimension_semantics<parallel>], iteration_bounds = array<i64: 1>, scalar_prefetch = 0 : i64, scratch_operands = 0 : i64, tpu.core_type = #tpu.core_type<tc>, window_params = [{transform_indices = @transform_0, window_bounds = array<i64: 128, 512>}, {pipeline_mode = #tpu.pipeline_mode<synchronous>, transform_indices = @transform_1, window_bounds = array<i64: 512, 256>}, {pipeline_mode = #tpu.pipeline_mode<synchronous>, transform_indices = @transform_2, window_bounds = array<i64: 1, 256>}, {transform_indices = @transform_3, window_bounds = array<i64: 128, 256>}]} {
    %c0 = arith.constant 0 : index
    %c0_0 = arith.constant 0 : index
    %0 = vector.load %arg1[%c0, %c0_0] : memref<128x512xbf16, #tpu.memory_space<vmem>>, vector<128x512xbf16>
    %c0_1 = arith.constant 0 : index
    %c0_2 = arith.constant 0 : index
    %1 = vector.load %arg2[%c0_1, %c0_2] : memref<512x256xbf16, #tpu.memory_space<vmem>>, vector<512x256xbf16>
    %cst = arith.constant dense<0.000000e+00> : vector<128x256xf32>
    %2 = tpu.matmul %0, %1, %cst {dimension_numbers = #tpu.dot_dimension_numbers<[1], [0], [0], [1], [0, 0, 1, 1], [], []>} : vector<128x512xbf16>, vector<512x256xbf16>, vector<128x256xf32> -> vector<128x256xf32>
    %c0_3 = arith.constant 0 : index
    %c0_4 = arith.constant 0 : index
    %3 = vector.load %arg3[%c0_3, %c0_4] : memref<1x256xf32, #tpu.memory_space<vmem>>, vector<1x256xf32>
    %4 = vector.broadcast %3 : vector<1x256xf32> to vector<128x256xf32>
    %5 = arith.addf %2, %4 : vector<128x256xf32>
    %cst_5 = arith.constant 0.000000e+00 : f32
    %6 = vector.broadcast %cst_5 : f32 to vector<128x256xf32>
    %7 = arith.cmpf ogt, %5, %6 : vector<128x256xf32>
    %cst_6 = arith.constant 0.00999999977 : f32
    %8 = vector.broadcast %cst_6 : f32 to vector<128x256xf32>
    %9 = arith.mulf %8, %5 : vector<128x256xf32>
    %10 = arith.select %7, %5, %9 : vector<128x256xi1>, vector<128x256xf32>
    %11 = arith.truncf %10 : vector<128x256xf32> to vector<128x256xbf16>
    %c0_7 = arith.constant 0 : index
    %c0_8 = arith.constant 0 : index
    %12 = vector.load %arg4[%c0_7, %c0_8] : memref<128x256xbf16, #tpu.memory_space<vmem>>, vector<128x256xbf16>
    tpu.vector_store %arg4[%c0_7, %c0_8], %11 {strides = array<i32>} : memref<128x256xbf16, #tpu.memory_space<vmem>>, vector<128x256xbf16>,
    return
  }
  func.func @transform_0(%arg0: i32) -> (i32, i32) {
    %c0_i32 = arith.constant 0 : i32
    %c0_i32_0 = arith.constant 0 : i32
    return %arg0, %c0_i32 : i32, i32
  }
  func.func @transform_1(%arg0: i32) -> (i32, i32) {
    %c0_i32 = arith.constant 0 : i32
    %c0_i32_0 = arith.constant 0 : i32
    %c0_i32_1 = arith.constant 0 : i32
    return %c0_i32, %c0_i32_0 : i32, i32
  }
  func.func @transform_2(%arg0: i32) -> (i32, i32) {
    %c0_i32 = arith.constant 0 : i32
    %c0_i32_0 = arith.constant 0 : i32
    %c0_i32_1 = arith.constant 0 : i32
    return %c0_i32, %c0_i32_0 : i32, i32
  }
  func.func @transform_3(%arg0: i32) -> (i32, i32) {
    %c0_i32 = arith.constant 0 : i32
    %c0_i32_0 = arith.constant 0 : i32
    return %arg0, %c0_i32 : i32, i32
  }
}

module attributes {stable_mosaic.version = 11 : i64} {
  func.func @_matmul_bias_act_kernel(%arg0: i32, %arg1: memref<256x256xbf16, #tpu.memory_space<vmem>>, %arg2: memref<256x128xbf16, #tpu.memory_space<vmem>>, %arg3: memref<1x128xf32, #tpu.memory_space<vmem>>, %arg4: memref<256x128xf32, #tpu.memory_space<vmem>>) attributes {dimension_semantics = [#tpu.dimension_semantics<parallel>], iteration_bounds = array<i64: 4>, scalar_prefetch = 0 : i64, scratch_operands = 0 : i64, tpu.core_type = #tpu.core_type<tc>, window_params = [{transform_indices = @transform_0, window_bounds = array<i64: 256, 256>}, {pipeline_mode = #tpu.pipeline_mode<synchronous>, transform_indices = @transform_1, window_bounds = array<i64: 256, 128>}, {pipeline_mode = #tpu.pipeline_mode<synchronous>, transform_indices = @transform_2, window_bounds = array<i64: 1, 128>}, {transform_indices = @transform_3, window_bounds = array<i64: 256, 128>}]} {
    %c0 = arith.constant 0 : index
    %c0_0 = arith.constant 0 : index
    %0 = vector.load %arg1[%c0, %c0_0] : memref<256x256xbf16, #tpu.memory_space<vmem>>, vector<256x256xbf16>
    %c0_1 = arith.constant 0 : index
    %c0_2 = arith.constant 0 : index
    %1 = vector.load %arg2[%c0_1, %c0_2] : memref<256x128xbf16, #tpu.memory_space<vmem>>, vector<256x128xbf16>
    %cst = arith.constant dense<0.000000e+00> : vector<256x128xf32>
    %2 = tpu.matmul %0, %1, %cst {dimension_numbers = #tpu.dot_dimension_numbers<[1], [0], [0], [1], [0, 0, 1, 1], [], []>} : vector<256x256xbf16>, vector<256x128xbf16>, vector<256x128xf32> -> vector<256x128xf32>
    %c0_3 = arith.constant 0 : index
    %c0_4 = arith.constant 0 : index
    %3 = vector.load %arg3[%c0_3, %c0_4] : memref<1x128xf32, #tpu.memory_space<vmem>>, vector<1x128xf32>
    %4 = vector.broadcast %3 : vector<1x128xf32> to vector<256x128xf32>
    %5 = arith.addf %2, %4 : vector<256x128xf32>
    %cst_5 = arith.constant 0.000000e+00 : f32
    %6 = vector.broadcast %cst_5 : f32 to vector<256x128xf32>
    %7 = arith.maximumf %5, %6 : vector<256x128xf32>
    %c0_6 = arith.constant 0 : index
    %c0_7 = arith.constant 0 : index
    %8 = vector.load %arg4[%c0_6, %c0_7] : memref<256x128xf32, #tpu.memory_space<vmem>>, vector<256x128xf32>
    tpu.vector_store %arg4[%c0_6, %c0_7], %7 {strides = array<i32>} : memref<256x128xf32, #tpu.memory_space<vmem>>, vector<256x128xf32>,
    return
  }
  func.func @transform_0(%arg0: i32) -> (i32, i32) {
    %c0_i32 = arith.constant 0 : i32
    %c0_i32_0 = arith.constant 0 : i32
    return %arg0, %c0_i32 : i32, i32
  }
  func.func @transform_1(%arg0: i32) -> (i32, i32) {
    %c0_i32 = arith.constant 0 : i32
    %c0_i32_0 = arith.constant 0 : i32
    %c0_i32_1 = arith.constant 0 : i32
    return %c0_i32, %c0_i32_0 : i32, i32
  }
  func.func @transform_2(%arg0: i32) -> (i32, i32) {
    %c0_i32 = arith.constant 0 : i32
    %c0_i32_0 = arith.constant 0 : i32
    %c0_i32_1 = arith.constant 0 : i32
    return %c0_i32, %c0_i32_0 : i32, i32
  }
  func.func @transform_3(%arg0: i32) -> (i32, i32) {
    %c0_i32 = arith.constant 0 : i32
    %c0_i32_0 = arith.constant 0 : i32
    return %arg0, %c0_i32 : i32, i32
  }
}

</mosaic_0001>

<bundles_post_ra>
// kernel: autoencoder_pc_forward.8
= control target key start
LH: loop header
LB: loop body
LE: loop exit
PB: predicated region body
PF: predicated region fallthrough
CT: control target
= control target key end

     0   :  { %s962_s12 = smov 0   ;;  %s1083_s0 = inlined_call_operand.vmem [shape: bf16[1024,128], index: 0, kind: input, shape index: {}]   ;;  %s1084_s1 = inlined_call_operand.vmem [shape: bf16[128,128], index: 1, kind: input, shape index: {}]   ;;  %s1085_s2 = inlined_call_operand.vmem [shape: f32[1,128], index: 2, kind: input, shape index: {}]   ;;  %s1086_s3 = inlined_call_operand.vmem [shape: bf16[1024,128], index: 3, kind: output, shape index: {}]  }
   0x1 LB: > { %s675_s13 = sadd.s32 4294967295, %s940_s12   ;;  %p679_p0 = scmp.ge.s32.totalorder %s940_s12, 1  ;;  %s940_s12 = sphi %s962_s12, %s13_s12  }
   0x2   : > { %p138_p1 = scmp.lt.s32.totalorder %s940_s12, 5 }
   0x4   : > { %p139_p2 = pnand %p679_p0, %p138_p1 }
   0x5   : > { %s680_s22 = sshll.u32 (!%p139_p2), %s675_s13, 5 }
   0x6   : > { %142 = sbr.rel (%p139_p2) target bundleno = 241 (0xf1), region = 32  ;;  %p163_p3 = scmp.lt.s32.totalorder (!%p139_p2), %s680_s22, 127 }
   0xb   : > { %v805_v0 = vld [vmem:[%s1084_s1 + $0x38] sm:$0xff]  ;;  %v804_v1 = vld [vmem:[%s1084_s1 + $0x30] sm:$0xff]  ;;  %v803_v2 = vld [vmem:[%s1084_s1 + $0x28] sm:$0xff]  ;;  %s1088_s22 = smov (!%p163_p3, %s680_s22), 127 }
   0xc   : > { %370 = vmatpush.bf16.msra.mxu0 %v805_v0  ;;  %901 = vmatpush.bf16.msra.mxu1 %v805_v0  ;;  %v802_v3 = vld [vmem:[%s1084_s1 + $0x20] sm:$0xff]  ;;  %v801_v4 = vld [vmem:[%s1084_s1 + $0x18] sm:$0xff]  ;;  %v800_v5 = vld [vmem:[%s1084_s1 + $0x10] sm:$0xff]  ;;  %s681_s29 = sshll.u32 %s1088_s22, 2 }
   0xd   : > { %902 = vmatpush.bf16.msra.mxu2 %v805_v0  ;;  %903 = vmatpush.bf16.msra.mxu3 %v805_v0  ;;  %v799_v6 = vld [vmem:[%s1084_s1 + $0x8] sm:$0xff]  ;;  %v798_v7 = vld [vmem:[%s1084_s1] sm:$0xff]  ;;  %s1002_s7 = scalar_lea.vmem %s1083_s0, %s681_s29  ;;  %s1036_s13 = scalar_lea.vmem %s1086_s3, %s681_s29 }
   0xe   : > { %v782_v8 = vld [vmem:[%s1002_s7] sm:$0xff]  ;;  %v783_v12 = vld [vmem:[%s1002_s7 + $0x8] sm:$0xff]  ;;  %v784_v16 = vld [vmem:[%s1002_s7 + $0x10] sm:$0xff] }
   0xf   : > { %v786_v9 = vld [vmem:[%s1002_s7 + $0x20] sm:$0xff]  ;;  %v787_v13 = vld [vmem:[%s1002_s7 + $0x28] sm:$0xff]  ;;  %v788_v17 = vld [vmem:[%s1002_s7 + $0x30] sm:$0xff] }
  0x10   : > { %371 = vmatpush.bf16.msra.mxu0 %v804_v1  ;;  %904 = vmatpush.bf16.msra.mxu1 %v804_v1  ;;  %v790_v10 = vld [vmem:[%s1002_s7 + $0x40] sm:$0xff]  ;;  %v791_v14 = vld [vmem:[%s1002_s7 + $0x48] sm:$0xff]  ;;  %v792_v18 = vld [vmem:[%s1002_s7 + $0x50] sm:$0xff] }
  0x11   : > { %905 = vmatpush.bf16.msra.mxu2 %v804_v1  ;;  %906 = vmatpush.bf16.msra.mxu3 %v804_v1  ;;  %v794_v11 = vld [vmem:[%s1002_s7 + $0x60] sm:$0xff]  ;;  %v795_v15 = vld [vmem:[%s1002_s7 + $0x68] sm:$0xff]  ;;  %v796_v19 = vld [vmem:[%s1002_s7 + $0x70] sm:$0xff] }
  0x12   : > { %v785_v20 = vld [vmem:[%s1002_s7 + $0x18] sm:$0xff]  ;;  %v1023_v26 = vld [vmem:[%s1085_s2] ss:$0 sm:$0xff] }
  0x13   : > { %v789_v21 = vld [vmem:[%s1002_s7 + $0x38] sm:$0xff] }
  0x14   : > { %372 = vmatpush.bf16.msra.mxu0 %v803_v2  ;;  %907 = vmatpush.bf16.msra.mxu1 %v803_v2  ;;  %v793_v22 = vld [vmem:[%s1002_s7 + $0x58] sm:$0xff] }
  0x15   : > { %908 = vmatpush.bf16.msra.mxu2 %v803_v2  ;;  %909 = vmatpush.bf16.msra.mxu3 %v803_v2  ;;  %v797_v23 = vld [vmem:[%s1002_s7 + $0x78] sm:$0xff] }
  0x18   : > { %373 = vmatpush.bf16.msra.mxu0 %v802_v3  ;;  %910 = vmatpush.bf16.msra.mxu1 %v802_v3 }
  0x19   : > { %911 = vmatpush.bf16.msra.mxu2 %v802_v3  ;;  %912 = vmatpush.bf16.msra.mxu3 %v802_v3 }
  0x1c   : > { %374 = vmatpush.bf16.msra.mxu0 %v801_v4  ;;  %913 = vmatpush.bf16.msra.mxu1 %v801_v4 }
  0x1d   : > { %914 = vmatpush.bf16.msra.mxu2 %v801_v4  ;;  %915 = vmatpush.bf16.msra.mxu3 %v801_v4 }
  0x20   : > { %375 = vmatpush.bf16.msra.mxu0 %v800_v5  ;;  %916 = vmatpush.bf16.msra.mxu1 %v800_v5 }
  0x21   : > { %917 = vmatpush.bf16.msra.mxu2 %v800_v5  ;;  %918 = vmatpush.bf16.msra.mxu3 %v800_v5 }
  0x24   : > { %376 = vmatpush.bf16.msra.mxu0 %v799_v6  ;;  %919 = vmatpush.bf16.msra.mxu1 %v799_v6 }
  0x25   : > { %920 = vmatpush.bf16.msra.mxu2 %v799_v6  ;;  %921 = vmatpush.bf16.msra.mxu3 %v799_v6 }
  0x28   : > { %377 = vmatpush.bf16.msra.mxu0 %v798_v7  ;;  %922 = vmatpush.bf16.msra.mxu1 %v798_v7 }
  0x29   : > { %923 = vmatpush.bf16.msra.mxu2 %v798_v7  ;;  %924 = vmatpush.bf16.msra.mxu3 %v798_v7 }
  0x2b   : > { %378 = vmatmul.bf16.vlgmr.msra.gmra.mxu0 %v782_v8  ;;  %398 = vmatmul.bf16.vlgmr.msra.gmra.mxu1 %v786_v9 }
  0x2c   : > { %418 = vmatmul.bf16.vlgmr.msra.gmra.mxu2 %v790_v10  ;;  %438 = vmatmul.bf16.vlgmr.msra.gmra.mxu3 %v794_v11 }
  0x3b   : > { %383 = vmatmul.bf16.gmra.mxu0 %v783_v12  ;;  %403 = vmatmul.bf16.gmra.mxu1 %v787_v13 }
  0x3c   : > { %423 = vmatmul.bf16.gmra.mxu2 %v791_v14  ;;  %443 = vmatmul.bf16.gmra.mxu3 %v795_v15 }
  0x4b   : > { %388 = vmatmul.bf16.gmra.mxu0 %v784_v16  ;;  %408 = vmatmul.bf16.gmra.mxu1 %v788_v17 }
  0x4c   : > { %428 = vmatmul.bf16.gmra.mxu2 %v792_v18  ;;  %448 = vmatmul.bf16.gmra.mxu3 %v796_v19 }
  0x5b   : > { %393 = vmatmul.bf16.gmra.mxu0 %v785_v20  ;;  %413 = vmatmul.bf16.gmra.mxu1 %v789_v21 }
  0x5c   : > { %433 = vmatmul.bf16.gmra.mxu2 %v793_v22  ;;  %453 = vmatmul.bf16.gmra.mxu3 %v797_v23 }
  0xa8   : > { %v379_v24 = vpop.f32.mrf.mxu0  ;;  %v399_v25 = vpop.f32.mrf.mxu1 }
  0xa9   : > { %v380_v27 = vadd.f32 %v1023_v26, %v379_v24  ;;  %v400_v28 = vadd.f32 %v1023_v26, %v399_v25 }
  0xab   : > { %v491_v33 = vmul.f32 0.01, %v380_v27  ;;  %v499_v34 = vmul.f32 0.01, %v400_v28  ;;  %vm459_vm0 = vcmp.gt.f32.partialorder %v380_v27, 0.0  ;;  %vm467_vm1 = vcmp.gt.f32.partialorder %v400_v28, 0.0 }
  0xad   : > { %v523_v41 = vsel %vm459_vm0, %v380_v27, %v491_v33  ;;  %v531_v42 = vsel %vm467_vm1, %v400_v28, %v499_v34 }
  0xaf   : > { %v419_v29 = vpop.f32.mrf.mxu2  ;;  %v439_v30 = vpop.f32.mrf.mxu3 }
  0xb0   : > { %v381_v31 = vpop.f32.mrf.mxu0  ;;  %v401_v32 = vpop.f32.mrf.mxu1  ;;  %v420_v39 = vadd.f32 %v1023_v26, %v419_v29  ;;  %v440_v40 = vadd.f32 %v1023_v26, %v439_v30 }
  0xb1   : > { %v382_v35 = vadd.f32 %v1023_v26, %v381_v31  ;;  %v402_v36 = vadd.f32 %v1023_v26, %v401_v32 }
  0xb2   : > { %v507_v49 = vmul.f32 0.01, %v420_v39  ;;  %v515_v50 = vmul.f32 0.01, %v440_v40  ;;  %vm475_vm4 = vcmp.gt.f32.partialorder %v420_v39, 0.0  ;;  %vm483_vm5 = vcmp.gt.f32.partialorder %v440_v40, 0.0 }
  0xb3   : > { %vm460_vm2 = vcmp.gt.f32.partialorder %v382_v35, 0.0  ;;  %v492_v37 = vmul.f32 0.01, %v382_v35  ;;  %vm468_vm3 = vcmp.gt.f32.partialorder %v402_v36, 0.0  ;;  %v500_v38 = vmul.f32 0.01, %v402_v36 }
  0xb4   : > { %v539_v57 = vsel %vm475_vm4, %v420_v39, %v507_v49  ;;  %v547_v58 = vsel %vm483_vm5, %v440_v40, %v515_v50 }
  0xb5   : > { %v524_v43 = vsel %vm460_vm2, %v382_v35, %v492_v37  ;;  %v532_v44 = vsel %vm468_vm3, %v402_v36, %v500_v38 }
  0xb6   : > { %v809_v45 = vpack.c.bf16 %v524_v43, %v523_v41  ;;  %v829_v46 = vpack.c.bf16 %v532_v44, %v531_v42 }
  0xb7   : > { %v421_v47 = vpop.f32.mrf.mxu2  ;;  %v441_v48 = vpop.f32.mrf.mxu3 }
  0xb8   : > { %810 = vst [vmem:[%s1036_s13] sm:$0xff] %v809_v45   ;;  %v422_v51 = vadd.f32 %v1023_v26, %v421_v47  ;;  %v442_v52 = vadd.f32 %v1023_v26, %v441_v48  ;;  %v384_v53 = vpop.f32.mrf.mxu0  ;;  %v404_v54 = vpop.f32.mrf.mxu1 }
  0xb9   : > { %889 = vst [vmem:[%s1036_s13 + $0x20] sm:$0xff] %v829_v46   ;;  %v385_v63 = vadd.f32 %v1023_v26, %v384_v53  ;;  %v405_v0 = vadd.f32 %v1023_v26, %v404_v54 }
  0xba   : > { %vm476_vm6 = vcmp.gt.f32.partialorder %v422_v51, 0.0  ;;  %v508_v55 = vmul.f32 0.01, %v422_v51  ;;  %vm484_vm7 = vcmp.gt.f32.partialorder %v442_v52, 0.0  ;;  %v516_v56 = vmul.f32 0.01, %v442_v52 }
  0xbb   : > { %v493_v5 = vmul.f32 0.01, %v385_v63  ;;  %v501_v6 = vmul.f32 0.01, %v405_v0  ;;  %vm461_vm8 = vcmp.gt.f32.partialorder %v385_v63, 0.0  ;;  %vm469_vm9 = vcmp.gt.f32.partialorder %v405_v0, 0.0 }
  0xbc   : > { %v540_v59 = vsel %vm476_vm6, %v422_v51, %v508_v55  ;;  %v548_v60 = vsel %vm484_vm7, %v442_v52, %v516_v56 }
  0xbd   : > { %v849_v61 = vpack.c.bf16 %v540_v59, %v539_v57  ;;  %v869_v62 = vpack.c.bf16 %v548_v60, %v547_v58  ;;  %v525_v13 = vsel %vm461_vm8, %v385_v63, %v493_v5  ;;  %v533_v14 = vsel %vm469_vm9, %v405_v0, %v501_v6 }
  0xbf   : > { %893 = vst [vmem:[%s1036_s13 + $0x40] sm:$0xff] %v849_v61   ;;  %v424_v1 = vpop.f32.mrf.mxu2  ;;  %v444_v2 = vpop.f32.mrf.mxu3 }
  0xc0   : > { %897 = vst [vmem:[%s1036_s13 + $0x60] sm:$0xff] %v869_v62   ;;  %v386_v3 = vpop.f32.mrf.mxu0  ;;  %v406_v4 = vpop.f32.mrf.mxu1  ;;  %v425_v11 = vadd.f32 %v1023_v26, %v424_v1  ;;  %v445_v12 = vadd.f32 %v1023_v26, %v444_v2 }
  0xc1   : > { %v387_v7 = vadd.f32 %v1023_v26, %v386_v3  ;;  %v407_v8 = vadd.f32 %v1023_v26, %v406_v4 }
  0xc2   : > { %v509_v21 = vmul.f32 0.01, %v425_v11  ;;  %v517_v22 = vmul.f32 0.01, %v445_v12  ;;  %vm477_vm12 = vcmp.gt.f32.partialorder %v425_v11, 0.0  ;;  %vm485_vm13 = vcmp.gt.f32.partialorder %v445_v12, 0.0 }
  0xc3   : > { %vm462_vm10 = vcmp.gt.f32.partialorder %v387_v7, 0.0  ;;  %v494_v9 = vmul.f32 0.01, %v387_v7  ;;  %vm470_vm11 = vcmp.gt.f32.partialorder %v407_v8, 0.0  ;;  %v502_v10 = vmul.f32 0.01, %v407_v8 }
  0xc4   : > { %v541_v30 = vsel %vm477_vm12, %v425_v11, %v509_v21  ;;  %v549_v31 = vsel %vm485_vm13, %v445_v12, %v517_v22 }
  0xc5   : > { %v526_v15 = vsel %vm462_vm10, %v387_v7, %v494_v9  ;;  %v534_v16 = vsel %vm470_vm11, %v407_v8, %v502_v10 }
  0xc6   : > { %v814_v17 = vpack.c.bf16 %v526_v15, %v525_v13  ;;  %v834_v18 = vpack.c.bf16 %v534_v16, %v533_v14 }
  0xc7   : > { %v426_v19 = vpop.f32.mrf.mxu2  ;;  %v446_v20 = vpop.f32.mrf.mxu3 }
  0xc8   : > { %886 = vst [vmem:[%s1036_s13 + $0x8] sm:$0xff] %v814_v17   ;;  %v427_v23 = vadd.f32 %v1023_v26, %v426_v19  ;;  %v447_v24 = vadd.f32 %v1023_v26, %v446_v20  ;;  %v389_v25 = vpop.f32.mrf.mxu0  ;;  %v409_v27 = vpop.f32.mrf.mxu1 }
  0xc9   : > { %890 = vst [vmem:[%s1036_s13 + $0x28] sm:$0xff] %v834_v18   ;;  %v390_v36 = vadd.f32 %v1023_v26, %v389_v25  ;;  %v410_v37 = vadd.f32 %v1023_v26, %v409_v27 }
  0xca   : > { %vm478_vm14 = vcmp.gt.f32.partialorder %v427_v23, 0.0  ;;  %v510_v28 = vmul.f32 0.01, %v427_v23  ;;  %vm486_vm15 = vcmp.gt.f32.partialorder %v447_v24, 0.0  ;;  %v518_v29 = vmul.f32 0.01, %v447_v24 }
  0xcb   : > { %v495_v42 = vmul.f32 0.01, %v390_v36  ;;  %v503_v43 = vmul.f32 0.01, %v410_v37  ;;  %vm463_vm0 = vcmp.gt.f32.partialorder %v390_v36, 0.0  ;;  %vm471_vm1 = vcmp.gt.f32.partialorder %v410_v37, 0.0 }
  0xcc   : > { %v542_v32 = vsel %vm478_vm14, %v427_v23, %v510_v28  ;;  %v550_v33 = vsel %vm486_vm15, %v447_v24, %v518_v29 }
  0xcd   : > { %v854_v34 = vpack.c.bf16 %v542_v32, %v541_v30  ;;  %v874_v35 = vpack.c.bf16 %v550_v33, %v549_v31  ;;  %v527_v50 = vsel %vm463_vm0, %v390_v36, %v495_v42  ;;  %v535_v51 = vsel %vm471_vm1, %v410_v37, %v503_v43 }
  0xcf   : > { %894 = vst [vmem:[%s1036_s13 + $0x48] sm:$0xff] %v854_v34   ;;  %v429_v38 = vpop.f32.mrf.mxu2  ;;  %v449_v39 = vpop.f32.mrf.mxu3 }
  0xd0   : > { %898 = vst [vmem:[%s1036_s13 + $0x68] sm:$0xff] %v874_v35   ;;  %v391_v40 = vpop.f32.mrf.mxu0  ;;  %v411_v41 = vpop.f32.mrf.mxu1  ;;  %v430_v48 = vadd.f32 %v1023_v26, %v429_v38  ;;  %v450_v49 = vadd.f32 %v1023_v26, %v449_v39 }
  0xd1   : > { %v392_v44 = vadd.f32 %v1023_v26, %v391_v40  ;;  %v412_v45 = vadd.f32 %v1023_v26, %v411_v41 }
  0xd2   : > { %v511_v58 = vmul.f32 0.01, %v430_v48  ;;  %v519_v59 = vmul.f32 0.01, %v450_v49  ;;  %vm479_vm4 = vcmp.gt.f32.partialorder %v430_v48, 0.0  ;;  %vm487_vm5 = vcmp.gt.f32.partialorder %v450_v49, 0.0 }
  0xd3   : > { %vm464_vm2 = vcmp.gt.f32.partialorder %v392_v44, 0.0  ;;  %v496_v46 = vmul.f32 0.01, %v392_v44  ;;  %vm472_vm3 = vcmp.gt.f32.partialorder %v412_v45, 0.0  ;;  %v504_v47 = vmul.f32 0.01, %v412_v45 }
  0xd4   : > { %v543_v2 = vsel %vm479_vm4, %v430_v48, %v511_v58  ;;  %v551_v3 = vsel %vm487_vm5, %v450_v49, %v519_v59 }
  0xd5   : > { %v528_v52 = vsel %vm464_vm2, %v392_v44, %v496_v46  ;;  %v536_v53 = vsel %vm472_vm3, %v412_v45, %v504_v47 }
  0xd6   : > { %v819_v54 = vpack.c.bf16 %v528_v52, %v527_v50  ;;  %v839_v55 = vpack.c.bf16 %v536_v53, %v535_v51 }
  0xd7   : > { %v431_v56 = vpop.f32.mrf.mxu2  ;;  %v451_v57 = vpop.f32.mrf.mxu3 }
  0xd8   : > { %887 = vst [vmem:[%s1036_s13 + $0x10] sm:$0xff] %v819_v54   ;;  %v432_v60 = vadd.f32 %v1023_v26, %v431_v56  ;;  %v452_v61 = vadd.f32 %v1023_v26, %v451_v57  ;;  %v394_v62 = vpop.f32.mrf.mxu0  ;;  %v414_v63 = vpop.f32.mrf.mxu1 }
  0xd9   : > { %891 = vst [vmem:[%s1036_s13 + $0x30] sm:$0xff] %v839_v55   ;;  %v395_v8 = vadd.f32 %v1023_v26, %v394_v62  ;;  %v415_v9 = vadd.f32 %v1023_v26, %v414_v63 }
  0xda   : > { %vm480_vm6 = vcmp.gt.f32.partialorder %v432_v60, 0.0  ;;  %v512_v0 = vmul.f32 0.01, %v432_v60  ;;  %vm488_vm7 = vcmp.gt.f32.partialorder %v452_v61, 0.0  ;;  %v520_v1 = vmul.f32 0.01, %v452_v61 }
  0xdb   : > { %v497_v14 = vmul.f32 0.01, %v395_v8  ;;  %v505_v15 = vmul.f32 0.01, %v415_v9  ;;  %vm465_vm8 = vcmp.gt.f32.partialorder %v395_v8, 0.0  ;;  %vm473_vm9 = vcmp.gt.f32.partialorder %v415_v9, 0.0 }
  0xdc   : > { %v544_v4 = vsel %vm480_vm6, %v432_v60, %v512_v0  ;;  %v552_v5 = vsel %vm488_vm7, %v452_v61, %v520_v1 }
  0xdd   : > { %v859_v6 = vpack.c.bf16 %v544_v4, %v543_v2  ;;  %v879_v7 = vpack.c.bf16 %v552_v5, %v551_v3  ;;  %v529_v22 = vsel %vm465_vm8, %v395_v8, %v497_v14  ;;  %v537_v23 = vsel %vm473_vm9, %v415_v9, %v505_v15 }
  0xdf   : > { %895 = vst [vmem:[%s1036_s13 + $0x50] sm:$0xff] %v859_v6   ;;  %v434_v10 = vpop.f32.mrf.mxu2  ;;  %v454_v11 = vpop.f32.mrf.mxu3 }
  0xe0   : > { %899 = vst [vmem:[%s1036_s13 + $0x70] sm:$0xff] %v879_v7   ;;  %v396_v12 = vpop.f32.mrf.mxu0  ;;  %v416_v13 = vpop.f32.mrf.mxu1  ;;  %v435_v20 = vadd.f32 %v1023_v26, %v434_v10  ;;  %v455_v21 = vadd.f32 %v1023_v26, %v454_v11 }
  0xe1   : > { %v397_v16 = vadd.f32 %v1023_v26, %v396_v12  ;;  %v417_v17 = vadd.f32 %v1023_v26, %v416_v13 }
  0xe2   : > { %v513_v31 = vmul.f32 0.01, %v435_v20  ;;  %v521_v32 = vmul.f32 0.01, %v455_v21  ;;  %vm481_vm12 = vcmp.gt.f32.partialorder %v435_v20, 0.0  ;;  %vm489_vm13 = vcmp.gt.f32.partialorder %v455_v21, 0.0 }
  0xe3   : > { %vm466_vm10 = vcmp.gt.f32.partialorder %v397_v16, 0.0  ;;  %v498_v18 = vmul.f32 0.01, %v397_v16  ;;  %vm474_vm11 = vcmp.gt.f32.partialorder %v417_v17, 0.0  ;;  %v506_v19 = vmul.f32 0.01, %v417_v17 }
  0xe4   : > { %v545_v37 = vsel %vm481_vm12, %v435_v20, %v513_v31  ;;  %v553_v38 = vsel %vm489_vm13, %v455_v21, %v521_v32 }
  0xe5   : > { %v530_v24 = vsel %vm466_vm10, %v397_v16, %v498_v18  ;;  %v538_v25 = vsel %vm474_vm11, %v417_v17, %v506_v19 }
  0xe6   : > { %v824_v27 = vpack.c.bf16 %v530_v24, %v529_v22  ;;  %v844_v28 = vpack.c.bf16 %v538_v25, %v537_v23 }
  0xe7   : > { %v436_v29 = vpop.f32.mrf.mxu2  ;;  %v456_v30 = vpop.f32.mrf.mxu3 }
  0xe8   : > { %888 = vst [vmem:[%s1036_s13 + $0x18] sm:$0xff] %v824_v27   ;;  %v437_v33 = vadd.f32 %v1023_v26, %v436_v29  ;;  %v457_v34 = vadd.f32 %v1023_v26, %v456_v30 }
  0xe9   : > { %892 = vst [vmem:[%s1036_s13 + $0x38] sm:$0xff] %v844_v28  }
  0xea   : > { %vm482_vm14 = vcmp.gt.f32.partialorder %v437_v33, 0.0  ;;  %v514_v35 = vmul.f32 0.01, %v437_v33  ;;  %vm490_vm15 = vcmp.gt.f32.partialorder %v457_v34, 0.0  ;;  %v522_v36 = vmul.f32 0.01, %v457_v34 }
  0xec   : > { %v546_v39 = vsel %vm482_vm14, %v437_v33, %v514_v35  ;;  %v554_v40 = vsel %vm490_vm15, %v457_v34, %v522_v36 }
  0xed   : > { %v864_v41 = vpack.c.bf16 %v546_v39, %v545_v37  ;;  %v884_v42 = vpack.c.bf16 %v554_v40, %v553_v38 }
  0xef   : > { %896 = vst [vmem:[%s1036_s13 + $0x58] sm:$0xff] %v864_v41  }
  0xf0   : > { %900 = vst [vmem:[%s1036_s13 + $0x78] sm:$0xff] %v884_v42  }
  0xf1 PF: > { %s13_s12 = sadd.s32 1, %s940_s12  }
  0xf2   : > { %p10_p4 = scmp.ge.s32.totalorder %s13_s12, 6  }
  0xf4   :  { %12 = sbr.rel (!%p10_p4) target bundleno = 1 (0x1), region = 62 }

// kernel: autoencoder_pc_forward.9
= control target key start
LH: loop header
LB: loop body
LE: loop exit
PB: predicated region body
PF: predicated region fallthrough
CT: control target
= control target key end

     0   :  { %s2564_s1 = inlined_call_operand.vmem [shape: bf16[896,128], index: 1, kind: input, shape index: {}]   ;;  %s2565_s2 = inlined_call_operand.vmem [shape: f32[1,128], index: 2, kind: input, shape index: {}]   ;;  %s2566_s0 = inlined_call_operand.vmem [shape: bf16[128,896], index: 0, kind: input, shape index: {}]   ;;  %s2567_s3 = inlined_call_operand.vmem [shape: bf16[128,128], index: 3, kind: output, shape index: {}]  }
   0x1   :  { %v1756_v0 = vld [vmem:[%s2564_s1 + $0x38] sm:$0xff]  ;;  %v1755_v3 = vld [vmem:[%s2564_s1 + $0x30] sm:$0xff]  ;;  %v1754_v6 = vld [vmem:[%s2564_s1 + $0x28] sm:$0xff] }
   0x2   :  { %v1903_v1 = vld [vmem:[%s2564_s1 + $0xb8] sm:$0xff]  ;;  %818 = vmatpush.bf16.msra.mxu0 %v1756_v0  ;;  %1852 = vmatpush.bf16.msra.mxu3 %v1756_v0  ;;  %v1918_v4 = vld [vmem:[%s2564_s1 + $0xb0] sm:$0xff]  ;;  %v1933_v7 = vld [vmem:[%s2564_s1 + $0xa8] sm:$0xff] }
   0x3   :  { %v1908_v2 = vld [vmem:[%s2564_s1 + $0x78] sm:$0xff]  ;;  %1868 = vmatpush.bf16.msra.mxu2 %v1903_v1  ;;  %v1923_v5 = vld [vmem:[%s2564_s1 + $0x70] sm:$0xff]  ;;  %v1938_v8 = vld [vmem:[%s2564_s1 + $0x68] sm:$0xff] }
   0x4   :  { %1860 = vmatpush.bf16.msra.mxu1 %v1908_v2  ;;  %v1753_v9 = vld [vmem:[%s2564_s1 + $0x20] sm:$0xff]  ;;  %v1752_v12 = vld [vmem:[%s2564_s1 + $0x18] sm:$0xff]  ;;  %v1751_v15 = vld [vmem:[%s2564_s1 + $0x10] sm:$0xff] }
   0x5   :  { %v1948_v10 = vld [vmem:[%s2564_s1 + $0xa0] sm:$0xff]  ;;  %v1963_v13 = vld [vmem:[%s2564_s1 + $0x98] sm:$0xff]  ;;  %v1978_v16 = vld [vmem:[%s2564_s1 + $0x90] sm:$0xff] }
   0x6   :  { %819 = vmatpush.bf16.msra.mxu0 %v1755_v3  ;;  %1853 = vmatpush.bf16.msra.mxu3 %v1755_v3  ;;  %v1953_v11 = vld [vmem:[%s2564_s1 + $0x60] sm:$0xff]  ;;  %v1968_v14 = vld [vmem:[%s2564_s1 + $0x58] sm:$0xff]  ;;  %v1983_v17 = vld [vmem:[%s2564_s1 + $0x50] sm:$0xff] }
   0x7   :  { %1869 = vmatpush.bf16.msra.mxu2 %v1918_v4  ;;  %v1750_v18 = vld [vmem:[%s2564_s1 + $0x8] sm:$0xff]  ;;  %v1749_v21 = vld [vmem:[%s2564_s1] sm:$0xff]  ;;  %v1696_v25 = vld [vmem:[%s2566_s0 + $0x18] sm:$0xf0] }
   0x8   :  { %1861 = vmatpush.bf16.msra.mxu1 %v1923_v5  ;;  %v1993_v19 = vld [vmem:[%s2564_s1 + $0x88] sm:$0xff]  ;;  %v2006_v22 = vld [vmem:[%s2564_s1 + $0x80] sm:$0xff]  ;;  %v1303_v26 = vld [vmem:[%s2566_s0 + $0x70] sm:$0xf] }
   0x9   :  { %v1998_v20 = vld [vmem:[%s2564_s1 + $0x48] sm:$0xff]  ;;  %v2011_v23 = vld [vmem:[%s2564_s1 + $0x40] sm:$0xff]  ;;  %v1311_v28 = vld [vmem:[%s2566_s0 + $0x78] sm:$0xf] }
   0xa   :  { %820 = vmatpush.bf16.msra.mxu0 %v1754_v6  ;;  %1854 = vmatpush.bf16.msra.mxu3 %v1754_v6  ;;  %v1247_v24 = vld [vmem:[%s2566_s0] sm:$0xf]  ;;  %v1710_v27 = vld [vmem:[%s2566_s0 + $0x88] sm:$0xf0]  ;;  %v1711_v29 = vld [vmem:[%s2566_s0 + $0x90] sm:$0xf0] }
   0xb   :  { %1870 = vmatpush.bf16.msra.mxu2 %v1933_v7  ;;  %v1707_v30 = vld [vmem:[%s2566_s0 + $0x74] sm:$0xf]  ;;  %v1305_v31 = vld [vmem:[%s2566_s0 + $0x8c] sm:$0xf0]  ;;  %v1780_v32 = vld [vmem:[%s2564_s1 + $0xf8] sm:$0xff]  ;;  %v1248_v33 = vor.u32 %v1696_v25, %v1247_v24  ;;  %v1304_v34 = vor.u32 %v1710_v27, %v1303_v26  ;;  %v1312_v35 = vor.u32 %v1711_v29, %v1311_v28 }
   0xc   :  { %1862 = vmatpush.bf16.msra.mxu1 %v1938_v8  ;;  %v1308_v36 = vor.u32 %v1707_v30, %v1305_v31  ;;  %v1804_v37 = vld [vmem:[%s2564_s1 + $0x1b8] sm:$0xff]  ;;  %v1779_v39 = vld [vmem:[%s2564_s1 + $0xf0] sm:$0xff]  ;;  %v1778_v42 = vld [vmem:[%s2564_s1 + $0xe8] sm:$0xff] }
   0xd   :  { %v1796_v38 = vld [vmem:[%s2564_s1 + $0x178] sm:$0xff]  ;;  %v1803_v40 = vld [vmem:[%s2564_s1 + $0x1b0] sm:$0xff]  ;;  %v1802_v43 = vld [vmem:[%s2564_s1 + $0x1a8] sm:$0xff] }
   0xe   :  { %821 = vmatpush.bf16.msra.mxu0 %v1753_v9  ;;  %1855 = vmatpush.bf16.msra.mxu3 %v1753_v9  ;;  %v1795_v41 = vld [vmem:[%s2564_s1 + $0x170] sm:$0xff]  ;;  %v1794_v44 = vld [vmem:[%s2564_s1 + $0x168] sm:$0xff]  ;;  %v1275_v45 = vld [vmem:[%s2566_s0 + $0x38] sm:$0xf] }
   0xf   :  { %1871 = vmatpush.bf16.msra.mxu2 %v1948_v10  ;;  %v1777_v46 = vld [vmem:[%s2564_s1 + $0xe0] sm:$0xff]  ;;  %v1703_v47 = vld [vmem:[%s2566_s0 + $0x50] sm:$0xf0]  ;;  %v1331_v48 = vld [vmem:[%s2566_s0 + $0xa8] sm:$0xf] }
  0x10   :  { %1863 = vmatpush.bf16.msra.mxu1 %v1953_v11  ;;  %v1717_v49 = vld [vmem:[%s2566_s0 + $0xc0] sm:$0xf0]  ;;  %v1339_v50 = vld [vmem:[%s2566_s0 + $0xb0] sm:$0xf]  ;;  %v1718_v51 = vld [vmem:[%s2566_s0 + $0xc8] sm:$0xf0]  ;;  %v1276_v56 = vor.u32 %v1703_v47, %v1275_v45 }
  0x11   :  { %v1714_v52 = vld [vmem:[%s2566_s0 + $0xac] sm:$0xf]  ;;  %v1333_v53 = vld [vmem:[%s2566_s0 + $0xc4] sm:$0xf0]  ;;  %v1801_v54 = vld [vmem:[%s2564_s1 + $0x1a0] sm:$0xff]  ;;  %v1332_v57 = vor.u32 %v1717_v49, %v1331_v48  ;;  %v1340_v58 = vor.u32 %v1718_v51, %v1339_v50 }
  0x12   :  { %822 = vmatpush.bf16.msra.mxu0 %v1752_v12  ;;  %1856 = vmatpush.bf16.msra.mxu3 %v1752_v12  ;;  %v1793_v55 = vld [vmem:[%s2564_s1 + $0x160] sm:$0xff]  ;;  %v1336_v59 = vor.u32 %v1714_v52, %v1333_v53  ;;  %v1776_v60 = vld [vmem:[%s2564_s1 + $0xd8] sm:$0xff]  ;;  %v1775_v63 = vld [vmem:[%s2564_s1 + $0xd0] sm:$0xff] }
  0x13   :  { %1872 = vmatpush.bf16.msra.mxu2 %v1963_v13  ;;  %v1800_v61 = vld [vmem:[%s2564_s1 + $0x198] sm:$0xff]  ;;  %v1359_v0 = vld [vmem:[%s2566_s0 + $0xe0] sm:$0xf]  ;;  %v1693_v3 = vld [vmem:[%s2566_s0 + $0x4] sm:$0xf] }
  0x14   :  { %1864 = vmatpush.bf16.msra.mxu1 %v1968_v14  ;;  %v1792_v62 = vld [vmem:[%s2564_s1 + $0x158] sm:$0xff]  ;;  %v1367_v6 = vld [vmem:[%s2566_s0 + $0xe8] sm:$0xf]  ;;  %v1721_v9 = vld [vmem:[%s2566_s0 + $0xe4] sm:$0xf] }
  0x15   :  { %v1700_v24 = vld [vmem:[%s2566_s0 + $0x3c] sm:$0xf]  ;;  %v1395_v25 = vld [vmem:[%s2566_s0 + $0x120] sm:$0xf]  ;;  %v1389_v28 = vld [vmem:[%s2566_s0 + $0x134] sm:$0xf0] }
  0x16   :  { %823 = vmatpush.bf16.msra.mxu0 %v1751_v15  ;;  %1857 = vmatpush.bf16.msra.mxu3 %v1751_v15  ;;  %v1732_v26 = vld [vmem:[%s2566_s0 + $0x138] sm:$0xf0]  ;;  %v1785_v47 = vld [vmem:[%s2564_s1 + $0x120] sm:$0xff]  ;;  %v1443_v49 = vld [vmem:[%s2566_s0 + $0x188] sm:$0xf] }
  0x17   :  { %1873 = vmatpush.bf16.msra.mxu2 %v1978_v16  ;;  %v1728_v27 = vld [vmem:[%s2566_s0 + $0x11c] sm:$0xf]  ;;  %v1396_v31 = vor.u32 %v1732_v26, %v1395_v25  ;;  %v1745_v50 = vld [vmem:[%s2566_s0 + $0x1a0] sm:$0xf0]  ;;  %v1283_v51 = vld [vmem:[%s2566_s0 + $0x40] sm:$0xf] }
  0x18   :  { %1865 = vmatpush.bf16.msra.mxu1 %v1983_v17  ;;  %v1784_v48 = vld [vmem:[%s2564_s1 + $0x118] sm:$0xff]  ;;  %v1451_v53 = vld [vmem:[%s2566_s0 + $0x190] sm:$0xf] }
  0x19   :  { %v1704_v52 = vld [vmem:[%s2566_s0 + $0x58] sm:$0xf0] }
  0x1a   :  { %824 = vmatpush.bf16.msra.mxu0 %v1750_v18  ;;  %1858 = vmatpush.bf16.msra.mxu3 %v1750_v18  ;;  %v1799_v18 = vld [vmem:[%s2564_s1 + $0x190] sm:$0xff] }
  0x1b   :  { %1874 = vmatpush.bf16.msra.mxu2 %v1993_v19 }
  0x1c   :  { %1866 = vmatpush.bf16.msra.mxu1 %v1998_v20 }
  0x1e   :  { %825 = vmatpush.bf16.msra.mxu0 %v1749_v21  ;;  %1859 = vmatpush.bf16.msra.mxu3 %v1749_v21  ;;  %v1798_v21 = vld [vmem:[%s2564_s1 + $0x188] sm:$0xff] }
  0x1f   :  { %1875 = vmatpush.bf16.msra.mxu2 %v2006_v22 }
  0x20   :  { %1867 = vmatpush.bf16.msra.mxu1 %v2011_v23 }
  0x21   :  { %826 = vmatmul.bf16.vlgmr.msra.gmra.mxu0 %v1248_v33  ;;  %836 = vmatmul.bf16.vlgmr.msra.gmra.mxu3 %v1304_v34  ;;  %v1773_v33 = vld [vmem:[%s2564_s1 + $0xc0] sm:$0xff]  ;;  %v1788_v34 = vld [vmem:[%s2564_s1 + $0x138] sm:$0xff] }
  0x22   :  { %965 = vmatpush.bf16.msrb.mxu3 %v1780_v32  ;;  %867 = vmatpush.bf16.msrb.mxu0 %v1908_v2  ;;  %v1724_v2 = vld [vmem:[%s2566_s0 + $0xf8] sm:$0xf0]  ;;  %v1392_v32 = vor.u32 %v1728_v27, %v1389_v28 }
  0x23   :  { %934 = vmatmul.bf16.vlgmr.msra.gmra.mxu2 %v1312_v35  ;;  %885 = vmatmul.bf16.vlgmr.msra.gmra.mxu1 %v1308_v36  ;;  %v1360_v12 = vor.u32 %v1724_v2, %v1359_v0  ;;  %v1789_v35 = vld [vmem:[%s2564_s1 + $0x140] sm:$0xff]  ;;  %v1738_v36 = vld [vmem:[%s2566_s0 + $0x168] sm:$0xf0]  ;;  %v1257_v2 = vld [vmem:[%s2566_s0 + $0x24] sm:$0xf0] }
  0x24   :  { %1112 = vmatpush.bf16.msrb.mxu2 %v1804_v37  ;;  %1063 = vmatpush.bf16.msrb.mxu1 %v1796_v38  ;;  %v1697_v37 = vld [vmem:[%s2566_s0 + $0x20] sm:$0xf0]  ;;  %v1423_v38 = vld [vmem:[%s2566_s0 + $0x158] sm:$0xf]  ;;  %v1694_v0 = vld [vmem:[%s2566_s0 + $0xc] sm:$0xf] }
  0x26   :  { %868 = vmatpush.bf16.msrb.mxu0 %v1923_v5  ;;  %966 = vmatpush.bf16.msrb.mxu3 %v1779_v39  ;;  %v1249_v5 = vld [vmem:[%s2566_s0 + $0x1c] sm:$0xf0]  ;;  %v1739_v39 = vld [vmem:[%s2566_s0 + $0x170] sm:$0xf0] }
  0x28   :  { %1113 = vmatpush.bf16.msrb.mxu2 %v1803_v40  ;;  %1064 = vmatpush.bf16.msrb.mxu1 %v1795_v41  ;;  %v1735_v40 = vld [vmem:[%s2566_s0 + $0x154] sm:$0xf]  ;;  %v1417_v41 = vld [vmem:[%s2566_s0 + $0x16c] sm:$0xf0] }
  0x29   :  { %v1420_v45 = vor.u32 %v1735_v40, %v1417_v41 }
  0x2a   :  { %869 = vmatpush.bf16.msrb.mxu0 %v1938_v8  ;;  %967 = vmatpush.bf16.msrb.mxu3 %v1778_v42  ;;  %v1725_v8 = vld [vmem:[%s2566_s0 + $0x100] sm:$0xf0]  ;;  %v1787_v42 = vld [vmem:[%s2564_s1 + $0x130] sm:$0xff] }
  0x2b   :  { %v1368_v15 = vor.u32 %v1725_v8, %v1367_v6  ;;  %v1271_v6 = vld [vmem:[%s2566_s0 + $0x18] sm:$0xf]  ;;  %v1699_v8 = vld [vmem:[%s2566_s0 + $0x30] sm:$0xf0] }
  0x2c   :  { %1114 = vmatpush.bf16.msrb.mxu2 %v1802_v43  ;;  %1065 = vmatpush.bf16.msrb.mxu1 %v1794_v44 }
  0x2e   :  { %870 = vmatpush.bf16.msrb.mxu0 %v1953_v11  ;;  %968 = vmatpush.bf16.msrb.mxu3 %v1777_v46  ;;  %v1361_v11 = vld [vmem:[%s2566_s0 + $0xfc] sm:$0xf0]  ;;  %v1786_v46 = vld [vmem:[%s2564_s1 + $0x128] sm:$0xff] }
  0x30   :  { %1115 = vmatpush.bf16.msrb.mxu2 %v1801_v54  ;;  %1066 = vmatpush.bf16.msrb.mxu1 %v1793_v55  ;;  %v1746_v54 = vld [vmem:[%s2566_s0 + $0x1a8] sm:$0xf0] }
  0x31   :  { %831 = vmatmul.bf16.gmra.mxu0 %v1276_v56  ;;  %841 = vmatmul.bf16.gmra.mxu3 %v1332_v57  ;;  %v1742_v55 = vld [vmem:[%s2566_s0 + $0x18c] sm:$0xf]  ;;  %v1445_v56 = vld [vmem:[%s2566_s0 + $0x1a4] sm:$0xf0]  ;;  %v1783_v57 = vld [vmem:[%s2564_s1 + $0x110] sm:$0xff] }
  0x32   :  { %871 = vmatpush.bf16.msrb.mxu0 %v1968_v14  ;;  %969 = vmatpush.bf16.msrb.mxu3 %v1776_v60  ;;  %v1252_v14 = vor.u32 %v1693_v3, %v1249_v5  ;;  %v1452_v60 = vor.u32 %v1746_v54, %v1451_v53  ;;  %v1263_v3 = vld [vmem:[%s2566_s0 + $0x10] sm:$0xf]  ;;  %v1698_v5 = vld [vmem:[%s2566_s0 + $0x28] sm:$0xf0]  ;;  %v1349_v53 = vld [vmem:[%s2566_s0 + $0xd4] sm:$0xf0] }
  0x33   :  { %939 = vmatmul.bf16.gmra.mxu2 %v1340_v58  ;;  %890 = vmatmul.bf16.gmra.mxu1 %v1336_v59  ;;  %v1444_v58 = vor.u32 %v1745_v50, %v1443_v49  ;;  %v1284_v59 = vor.u32 %v1704_v52, %v1283_v51  ;;  %v1719_v49 = vld [vmem:[%s2566_s0 + $0xd0] sm:$0xf0]  ;;  %v1355_v50 = vld [vmem:[%s2566_s0 + $0xc0] sm:$0xf]  ;;  %v1720_v51 = vld [vmem:[%s2566_s0 + $0xd8] sm:$0xf0] }
  0x34   :  { %1116 = vmatpush.bf16.msrb.mxu2 %v1800_v61  ;;  %1067 = vmatpush.bf16.msrb.mxu1 %v1792_v62  ;;  %v1448_v61 = vor.u32 %v1742_v55, %v1445_v56  ;;  %v1782_v62 = vld [vmem:[%s2564_s1 + $0x108] sm:$0xff]  ;;  %v1716_v52 = vld [vmem:[%s2566_s0 + $0xbc] sm:$0xf] }
  0x36   :  { %872 = vmatpush.bf16.msrb.mxu0 %v1983_v17  ;;  %970 = vmatpush.bf16.msrb.mxu3 %v1775_v63  ;;  %v1364_v17 = vor.u32 %v1721_v9, %v1361_v11  ;;  %v1781_v63 = vld [vmem:[%s2564_s1 + $0x100] sm:$0xff]  ;;  %v1695_v9 = vld [vmem:[%s2566_s0 + $0x14] sm:$0xf]  ;;  %v1265_v11 = vld [vmem:[%s2566_s0 + $0x2c] sm:$0xf0] }
  0x38   :  { %1117 = vmatpush.bf16.msrb.mxu2 %v1799_v18  ;;  %v1701_v18 = vld [vmem:[%s2566_s0 + $0x44] sm:$0xf] }
  0x3a   :  { %873 = vmatpush.bf16.msrb.mxu0 %v1998_v20  ;;  %v1791_v20 = vld [vmem:[%s2564_s1 + $0x150] sm:$0xff] }
  0x3b   :  { %1068 = vmatpush.bf16.msrb.mxu1 %v1791_v20  ;;  %v1285_v20 = vld [vmem:[%s2566_s0 + $0x5c] sm:$0xf0] }
  0x3c   :  { %1118 = vmatpush.bf16.msrb.mxu2 %v1798_v21  ;;  %v1705_v21 = vld [vmem:[%s2566_s0 + $0x60] sm:$0xf0]  ;;  %v1288_v25 = vor.u32 %v1701_v18, %v1285_v20  ;;  %v1383_v18 = vld [vmem:[%s2566_s0 + $0xf8] sm:$0xf]  ;;  %v1727_v20 = vld [vmem:[%s2566_s0 + $0x110] sm:$0xf0] }
  0x3e   :  { %874 = vmatpush.bf16.msrb.mxu0 %v2011_v23  ;;  %v1387_v23 = vld [vmem:[%s2566_s0 + $0x118] sm:$0xf] }
  0x41   :  { %846 = vmatmul.bf16.gmra.mxu3 %v1360_v12  ;;  %875 = vmatmul.bf16.vlgmr.msrb.gmra.mxu0 %v1252_v14  ;;  %v1260_v12 = vor.u32 %v1694_v0, %v1257_v2  ;;  %v1264_v14 = vor.u32 %v1698_v5, %v1263_v3 }
  0x42   :  { %916 = vmatpush.bf16.msra.mxu0 %v1903_v1  ;;  %v1774_v1 = vld [vmem:[%s2564_s1 + $0xc8] sm:$0xff] }
  0x43   :  { %944 = vmatmul.bf16.gmra.mxu2 %v1368_v15  ;;  %895 = vmatmul.bf16.gmra.mxu1 %v1364_v17  ;;  %v1272_v15 = vor.u32 %v1699_v8, %v1271_v6  ;;  %v1268_v17 = vor.u32 %v1695_v9, %v1265_v11 }
  0x44   :  { %971 = vmatpush.bf16.msrb.mxu3 %v1774_v1  ;;  %v1291_v1 = vld [vmem:[%s2566_s0 + $0x48] sm:$0xf] }
  0x45   :  { %v1292_v26 = vor.u32 %v1705_v21, %v1291_v1  ;;  %v1723_v1 = vld [vmem:[%s2566_s0 + $0xf4] sm:$0xf]  ;;  %v1377_v21 = vld [vmem:[%s2566_s0 + $0x10c] sm:$0xf0] }
  0x46   :  { %917 = vmatpush.bf16.msra.mxu0 %v1918_v4  ;;  %v1731_v4 = vld [vmem:[%s2566_s0 + $0x130] sm:$0xf0] }
  0x47   :  { %v1388_v29 = vor.u32 %v1731_v4, %v1387_v23  ;;  %v1299_v23 = vld [vmem:[%s2566_s0 + $0x50] sm:$0xf]  ;;  %v1706_v4 = vld [vmem:[%s2566_s0 + $0x68] sm:$0xf0] }
  0x48   :  { %972 = vmatpush.bf16.msrb.mxu3 %v1773_v33  ;;  %v1300_v27 = vor.u32 %v1706_v4, %v1299_v23  ;;  %v1713_v33 = vld [vmem:[%s2566_s0 + $0xa0] sm:$0xf0] }
  0x4a   :  { %918 = vmatpush.bf16.msra.mxu0 %v1933_v7  ;;  %v1277_v7 = vld [vmem:[%s2566_s0 + $0x54] sm:$0xf0] }
  0x4b   :  { %v1280_v30 = vor.u32 %v1700_v24, %v1277_v7  ;;  %v1702_v24 = vld [vmem:[%s2566_s0 + $0x4c] sm:$0xf]  ;;  %v1293_v7 = vld [vmem:[%s2566_s0 + $0x64] sm:$0xf0] }
  0x4c   :  { %v1296_v28 = vor.u32 %v1702_v24, %v1293_v7 }
  0x4e   :  { %919 = vmatpush.bf16.msra.mxu0 %v1948_v10  ;;  %v1790_v10 = vld [vmem:[%s2564_s1 + $0x148] sm:$0xff] }
  0x4f   :  { %1069 = vmatpush.bf16.msrb.mxu1 %v1790_v10  ;;  %v1327_v10 = vld [vmem:[%s2566_s0 + $0x88] sm:$0xf] }
  0x51   :  { %851 = vmatmul.bf16.gmra.mxu3 %v1388_v29  ;;  %880 = vmatmul.bf16.gmra.mxu0 %v1280_v30  ;;  %v1708_v29 = vld [vmem:[%s2566_s0 + $0x7c] sm:$0xf]  ;;  %v1313_v30 = vld [vmem:[%s2566_s0 + $0x94] sm:$0xf0] }
  0x52   :  { %920 = vmatpush.bf16.msra.mxu0 %v1963_v13  ;;  %v1797_v13 = vld [vmem:[%s2564_s1 + $0x180] sm:$0xff] }
  0x53   :  { %949 = vmatmul.bf16.gmra.mxu2 %v1396_v31  ;;  %900 = vmatmul.bf16.gmra.mxu1 %v1392_v32  ;;  %v1319_v31 = vld [vmem:[%s2566_s0 + $0x80] sm:$0xf]  ;;  %v1712_v32 = vld [vmem:[%s2566_s0 + $0x98] sm:$0xf0] }
  0x54   :  { %1119 = vmatpush.bf16.msrb.mxu2 %v1797_v13  ;;  %1070 = vmatpush.bf16.msrb.mxu1 %v1789_v35  ;;  %v1709_v13 = vld [vmem:[%s2566_s0 + $0x84] sm:$0xf]  ;;  %v1316_v35 = vor.u32 %v1708_v29, %v1313_v30  ;;  %v1380_v29 = vor.u32 %v1723_v1, %v1377_v21 }
  0x56   :  { %921 = vmatpush.bf16.msra.mxu0 %v1978_v16  ;;  %v1415_v16 = vld [vmem:[%s2566_s0 + $0x150] sm:$0xf] }
  0x57   :  { %v1416_v43 = vor.u32 %v1738_v36, %v1415_v16  ;;  %v1320_v16 = vor.u32 %v1712_v32, %v1319_v31 }
  0x5a   :  { %922 = vmatpush.bf16.msra.mxu0 %v1993_v19  ;;  %v1255_v19 = vld [vmem:[%s2566_s0 + $0x8] sm:$0xf] }
  0x5b   :  { %v1256_v44 = vor.u32 %v1697_v37, %v1255_v19  ;;  %v1328_v19 = vor.u32 %v1713_v33, %v1327_v10 }
  0x5e   :  { %923 = vmatpush.bf16.msra.mxu0 %v2006_v22  ;;  %v1424_v22 = vor.u32 %v1739_v39, %v1423_v38  ;;  %v2348_v39 = vld [vmem:[%s2565_s2] ss:$0 sm:$0xff] }
  0x61   :  { %856 = vmatmul.bf16.gmra.mxu3 %v1416_v43  ;;  %924 = vmatmul.bf16.vlgmr.msra.gmra.mxu0 %v1256_v44 }
  0x62   :  { %1014 = vmatpush.bf16.msrb.mxu0 %v1788_v34  ;;  %v1321_v34 = vld [vmem:[%s2566_s0 + $0x9c] sm:$0xf0] }
  0x63   :  { %954 = vmatmul.bf16.gmra.mxu2 %v1424_v22  ;;  %905 = vmatmul.bf16.gmra.mxu1 %v1420_v45  ;;  %v1324_v37 = vor.u32 %v1709_v13, %v1321_v34 }
  0x66   :  { %1015 = vmatpush.bf16.msrb.mxu0 %v1787_v42 }
  0x6a   :  { %1016 = vmatpush.bf16.msrb.mxu0 %v1786_v46  ;;  %v1715_v46 = vld [vmem:[%s2566_s0 + $0xb4] sm:$0xf] }
  0x6e   :  { %1017 = vmatpush.bf16.msrb.mxu0 %v1785_v47  ;;  %v1341_v47 = vld [vmem:[%s2566_s0 + $0xcc] sm:$0xf0] }
  0x71   :  { %861 = vmatmul.bf16.gmra.mxu3 %v1444_v58  ;;  %929 = vmatmul.bf16.gmra.mxu0 %v1284_v59 }
  0x72   :  { %1018 = vmatpush.bf16.msrb.mxu0 %v1784_v48  ;;  %v1347_v48 = vld [vmem:[%s2566_s0 + $0xb8] sm:$0xf] }
  0x73   :  { %959 = vmatmul.bf16.gmra.mxu2 %v1452_v60  ;;  %910 = vmatmul.bf16.gmra.mxu1 %v1448_v61  ;;  %v1348_v58 = vor.u32 %v1719_v49, %v1347_v48  ;;  %v1356_v60 = vor.u32 %v1720_v51, %v1355_v50  ;;  %v1352_v61 = vor.u32 %v1716_v52, %v1349_v53 }
  0x76   :  { %1019 = vmatpush.bf16.msrb.mxu0 %v1783_v57  ;;  %v1344_v57 = vor.u32 %v1715_v46, %v1341_v47  ;;  %v1405_v46 = vld [vmem:[%s2566_s0 + $0x144] sm:$0xf0] }
  0x7a   :  { %1020 = vmatpush.bf16.msrb.mxu0 %v1782_v62 }
  0x7e   :  { %1021 = vmatpush.bf16.msrb.mxu0 %v1781_v63 }
  0x81   :  { %973 = vmatmul.bf16.vlgmr.msrb.gmra.mxu3 %v1260_v12  ;;  %1022 = vmatmul.bf16.vlgmr.msrb.gmra.mxu0 %v1264_v14  ;;  %v1722_v12 = vld [vmem:[%s2566_s0 + $0xec] sm:$0xf]  ;;  %v1369_v14 = vld [vmem:[%s2566_s0 + $0x104] sm:$0xf0] }
  0x83   :  { %1120 = vmatmul.bf16.vlgmr.msrb.gmra.mxu2 %v1272_v15  ;;  %1071 = vmatmul.bf16.vlgmr.msrb.gmra.mxu1 %v1268_v17  ;;  %v1375_v15 = vld [vmem:[%s2566_s0 + $0xf0] sm:$0xf]  ;;  %v1726_v17 = vld [vmem:[%s2566_s0 + $0x108] sm:$0xf0] }
  0x91   :  { %978 = vmatmul.bf16.gmra.mxu3 %v1288_v25  ;;  %1027 = vmatmul.bf16.gmra.mxu0 %v1292_v26  ;;  %v1372_v25 = vor.u32 %v1722_v12, %v1369_v14  ;;  %v1376_v26 = vor.u32 %v1726_v17, %v1375_v15  ;;  %v1431_v12 = vld [vmem:[%s2566_s0 + $0x160] sm:$0xf]  ;;  %v1740_v14 = vld [vmem:[%s2566_s0 + $0x178] sm:$0xf0]  ;;  %v1439_v15 = vld [vmem:[%s2566_s0 + $0x168] sm:$0xf] }
  0x92   :  { %v1741_v17 = vld [vmem:[%s2566_s0 + $0x180] sm:$0xf0] }
  0x93   :  { %1125 = vmatmul.bf16.gmra.mxu2 %v1300_v27  ;;  %1076 = vmatmul.bf16.gmra.mxu1 %v1296_v28  ;;  %v1384_v28 = vor.u32 %v1727_v20, %v1383_v18  ;;  %v1737_v18 = vld [vmem:[%s2566_s0 + $0x164] sm:$0xf]  ;;  %v1433_v20 = vld [vmem:[%s2566_s0 + $0x17c] sm:$0xf0] }
  0x9e   :  { %v827_v36 = vpop.f32.mrf.mxu0 }
  0x9f   :  { %v828_v4 = vadd.f32 %v2348_v39, %v827_v36 }
  0xa0   :  { %v886_v38 = vpop.f32.mrf.mxu1 }
  0xa1   :  { %983 = vmatmul.bf16.gmra.mxu3 %v1316_v35  ;;  %1032 = vmatmul.bf16.gmra.mxu0 %v1320_v16 }
  0xa3   :  { %1130 = vmatmul.bf16.gmra.mxu2 %v1328_v19  ;;  %1081 = vmatmul.bf16.gmra.mxu1 %v1324_v37  ;;  %v1729_v37 = vld [vmem:[%s2566_s0 + $0x124] sm:$0xf] }
  0xa4   :  { %v837_v40 = vpop.f32.mrf.mxu3 }
  0xa5   :  { %v838_v41 = vadd.f32 %v2348_v39, %v837_v40  ;;  %v1403_v40 = vld [vmem:[%s2566_s0 + $0x128] sm:$0xf] }
  0xa6   :  { %v935_v42 = vpop.f32.mrf.mxu2  ;;  %v2351_v43 = vpop.f32.mrf.mxu0 }
  0xa7   :  { %v887_v44 = vadd.f32 %v886_v38, %v838_v41  ;;  %v1397_v38 = vld [vmem:[%s2566_s0 + $0x13c] sm:$0xf0]  ;;  %v1733_v41 = vld [vmem:[%s2566_s0 + $0x140] sm:$0xf0] }
  0xa8   :  { %v888_v22 = vpop.f32.mrf.mxu1  ;;  %v1400_v51 = vor.u32 %v1729_v37, %v1397_v38  ;;  %v1404_v52 = vor.u32 %v1733_v41, %v1403_v40  ;;  %v1743_v37 = vld [vmem:[%s2566_s0 + $0x194] sm:$0xf]  ;;  %v1453_v38 = vld [vmem:[%s2566_s0 + $0x1ac] sm:$0xf0]  ;;  %v1459_v40 = vld [vmem:[%s2566_s0 + $0x198] sm:$0xf] }
  0xa9   :  { %v2353_v45 = vadd.f32 %v935_v42, %v887_v44  ;;  %v1411_v42 = vld [vmem:[%s2566_s0 + $0x130] sm:$0xf]  ;;  %v1734_v44 = vld [vmem:[%s2566_s0 + $0x148] sm:$0xf0]  ;;  %v1747_v41 = vld [vmem:[%s2566_s0 + $0x1b0] sm:$0xf0] }
  0xac   :  { %v839_v54 = vpop.f32.mrf.mxu3 }
  0xad   :  { %v840_v55 = vadd.f32 %v2348_v39, %v839_v54  ;;  %v1412_v54 = vor.u32 %v1734_v44, %v1411_v42  ;;  %v1467_v42 = vld [vmem:[%s2566_s0 + $0x1a0] sm:$0xf]  ;;  %v1748_v44 = vld [vmem:[%s2566_s0 + $0x1b8] sm:$0xf0] }
  0xae   :  { %v937_v56 = vpop.f32.mrf.mxu2  ;;  %v832_v59 = vpop.f32.mrf.mxu0 }
  0xaf   :  { %v889_v62 = vadd.f32 %v888_v22, %v840_v55  ;;  %v1730_v22 = vld [vmem:[%s2566_s0 + $0x12c] sm:$0xf]  ;;  %v833_v48 = vadd.f32 %v2348_v39, %v832_v59 }
  0xb0   :  { %v891_v63 = vpop.f32.mrf.mxu1  ;;  %v1408_v55 = vor.u32 %v1730_v22, %v1405_v46  ;;  %v1744_v22 = vld [vmem:[%s2566_s0 + $0x19c] sm:$0xf]  ;;  %v1461_v46 = vld [vmem:[%s2566_s0 + $0x1b4] sm:$0xf0] }
  0xb1   :  { %v2380_v0 = vadd.f32 %v937_v56, %v889_v62  ;;  %988 = vmatmul.bf16.gmra.mxu3 %v1344_v57  ;;  %1037 = vmatmul.bf16.gmra.mxu0 %v1348_v58 }
  0xb3   :  { %1135 = vmatmul.bf16.gmra.mxu2 %v1356_v60  ;;  %1086 = vmatmul.bf16.gmra.mxu1 %v1352_v61 }
  0xb4   :  { %v842_v2 = vpop.f32.mrf.mxu3 }
  0xb5   :  { %v843_v3 = vadd.f32 %v2348_v39, %v842_v2 }
  0xb6   :  { %v940_v5 = vpop.f32.mrf.mxu2  ;;  %v2383_v6 = vpop.f32.mrf.mxu0 }
  0xb7   :  { %v892_v8 = vadd.f32 %v891_v63, %v843_v3 }
  0xb8   :  { %v893_v9 = vpop.f32.mrf.mxu1 }
  0xb9   :  { %v2385_v11 = vadd.f32 %v940_v5, %v892_v8  ;;  %v1736_v8 = vld [vmem:[%s2566_s0 + $0x15c] sm:$0xf] }
  0xbc   :  { %v844_v23 = vpop.f32.mrf.mxu3 }
  0xbd   :  { %v845_v24 = vadd.f32 %v2348_v39, %v844_v23 }
  0xbe   :  { %v942_v7 = vpop.f32.mrf.mxu2  ;;  %v876_v27 = vpop.f32.mrf.mxu0 }
  0xbf   :  { %v894_v30 = vadd.f32 %v893_v9, %v845_v24  ;;  %v2413_v31 = vadd.f32 %v876_v27, %v828_v4  ;;  %v1425_v9 = vld [vmem:[%s2566_s0 + $0x174] sm:$0xf0]  ;;  %v1432_v24 = vor.u32 %v1740_v14, %v1431_v12 }
  0xc0   :  { %v896_v32 = vpop.f32.mrf.mxu1  ;;  %v1428_v4 = vor.u32 %v1736_v8, %v1425_v9 }
  0xc1   :  { %v2415_v10 = vadd.f32 %v942_v7, %v894_v30  ;;  %993 = vmatmul.bf16.gmra.mxu3 %v1372_v25  ;;  %1042 = vmatmul.bf16.gmra.mxu0 %v1376_v26  ;;  %v1440_v25 = vor.u32 %v1741_v17, %v1439_v15  ;;  %v1436_v26 = vor.u32 %v1737_v18, %v1433_v20 }
  0xc3   :  { %1140 = vmatmul.bf16.gmra.mxu2 %v1384_v28  ;;  %1091 = vmatmul.bf16.gmra.mxu1 %v1380_v29 }
  0xc4   :  { %v847_v33 = vpop.f32.mrf.mxu3 }
  0xc5   :  { %v848_v13 = vadd.f32 %v2348_v39, %v847_v33 }
  0xc6   :  { %v945_v34 = vpop.f32.mrf.mxu2  ;;  %v2418_v35 = vpop.f32.mrf.mxu0 }
  0xc7   :  { %v897_v16 = vadd.f32 %v896_v32, %v848_v13 }
  0xc8   :  { %v898_v36 = vpop.f32.mrf.mxu1 }
  0xc9   :  { %v2420_v19 = vadd.f32 %v945_v34, %v897_v16 }
  0xcc   :  { %v849_v47 = vpop.f32.mrf.mxu3 }
  0xcd   :  { %v850_v49 = vadd.f32 %v2348_v39, %v849_v47 }
  0xce   :  { %v947_v50 = vpop.f32.mrf.mxu2  ;;  %v881_v53 = vpop.f32.mrf.mxu0 }
  0xcf   :  { %v899_v56 = vadd.f32 %v898_v36, %v850_v49  ;;  %v2448_v57 = vadd.f32 %v881_v53, %v833_v48  ;;  %v1468_v53 = vor.u32 %v1748_v44, %v1467_v42 }
  0xd0   :  { %v901_v58 = vpop.f32.mrf.mxu1 }
  0xd1   :  { %v2450_v60 = vadd.f32 %v947_v50, %v899_v56  ;;  %998 = vmatmul.bf16.gmra.mxu3 %v1400_v51  ;;  %1047 = vmatmul.bf16.gmra.mxu0 %v1404_v52  ;;  %v1456_v50 = vor.u32 %v1743_v37, %v1453_v38  ;;  %v1460_v51 = vor.u32 %v1747_v41, %v1459_v40 }
  0xd3   :  { %1145 = vmatmul.bf16.gmra.mxu2 %v1412_v54  ;;  %1096 = vmatmul.bf16.gmra.mxu1 %v1408_v55  ;;  %v1464_v54 = vor.u32 %v1744_v22, %v1461_v46 }
  0xd4   :  { %v852_v61 = vpop.f32.mrf.mxu3 }
  0xd5   :  { %v853_v59 = vadd.f32 %v2348_v39, %v852_v61 }
  0xd6   :  { %v950_v62 = vpop.f32.mrf.mxu2  ;;  %v2453_v63 = vpop.f32.mrf.mxu0 }
  0xd7   :  { %v902_v2 = vadd.f32 %v901_v58, %v853_v59 }
  0xd8   :  { %v903_v3 = vpop.f32.mrf.mxu1 }
  0xd9   :  { %v2455_v5 = vadd.f32 %v950_v62, %v902_v2 }
  0xdc   :  { %v854_v1 = vpop.f32.mrf.mxu3 }
  0xdd   :  { %v855_v21 = vadd.f32 %v2348_v39, %v854_v1 }
  0xde   :  { %v952_v23 = vpop.f32.mrf.mxu2  ;;  %v925_v7 = vpop.f32.mrf.mxu0 }
  0xdf   :  { %v904_v27 = vadd.f32 %v903_v3, %v855_v21  ;;  %v926_v21 = vadd.f32 %v925_v7, %v2413_v31 }
  0xe0   :  { %v906_v28 = vpop.f32.mrf.mxu1 }
  0xe1   :  { %v2482_v29 = vadd.f32 %v952_v23, %v904_v27  ;;  %1003 = vmatmul.bf16.gmra.mxu3 %v1428_v4  ;;  %1052 = vmatmul.bf16.gmra.mxu0 %v1432_v24 }
  0xe3   :  { %1150 = vmatmul.bf16.gmra.mxu2 %v1440_v25  ;;  %1101 = vmatmul.bf16.gmra.mxu1 %v1436_v26  ;;  %v830_v26 = vadd.f32 %v2348_v39, %v2351_v43 }
  0xe4   :  { %v857_v30 = vpop.f32.mrf.mxu3 }
  0xe5   :  { %v858_v32 = vadd.f32 %v2348_v39, %v857_v30  ;;  %v879_v30 = vadd.f32 %v2418_v35, %v830_v26 }
  0xe6   :  { %v955_v33 = vpop.f32.mrf.mxu2  ;;  %v927_v13 = vpop.f32.mrf.mxu0 }
  0xe7   :  { %v907_v34 = vadd.f32 %v906_v28, %v858_v32  ;;  %v928_v32 = vadd.f32 %v927_v13, %v879_v30 }
  0xe8   :  { %v908_v16 = vpop.f32.mrf.mxu1 }
  0xe9   :  { %v2485_v36 = vadd.f32 %v955_v33, %v907_v34 }
  0xec   :  { %v859_v47 = vpop.f32.mrf.mxu3 }
  0xed   :  { %v860_v48 = vadd.f32 %v2348_v39, %v859_v47 }
  0xee   :  { %v957_v49 = vpop.f32.mrf.mxu2  ;;  %v930_v52 = vpop.f32.mrf.mxu0 }
  0xef   :  { %v909_v55 = vadd.f32 %v908_v16, %v860_v48  ;;  %v931_v42 = vadd.f32 %v930_v52, %v2448_v57  ;;  %v835_v48 = vadd.f32 %v2348_v39, %v2383_v6 }
  0xf0   :  { %v911_v56 = vpop.f32.mrf.mxu1 }
  0xf1   :  { %v2512_v58 = vadd.f32 %v957_v49, %v909_v55  ;;  %1008 = vmatmul.bf16.gmra.mxu3 %v1456_v50  ;;  %1057 = vmatmul.bf16.gmra.mxu0 %v1460_v51  ;;  %v884_v55 = vadd.f32 %v2453_v63, %v835_v48 }
  0xf3   :  { %1155 = vmatmul.bf16.gmra.mxu2 %v1468_v53  ;;  %1106 = vmatmul.bf16.gmra.mxu1 %v1464_v54 }
  0xf4   :  { %v862_v61 = vpop.f32.mrf.mxu3 }
  0xf5   :  { %v863_v59 = vadd.f32 %v2348_v39, %v862_v61 }
  0xf6   :  { %v960_v62 = vpop.f32.mrf.mxu2  ;;  %v932_v2 = vpop.f32.mrf.mxu0 }
  0xf7   :  { %v912_v3 = vadd.f32 %v911_v56, %v863_v59  ;;  %v933_v57 = vadd.f32 %v932_v2, %v884_v55 }
  0xf8   :  { %v913_v8 = vpop.f32.mrf.mxu1 }
  0xf9   :  { %v2515_v9 = vadd.f32 %v960_v62, %v912_v3 }
  0xfc   :  { %v864_v12 = vpop.f32.mrf.mxu3 }
  0xfd   :  { %v865_v14 = vadd.f32 %v2348_v39, %v864_v12 }
  0xfe   :  { %v962_v15 = vpop.f32.mrf.mxu2  ;;  %v1023_v17 = vpop.f32.mrf.mxu0 }
  0xff   :  { %v914_v18 = vadd.f32 %v913_v8, %v865_v14 }
 0x100   :  { %v1072_v20 = vpop.f32.mrf.mxu1 }
 0x101   :  { %v2518_v1 = vadd.f32 %v962_v15, %v914_v18 }
 0x104   :  { %v974_v23 = vpop.f32.mrf.mxu3 }
 0x105   :  { %v975_v4 = vadd.f32 %v974_v23, %v926_v21 }
 0x106   :  { %v1121_v24 = vpop.f32.mrf.mxu2  ;;  %v1025_v25 = vpop.f32.mrf.mxu0 }
 0x107   :  { %v1024_v27 = vadd.f32 %v1023_v17, %v975_v4 }
 0x108   :  { %v1074_v28 = vpop.f32.mrf.mxu1 }
 0x109   :  { %v1073_v33 = vadd.f32 %v1072_v20, %v1024_v27 }
 0x10b   :  { %v1122_v40 = vadd.f32 %v1121_v24, %v1073_v33 }
 0x10c   :  { %v976_v34 = vpop.f32.mrf.mxu3 }
 0x10d   :  { %v977_v16 = vadd.f32 %v976_v34, %v928_v32  ;;  %v1177_v44 = vmul.f32 0.01, %v1122_v40  ;;  %vm1161_vm0 = vcmp.gt.f32.partialorder %v1122_v40, 0.0 }
 0x10e   :  { %v1123_v37 = vpop.f32.mrf.mxu2  ;;  %v1028_v38 = vpop.f32.mrf.mxu0 }
 0x10f   :  { %v1026_v41 = vadd.f32 %v1025_v25, %v977_v16  ;;  %v1193_v49 = vsel %vm1161_vm0, %v1122_v40, %v1177_v44 }
 0x110   :  { %v1077_v31 = vpop.f32.mrf.mxu1 }
 0x111   :  { %v1075_v7 = vadd.f32 %v1074_v28, %v1026_v41 }
 0x113   :  { %v1124_v22 = vadd.f32 %v1123_v37, %v1075_v7 }
 0x114   :  { %v979_v43 = vpop.f32.mrf.mxu3 }
 0x115   :  { %vm1162_vm1 = vcmp.gt.f32.partialorder %v1124_v22, 0.0  ;;  %v1178_v46 = vmul.f32 0.01, %v1124_v22  ;;  %v980_v47 = vadd.f32 %v979_v43, %v931_v42 }
 0x116   :  { %v1126_v35 = vpop.f32.mrf.mxu2  ;;  %v1030_v13 = vpop.f32.mrf.mxu0 }
 0x117   :  { %v1194_v50 = vsel %vm1162_vm1, %v1124_v22, %v1178_v46  ;;  %v1029_v51 = vadd.f32 %v1028_v38, %v980_v47 }
 0x118   :  { %v1079_v53 = vpop.f32.mrf.mxu1  ;;  %v1808_v54 = vpack.c.bf16 %v1194_v50, %v1193_v49 }
 0x119   :  { %v1078_v52 = vadd.f32 %v1077_v31, %v1029_v51 }
 0x11a   :  { %1809 = vst [vmem:[%s2567_s3] sm:$0xff] %v1808_v54  }
 0x11b   :  { %v1127_v3 = vadd.f32 %v1126_v35, %v1078_v52 }
 0x11c   :  { %v981_v56 = vpop.f32.mrf.mxu3 }
 0x11d   :  { %v982_v61 = vadd.f32 %v981_v56, %v933_v57  ;;  %v1179_v12 = vmul.f32 0.01, %v1127_v3  ;;  %vm1163_vm2 = vcmp.gt.f32.partialorder %v1127_v3, 0.0 }
 0x11e   :  { %v1128_v59 = vpop.f32.mrf.mxu2  ;;  %v1033_v62 = vpop.f32.mrf.mxu0 }
 0x11f   :  { %v1031_v8 = vadd.f32 %v1030_v13, %v982_v61  ;;  %v1195_v2 = vsel %vm1163_vm2, %v1127_v3, %v1179_v12 }
 0x120   :  { %v1082_v39 = vpop.f32.mrf.mxu1 }
 0x121   :  { %v1080_v6 = vadd.f32 %v1079_v53, %v1031_v8 }
 0x123   :  { %v1129_v14 = vadd.f32 %v1128_v59, %v1080_v6 }
 0x124   :  { %v984_v15 = vpop.f32.mrf.mxu3 }
 0x125   :  { %vm1164_vm3 = vcmp.gt.f32.partialorder %v1129_v14, 0.0  ;;  %v1180_v63 = vmul.f32 0.01, %v1129_v14  ;;  %v985_v17 = vadd.f32 %v984_v15, %v2353_v45 }
 0x126   :  { %v1131_v18 = vpop.f32.mrf.mxu2  ;;  %v1035_v20 = vpop.f32.mrf.mxu0 }
 0x127   :  { %v1196_v21 = vsel %vm1164_vm3, %v1129_v14, %v1180_v63  ;;  %v1034_v23 = vadd.f32 %v1033_v62, %v985_v17 }
 0x128   :  { %v1084_v4 = vpop.f32.mrf.mxu1  ;;  %v1813_v24 = vpack.c.bf16 %v1196_v21, %v1195_v2 }
 0x129   :  { %v1083_v25 = vadd.f32 %v1082_v39, %v1034_v23 }
 0x12a   :  { %1845 = vst [vmem:[%s2567_s3 + $0x8] sm:$0xff] %v1813_v24  }
 0x12b   :  { %v1132_v32 = vadd.f32 %v1131_v18, %v1083_v25 }
 0x12c   :  { %v986_v26 = vpop.f32.mrf.mxu3 }
 0x12d   :  { %v987_v27 = vadd.f32 %v986_v26, %v2380_v0  ;;  %v1181_v16 = vmul.f32 0.01, %v1132_v32  ;;  %vm1165_vm4 = vcmp.gt.f32.partialorder %v1132_v32, 0.0 }
 0x12e   :  { %v1133_v28 = vpop.f32.mrf.mxu2  ;;  %v1038_v30 = vpop.f32.mrf.mxu0 }
 0x12f   :  { %v1036_v33 = vadd.f32 %v1035_v20, %v987_v27  ;;  %v1197_v42 = vsel %vm1165_vm4, %v1132_v32, %v1181_v16 }
 0x130   :  { %v1087_v45 = vpop.f32.mrf.mxu1 }
 0x131   :  { %v1085_v34 = vadd.f32 %v1084_v4, %v1036_v33 }
 0x133   :  { %v1134_v37 = vadd.f32 %v1133_v28, %v1085_v34 }
 0x134   :  { %v989_v38 = vpop.f32.mrf.mxu3 }
 0x135   :  { %vm1166_vm5 = vcmp.gt.f32.partialorder %v1134_v37, 0.0  ;;  %v1182_v40 = vmul.f32 0.01, %v1134_v37  ;;  %v990_v41 = vadd.f32 %v989_v38, %v2385_v11 }
 0x136   :  { %v1136_v31 = vpop.f32.mrf.mxu2  ;;  %v1040_v7 = vpop.f32.mrf.mxu0 }
 0x137   :  { %v1198_v44 = vsel %vm1166_vm5, %v1134_v37, %v1182_v40  ;;  %v1039_v22 = vadd.f32 %v1038_v30, %v990_v41 }
 0x138   :  { %v1089_v0 = vpop.f32.mrf.mxu1  ;;  %v1818_v43 = vpack.c.bf16 %v1198_v44, %v1197_v42 }
 0x139   :  { %v1088_v46 = vadd.f32 %v1087_v45, %v1039_v22 }
 0x13a   :  { %1846 = vst [vmem:[%s2567_s3 + $0x10] sm:$0xff] %v1818_v43  }
 0x13b   :  { %v1137_v49 = vadd.f32 %v1136_v31, %v1088_v46 }
 0x13c   :  { %v991_v47 = vpop.f32.mrf.mxu3 }
 0x13d   :  { %v992_v35 = vadd.f32 %v991_v47, %v2415_v10  ;;  %v1183_v53 = vmul.f32 0.01, %v1137_v49  ;;  %vm1167_vm6 = vcmp.gt.f32.partialorder %v1137_v49, 0.0 }
 0x13e   :  { %v1138_v13 = vpop.f32.mrf.mxu2  ;;  %v1043_v48 = vpop.f32.mrf.mxu0 }
 0x13f   :  { %v1041_v50 = vadd.f32 %v1040_v7, %v992_v35  ;;  %v1199_v59 = vsel %vm1167_vm6, %v1137_v49, %v1183_v53 }
 0x140   :  { %v1092_v11 = vpop.f32.mrf.mxu1 }
 0x141   :  { %v1090_v51 = vadd.f32 %v1089_v0, %v1041_v50 }
 0x143   :  { %v1139_v54 = vadd.f32 %v1138_v13, %v1090_v51 }
 0x144   :  { %v994_v55 = vpop.f32.mrf.mxu3 }
 0x145   :  { %vm1168_vm7 = vcmp.gt.f32.partialorder %v1139_v54, 0.0  ;;  %v1184_v57 = vmul.f32 0.01, %v1139_v54  ;;  %v995_v52 = vadd.f32 %v994_v55, %v2420_v19 }
 0x146   :  { %v1141_v56 = vpop.f32.mrf.mxu2  ;;  %v1045_v61 = vpop.f32.mrf.mxu0 }
 0x147   :  { %v1200_v62 = vsel %vm1168_vm7, %v1139_v54, %v1184_v57  ;;  %v1044_v3 = vadd.f32 %v1043_v48, %v995_v52 }
 0x148   :  { %v1094_v10 = vpop.f32.mrf.mxu1  ;;  %v1823_v8 = vpack.c.bf16 %v1200_v62, %v1199_v59 }
 0x149   :  { %v1093_v39 = vadd.f32 %v1092_v11, %v1044_v3 }
 0x14a   :  { %1847 = vst [vmem:[%s2567_s3 + $0x18] sm:$0xff] %v1823_v8  }
 0x14b   :  { %v1142_v63 = vadd.f32 %v1141_v56, %v1093_v39 }
 0x14c   :  { %v996_v6 = vpop.f32.mrf.mxu3 }
 0x14d   :  { %v997_v12 = vadd.f32 %v996_v6, %v2450_v60  ;;  %v1185_v20 = vmul.f32 0.01, %v1142_v63  ;;  %vm1169_vm8 = vcmp.gt.f32.partialorder %v1142_v63, 0.0 }
 0x14e   :  { %v1143_v14 = vpop.f32.mrf.mxu2  ;;  %v1048_v15 = vpop.f32.mrf.mxu0 }
 0x14f   :  { %v1046_v17 = vadd.f32 %v1045_v61, %v997_v12  ;;  %v1201_v26 = vsel %vm1169_vm8, %v1142_v63, %v1185_v20 }
 0x150   :  { %v1097_v19 = vpop.f32.mrf.mxu1 }
 0x151   :  { %v1095_v18 = vadd.f32 %v1094_v10, %v1046_v17 }
 0x153   :  { %v1144_v2 = vadd.f32 %v1143_v14, %v1095_v18 }
 0x154   :  { %v999_v21 = vpop.f32.mrf.mxu3 }
 0x155   :  { %vm1170_vm9 = vcmp.gt.f32.partialorder %v1144_v2, 0.0  ;;  %v1186_v23 = vmul.f32 0.01, %v1144_v2  ;;  %v1000_v4 = vadd.f32 %v999_v21, %v2455_v5 }
 0x156   :  { %v1146_v24 = vpop.f32.mrf.mxu2  ;;  %v1050_v25 = vpop.f32.mrf.mxu0 }
 0x157   :  { %v1202_v27 = vsel %vm1170_vm9, %v1144_v2, %v1186_v23  ;;  %v1049_v28 = vadd.f32 %v1048_v15, %v1000_v4 }
 0x158   :  { %v1828_v60 = vpack.c.bf16 %v1202_v27, %v1201_v26  ;;  %v1099_v30 = vpop.f32.mrf.mxu1 }
 0x159   :  { %v1098_v32 = vadd.f32 %v1097_v19, %v1049_v28 }
 0x15a   :  { %1848 = vst [vmem:[%s2567_s3 + $0x20] sm:$0xff] %v1828_v60  }
 0x15b   :  { %v1147_v16 = vadd.f32 %v1146_v24, %v1098_v32 }
 0x15c   :  { %v1001_v33 = vpop.f32.mrf.mxu3 }
 0x15d   :  { %v1002_v45 = vadd.f32 %v1001_v33, %v2482_v29  ;;  %v1187_v41 = vmul.f32 0.01, %v1147_v16  ;;  %vm1171_vm10 = vcmp.gt.f32.partialorder %v1147_v16, 0.0 }
 0x15e   :  { %v1148_v34 = vpop.f32.mrf.mxu2  ;;  %v1053_v38 = vpop.f32.mrf.mxu0 }
 0x15f   :  { %v1051_v37 = vadd.f32 %v1050_v25, %v1002_v45  ;;  %v1203_v0 = vsel %vm1171_vm10, %v1147_v16, %v1187_v41 }
 0x160   :  { %v1102_v40 = vpop.f32.mrf.mxu1 }
 0x161   :  { %v1100_v5 = vadd.f32 %v1099_v30, %v1051_v37 }
 0x163   :  { %v1149_v31 = vadd.f32 %v1148_v34, %v1100_v5 }
 0x164   :  { %v1004_v7 = vpop.f32.mrf.mxu3 }
 0x165   :  { %vm1172_vm11 = vcmp.gt.f32.partialorder %v1149_v31, 0.0  ;;  %v1188_v42 = vmul.f32 0.01, %v1149_v31  ;;  %v1005_v44 = vadd.f32 %v1004_v7, %v2485_v36 }
 0x166   :  { %v1151_v22 = vpop.f32.mrf.mxu2  ;;  %v1055_v29 = vpop.f32.mrf.mxu0 }
 0x167   :  { %v1204_v43 = vsel %vm1172_vm11, %v1149_v31, %v1188_v42  ;;  %v1054_v46 = vadd.f32 %v1053_v38, %v1005_v44 }
 0x168   :  { %v1833_v47 = vpack.c.bf16 %v1204_v43, %v1203_v0  ;;  %v1104_v13 = vpop.f32.mrf.mxu1 }
 0x169   :  { %v1103_v35 = vadd.f32 %v1102_v40, %v1054_v46 }
 0x16a   :  { %1849 = vst [vmem:[%s2567_s3 + $0x28] sm:$0xff] %v1833_v47  }
 0x16b   :  { %v1152_v11 = vadd.f32 %v1151_v22, %v1103_v35 }
 0x16c   :  { %v1006_v48 = vpop.f32.mrf.mxu3 }
 0x16d   :  { %v1007_v49 = vadd.f32 %v1006_v48, %v2512_v58  ;;  %v1189_v36 = vmul.f32 0.01, %v1152_v11  ;;  %vm1173_vm12 = vcmp.gt.f32.partialorder %v1152_v11, 0.0 }
 0x16e   :  { %v1153_v50 = vpop.f32.mrf.mxu2  ;;  %v1058_v55 = vpop.f32.mrf.mxu0 }
 0x16f   :  { %v1056_v51 = vadd.f32 %v1055_v29, %v1007_v49  ;;  %v1205_v59 = vsel %vm1173_vm12, %v1152_v11, %v1189_v36 }
 0x170   :  { %v1107_v61 = vpop.f32.mrf.mxu1 }
 0x171   :  { %v1105_v53 = vadd.f32 %v1104_v13, %v1056_v51 }
 0x173   :  { %v1154_v54 = vadd.f32 %v1153_v50, %v1105_v53 }
 0x174   :  { %v1009_v57 = vpop.f32.mrf.mxu3 }
 0x175   :  { %vm1174_vm13 = vcmp.gt.f32.partialorder %v1154_v54, 0.0  ;;  %v1190_v52 = vmul.f32 0.01, %v1154_v54  ;;  %v1010_v56 = vadd.f32 %v1009_v57, %v2515_v9 }
 0x176   :  { %v1156_v8 = vpop.f32.mrf.mxu2  ;;  %v1060_v12 = vpop.f32.mrf.mxu0 }
 0x177   :  { %v1206_v62 = vsel %vm1174_vm13, %v1154_v54, %v1190_v52  ;;  %v1059_v3 = vadd.f32 %v1058_v55, %v1010_v56 }
 0x178   :  { %v1838_v10 = vpack.c.bf16 %v1206_v62, %v1205_v59  ;;  %v1109_v63 = vpop.f32.mrf.mxu1 }
 0x179   :  { %v1108_v58 = vadd.f32 %v1107_v61, %v1059_v3 }
 0x17a   :  { %1850 = vst [vmem:[%s2567_s3 + $0x30] sm:$0xff] %v1838_v10  }
 0x17b   :  { %v1157_v14 = vadd.f32 %v1156_v8, %v1108_v58 }
 0x17c   :  { %v1011_v39 = vpop.f32.mrf.mxu3 }
 0x17d   :  { %v1012_v6 = vadd.f32 %v1011_v39, %v2518_v1  ;;  %v1191_v19 = vmul.f32 0.01, %v1157_v14  ;;  %vm1175_vm14 = vcmp.gt.f32.partialorder %v1157_v14, 0.0 }
 0x17e   :  { %v1158_v9 = vpop.f32.mrf.mxu2 }
 0x17f   :  { %v1061_v15 = vadd.f32 %v1060_v12, %v1012_v6  ;;  %v1207_v2 = vsel %vm1175_vm14, %v1157_v14, %v1191_v19 }
 0x181   :  { %v1110_v17 = vadd.f32 %v1109_v63, %v1061_v15 }
 0x183   :  { %v1159_v18 = vadd.f32 %v1158_v9, %v1110_v17 }
 0x185   :  { %vm1176_vm15 = vcmp.gt.f32.partialorder %v1159_v18, 0.0  ;;  %v1192_v20 = vmul.f32 0.01, %v1159_v18 }
 0x187   :  { %v1208_v21 = vsel %vm1176_vm15, %v1159_v18, %v1192_v20 }
 0x188   :  { %v1843_v23 = vpack.c.bf16 %v1208_v21, %v1207_v2 }
 0x18a   :  { %1851 = vst [vmem:[%s2567_s3 + $0x38] sm:$0xff] %v1843_v23  }

// kernel: autoencoder_pc_forward.10
= control target key start
LH: loop header
LB: loop body
LE: loop exit
PB: predicated region body
PF: predicated region fallthrough
CT: control target
= control target key end

     0   :  { %s2290_s1 = inlined_call_operand.vmem [shape: bf16[1792,128], index: 1, kind: input, shape index: {}]   ;;  %s2291_s2 = inlined_call_operand.vmem [shape: f32[1,128], index: 2, kind: input, shape index: {}]   ;;  %s2292_s0 = inlined_call_operand.vmem [shape: bf16[16,1792], index: 0, kind: input, shape index: {}]   ;;  %s2293_s3 = inlined_call_operand.vmem [shape: bf16[16,128], index: 3, kind: output, shape index: {}]  }
   0x1   :  { %v1733_v0 = vld [vmem:[%s2290_s1 + $0x38] sm:$0xff]  ;;  %v1732_v4 = vld [vmem:[%s2290_s1 + $0x30] sm:$0xff]  ;;  %v1731_v8 = vld [vmem:[%s2290_s1 + $0x28] sm:$0xff] }
   0x2   :  { %v1741_v1 = vld [vmem:[%s2290_s1 + $0x78] sm:$0xff]  ;;  %998 = vmatpush.bf16.msra.mxu0 %v1733_v0  ;;  %v1740_v5 = vld [vmem:[%s2290_s1 + $0x70] sm:$0xff]  ;;  %v1739_v9 = vld [vmem:[%s2290_s1 + $0x68] sm:$0xff] }
   0x3   :  { %v1749_v2 = vld [vmem:[%s2290_s1 + $0xb8] sm:$0xff]  ;;  %1012 = vmatpush.bf16.msra.mxu1 %v1741_v1  ;;  %v1748_v6 = vld [vmem:[%s2290_s1 + $0xb0] sm:$0xff]  ;;  %v1747_v10 = vld [vmem:[%s2290_s1 + $0xa8] sm:$0xff] }
   0x4   :  { %v1757_v3 = vld [vmem:[%s2290_s1 + $0xf8] sm:$0xff]  ;;  %1026 = vmatpush.bf16.msra.mxu2 %v1749_v2  ;;  %v1756_v7 = vld [vmem:[%s2290_s1 + $0xf0] sm:$0xff]  ;;  %v1755_v11 = vld [vmem:[%s2290_s1 + $0xe8] sm:$0xff] }
   0x5   :  { %1040 = vmatpush.bf16.msra.mxu3 %v1757_v3  ;;  %v1730_v12 = vld [vmem:[%s2290_s1 + $0x20] sm:$0xff]  ;;  %v1729_v16 = vld [vmem:[%s2290_s1 + $0x18] sm:$0xff]  ;;  %v1728_v20 = vld [vmem:[%s2290_s1 + $0x10] sm:$0xff] }
   0x6   :  { %999 = vmatpush.bf16.msra.mxu0 %v1732_v4  ;;  %v1738_v13 = vld [vmem:[%s2290_s1 + $0x60] sm:$0xff]  ;;  %v1737_v17 = vld [vmem:[%s2290_s1 + $0x58] sm:$0xff]  ;;  %v1736_v21 = vld [vmem:[%s2290_s1 + $0x50] sm:$0xff] }
   0x7   :  { %1013 = vmatpush.bf16.msra.mxu1 %v1740_v5  ;;  %v1746_v14 = vld [vmem:[%s2290_s1 + $0xa0] sm:$0xff]  ;;  %v1745_v18 = vld [vmem:[%s2290_s1 + $0x98] sm:$0xff]  ;;  %v1744_v22 = vld [vmem:[%s2290_s1 + $0x90] sm:$0xff] }
   0x8   :  { %1027 = vmatpush.bf16.msra.mxu2 %v1748_v6  ;;  %v1754_v15 = vld [vmem:[%s2290_s1 + $0xe0] sm:$0xff]  ;;  %v1753_v19 = vld [vmem:[%s2290_s1 + $0xd8] sm:$0xff]  ;;  %v1752_v23 = vld [vmem:[%s2290_s1 + $0xd0] sm:$0xff] }
   0x9   :  { %1041 = vmatpush.bf16.msra.mxu3 %v1756_v7  ;;  %v1727_v24 = vld [vmem:[%s2290_s1 + $0x8] sm:$0xff]  ;;  %v1726_v28 = vld [vmem:[%s2290_s1] sm:$0xff]  ;;  %v1765_v31 = vld [vmem:[%s2290_s1 + $0x138] sm:$0xff] }
   0xa   :  { %1000 = vmatpush.bf16.msra.mxu0 %v1731_v8  ;;  %v1735_v25 = vld [vmem:[%s2290_s1 + $0x48] sm:$0xff]  ;;  %v1734_v29 = vld [vmem:[%s2290_s1 + $0x40] sm:$0xff]  ;;  %v1719_v33 = vld [vmem:[%s2292_s0 + $0x34] sm:$0xf0] }
   0xb   :  { %1014 = vmatpush.bf16.msra.mxu1 %v1739_v9  ;;  %v1743_v26 = vld [vmem:[%s2290_s1 + $0x88] sm:$0xff]  ;;  %v1742_v30 = vld [vmem:[%s2290_s1 + $0x80] sm:$0xff]  ;;  %v1773_v34 = vld [vmem:[%s2290_s1 + $0x178] sm:$0xff] }
   0xc   :  { %1028 = vmatpush.bf16.msra.mxu2 %v1747_v10  ;;  %v1751_v27 = vld [vmem:[%s2290_s1 + $0xc8] sm:$0xff]  ;;  %v1210_v32 = vld [vmem:[%s2292_s0] sm:$0xf]  ;;  %v1781_v37 = vld [vmem:[%s2290_s1 + $0x1b8] sm:$0xff] }
   0xd   :  { %1042 = vmatpush.bf16.msra.mxu3 %v1755_v11  ;;  %v1218_v35 = vld [vmem:[%s2292_s0 + $0x8] sm:$0xf]  ;;  %v1720_v36 = vld [vmem:[%s2292_s0 + $0x3c] sm:$0xf0]  ;;  %v1712_v38 = vld [vmem:[%s2292_s0 + $0x4] sm:$0xf]  ;;  %v1211_v41 = vor.u32 %v1719_v33, %v1210_v32 }
   0xe   :  { %1001 = vmatpush.bf16.msra.mxu0 %v1730_v12  ;;  %v1212_v39 = vld [vmem:[%s2292_s0 + $0x38] sm:$0xf0]  ;;  %v1750_v40 = vld [vmem:[%s2290_s1 + $0xc0] sm:$0xff]  ;;  %v1219_v43 = vor.u32 %v1720_v36, %v1218_v35  ;;  %v1713_v44 = vld [vmem:[%s2292_s0 + $0xc] sm:$0xf] }
   0xf   :  { %1015 = vmatpush.bf16.msra.mxu1 %v1738_v13  ;;  %v1789_v42 = vld [vmem:[%s2290_s1 + $0x1f8] sm:$0xff]  ;;  %v1220_v45 = vld [vmem:[%s2292_s0 + $0x40] sm:$0xf0]  ;;  %v1764_v46 = vld [vmem:[%s2290_s1 + $0x130] sm:$0xff]  ;;  %v1215_v47 = vor.u32 %v1712_v38, %v1212_v39 }
  0x10   :  { %1029 = vmatpush.bf16.msra.mxu2 %v1746_v14  ;;  %v1772_v48 = vld [vmem:[%s2290_s1 + $0x170] sm:$0xff]  ;;  %v1223_v50 = vor.u32 %v1713_v44, %v1220_v45  ;;  %v1763_v52 = vld [vmem:[%s2290_s1 + $0x128] sm:$0xff]  ;;  %v1762_v56 = vld [vmem:[%s2290_s1 + $0x120] sm:$0xff] }
  0x11   :  { %1043 = vmatpush.bf16.msra.mxu3 %v1754_v15  ;;  %v1780_v49 = vld [vmem:[%s2290_s1 + $0x1b0] sm:$0xff]  ;;  %v1771_v53 = vld [vmem:[%s2290_s1 + $0x168] sm:$0xff]  ;;  %v1770_v57 = vld [vmem:[%s2290_s1 + $0x160] sm:$0xff] }
  0x12   :  { %1002 = vmatpush.bf16.msra.mxu0 %v1729_v16  ;;  %v1788_v51 = vld [vmem:[%s2290_s1 + $0x1f0] sm:$0xff]  ;;  %v1779_v54 = vld [vmem:[%s2290_s1 + $0x1a8] sm:$0xff]  ;;  %v1778_v58 = vld [vmem:[%s2290_s1 + $0x1a0] sm:$0xff] }
  0x13   :  { %1016 = vmatpush.bf16.msra.mxu1 %v1737_v17  ;;  %v1787_v55 = vld [vmem:[%s2290_s1 + $0x1e8] sm:$0xff]  ;;  %v1786_v59 = vld [vmem:[%s2290_s1 + $0x1e0] sm:$0xff]  ;;  %v1761_v60 = vld [vmem:[%s2290_s1 + $0x118] sm:$0xff] }
  0x14   :  { %1030 = vmatpush.bf16.msra.mxu2 %v1745_v18  ;;  %v1769_v61 = vld [vmem:[%s2290_s1 + $0x158] sm:$0xff]  ;;  %v1760_v0 = vld [vmem:[%s2290_s1 + $0x110] sm:$0xff]  ;;  %v1759_v4 = vld [vmem:[%s2290_s1 + $0x108] sm:$0xff] }
  0x15   :  { %1044 = vmatpush.bf16.msra.mxu3 %v1753_v19  ;;  %v1777_v62 = vld [vmem:[%s2290_s1 + $0x198] sm:$0xff]  ;;  %v1768_v1 = vld [vmem:[%s2290_s1 + $0x150] sm:$0xff]  ;;  %v1767_v5 = vld [vmem:[%s2290_s1 + $0x148] sm:$0xff] }
  0x16   :  { %1003 = vmatpush.bf16.msra.mxu0 %v1728_v20  ;;  %v1785_v63 = vld [vmem:[%s2290_s1 + $0x1d8] sm:$0xff]  ;;  %v1776_v2 = vld [vmem:[%s2290_s1 + $0x190] sm:$0xff]  ;;  %v1775_v6 = vld [vmem:[%s2290_s1 + $0x188] sm:$0xff] }
  0x17   :  { %1017 = vmatpush.bf16.msra.mxu1 %v1736_v21  ;;  %v1784_v3 = vld [vmem:[%s2290_s1 + $0x1d0] sm:$0xff]  ;;  %v1783_v7 = vld [vmem:[%s2290_s1 + $0x1c8] sm:$0xff]  ;;  %v1758_v8 = vld [vmem:[%s2290_s1 + $0x100] sm:$0xff] }
  0x18   :  { %1031 = vmatpush.bf16.msra.mxu2 %v1744_v22  ;;  %v1766_v9 = vld [vmem:[%s2290_s1 + $0x140] sm:$0xff]  ;;  %v1797_v11 = vld [vmem:[%s2290_s1 + $0x238] sm:$0xff]  ;;  %v1226_v13 = vld [vmem:[%s2292_s0 + $0x10] sm:$0xf] }
  0x19   :  { %1045 = vmatpush.bf16.msra.mxu3 %v1752_v23  ;;  %v1774_v10 = vld [vmem:[%s2290_s1 + $0x180] sm:$0xff]  ;;  %v1805_v12 = vld [vmem:[%s2290_s1 + $0x278] sm:$0xff]  ;;  %v1721_v14 = vld [vmem:[%s2292_s0 + $0x44] sm:$0xf0] }
  0x1a   :  { %1004 = vmatpush.bf16.msra.mxu0 %v1727_v24  ;;  %v1234_v15 = vld [vmem:[%s2292_s0 + $0x18] sm:$0xf]  ;;  %v1722_v16 = vld [vmem:[%s2292_s0 + $0x4c] sm:$0xf0]  ;;  %v1714_v18 = vld [vmem:[%s2292_s0 + $0x14] sm:$0xf]  ;;  %v1227_v23 = vor.u32 %v1721_v14, %v1226_v13 }
  0x1b   :  { %1018 = vmatpush.bf16.msra.mxu1 %v1735_v25  ;;  %v1813_v17 = vld [vmem:[%s2290_s1 + $0x2b8] sm:$0xff]  ;;  %v1228_v19 = vld [vmem:[%s2292_s0 + $0x48] sm:$0xf0]  ;;  %v1782_v20 = vld [vmem:[%s2290_s1 + $0x1c0] sm:$0xff]  ;;  %v1235_v24 = vor.u32 %v1722_v16, %v1234_v15 }
  0x1c   :  { %1032 = vmatpush.bf16.msra.mxu2 %v1743_v26  ;;  %v1715_v21 = vld [vmem:[%s2292_s0 + $0x1c] sm:$0xf]  ;;  %v1236_v22 = vld [vmem:[%s2292_s0 + $0x50] sm:$0xf0]  ;;  %v1231_v26 = vor.u32 %v1714_v18, %v1228_v19  ;;  %v1795_v32 = vld [vmem:[%s2290_s1 + $0x228] sm:$0xff] }
  0x1d   :  { %1046 = vmatpush.bf16.msra.mxu3 %v1751_v27  ;;  %v1821_v25 = vld [vmem:[%s2290_s1 + $0x2f8] sm:$0xff]  ;;  %v1239_v27 = vor.u32 %v1715_v21, %v1236_v22  ;;  %v1803_v33 = vld [vmem:[%s2290_s1 + $0x268] sm:$0xff]  ;;  %v1794_v36 = vld [vmem:[%s2290_s1 + $0x220] sm:$0xff] }
  0x1e   :  { %1005 = vmatpush.bf16.msra.mxu0 %v1726_v28  ;;  %v1796_v28 = vld [vmem:[%s2290_s1 + $0x230] sm:$0xff]  ;;  %v1819_v35 = vld [vmem:[%s2290_s1 + $0x2e8] sm:$0xff]  ;;  %v1810_v38 = vld [vmem:[%s2290_s1 + $0x2a0] sm:$0xff] }
  0x1f   :  { %1019 = vmatpush.bf16.msra.mxu1 %v1734_v29  ;;  %v1804_v29 = vld [vmem:[%s2290_s1 + $0x270] sm:$0xff]  ;;  %v1818_v39 = vld [vmem:[%s2290_s1 + $0x2e0] sm:$0xff]  ;;  %v1833_v13 = vld [vmem:[%s2290_s1 + $0x358] sm:$0xff] }
  0x20   :  { %1033 = vmatpush.bf16.msra.mxu2 %v1742_v30  ;;  %v1812_v30 = vld [vmem:[%s2290_s1 + $0x2b0] sm:$0xff]  ;;  %v1823_v16 = vld [vmem:[%s2290_s1 + $0x308] sm:$0xff]  ;;  %v1822_v18 = vld [vmem:[%s2290_s1 + $0x300] sm:$0xff] }
  0x21   :  { %1047 = vmatpush.bf16.msra.mxu3 %v1750_v40  ;;  %1006 = vmatmul.bf16.vlgmr.msra.gmra.mxu0 %v1211_v41  ;;  %v1793_v40 = vld [vmem:[%s2290_s1 + $0x218] sm:$0xff]  ;;  %v1792_v44 = vld [vmem:[%s2290_s1 + $0x210] sm:$0xff]  ;;  %v1830_v21 = vld [vmem:[%s2290_s1 + $0x340] sm:$0xff] }
  0x22   :  { %1054 = vmatpush.bf16.msrb.mxu0 %v1765_v31  ;;  %1020 = vmatmul.bf16.vlgmr.msra.gmra.mxu1 %v1215_v47  ;;  %v1820_v31 = vld [vmem:[%s2290_s1 + $0x2f0] sm:$0xff]  ;;  %v1801_v41 = vld [vmem:[%s2290_s1 + $0x258] sm:$0xff] }
  0x23   :  { %1068 = vmatpush.bf16.msrb.mxu1 %v1773_v34  ;;  %1034 = vmatmul.bf16.vlgmr.msra.gmra.mxu2 %v1219_v43  ;;  %v1811_v34 = vld [vmem:[%s2290_s1 + $0x2a8] sm:$0xff]  ;;  %v1817_v43 = vld [vmem:[%s2290_s1 + $0x2d8] sm:$0xff]  ;;  %v1800_v45 = vld [vmem:[%s2290_s1 + $0x250] sm:$0xff] }
  0x24   :  { %1082 = vmatpush.bf16.msrb.mxu2 %v1781_v37  ;;  %1048 = vmatmul.bf16.vlgmr.msra.gmra.mxu3 %v1223_v50  ;;  %v1802_v37 = vld [vmem:[%s2290_s1 + $0x260] sm:$0xff]  ;;  %v1816_v47 = vld [vmem:[%s2290_s1 + $0x2d0] sm:$0xff]  ;;  %v1807_v50 = vld [vmem:[%s2290_s1 + $0x288] sm:$0xff] }
  0x25   :  { %1096 = vmatpush.bf16.msrb.mxu3 %v1789_v42  ;;  %v1809_v42 = vld [vmem:[%s2290_s1 + $0x298] sm:$0xff]  ;;  %v1824_v14 = vld [vmem:[%s2290_s1 + $0x310] sm:$0xff] }
  0x26   :  { %1055 = vmatpush.bf16.msrb.mxu0 %v1764_v46  ;;  %v1808_v46 = vld [vmem:[%s2290_s1 + $0x290] sm:$0xff] }
  0x27   :  { %1069 = vmatpush.bf16.msrb.mxu1 %v1772_v48  ;;  %v1791_v48 = vld [vmem:[%s2290_s1 + $0x208] sm:$0xff]  ;;  %v1832_v15 = vld [vmem:[%s2290_s1 + $0x350] sm:$0xff] }
  0x28   :  { %1083 = vmatpush.bf16.msrb.mxu2 %v1780_v49  ;;  %v1799_v49 = vld [vmem:[%s2290_s1 + $0x248] sm:$0xff]  ;;  %v1258_v19 = vld [vmem:[%s2292_s0 + $0x30] sm:$0xf]  ;;  %v1718_v22 = vld [vmem:[%s2292_s0 + $0x34] sm:$0xf] }
  0x29   :  { %1097 = vmatpush.bf16.msrb.mxu3 %v1788_v51  ;;  %v1815_v51 = vld [vmem:[%s2290_s1 + $0x2c8] sm:$0xff] }
  0x2a   :  { %1056 = vmatpush.bf16.msrb.mxu0 %v1763_v52  ;;  %v1790_v52 = vld [vmem:[%s2290_s1 + $0x200] sm:$0xff] }
  0x2b   :  { %1070 = vmatpush.bf16.msrb.mxu1 %v1771_v53  ;;  %v1798_v53 = vld [vmem:[%s2290_s1 + $0x240] sm:$0xff] }
  0x2c   :  { %1084 = vmatpush.bf16.msrb.mxu2 %v1779_v54  ;;  %v1806_v54 = vld [vmem:[%s2290_s1 + $0x280] sm:$0xff] }
  0x2d   :  { %1098 = vmatpush.bf16.msrb.mxu3 %v1787_v55  ;;  %v1242_v55 = vld [vmem:[%s2292_s0 + $0x20] sm:$0xf] }
  0x2e   :  { %1057 = vmatpush.bf16.msrb.mxu0 %v1762_v56  ;;  %v1723_v56 = vld [vmem:[%s2292_s0 + $0x54] sm:$0xf0] }
  0x2f   :  { %1071 = vmatpush.bf16.msrb.mxu1 %v1770_v57  ;;  %v1250_v57 = vld [vmem:[%s2292_s0 + $0x28] sm:$0xf] }
  0x30   :  { %1085 = vmatpush.bf16.msrb.mxu2 %v1778_v58  ;;  %v1724_v58 = vld [vmem:[%s2292_s0 + $0x5c] sm:$0xf0] }
  0x31   :  { %1099 = vmatpush.bf16.msrb.mxu3 %v1786_v59  ;;  %v1716_v59 = vld [vmem:[%s2292_s0 + $0x24] sm:$0xf] }
  0x32   :  { %1058 = vmatpush.bf16.msrb.mxu0 %v1761_v60  ;;  %v1244_v60 = vld [vmem:[%s2292_s0 + $0x58] sm:$0xf0] }
  0x33   :  { %1072 = vmatpush.bf16.msrb.mxu1 %v1769_v61  ;;  %v1829_v61 = vld [vmem:[%s2290_s1 + $0x338] sm:$0xff] }
  0x34   :  { %1086 = vmatpush.bf16.msrb.mxu2 %v1777_v62  ;;  %v1837_v62 = vld [vmem:[%s2290_s1 + $0x378] sm:$0xff] }
  0x35   :  { %1100 = vmatpush.bf16.msrb.mxu3 %v1785_v63  ;;  %v1814_v63 = vld [vmem:[%s2290_s1 + $0x2c0] sm:$0xff] }
  0x36   :  { %1059 = vmatpush.bf16.msrb.mxu0 %v1760_v0  ;;  %v1243_v0 = vor.u32 %v1723_v56, %v1242_v55 }
  0x37   :  { %1073 = vmatpush.bf16.msrb.mxu1 %v1768_v1  ;;  %v1717_v1 = vld [vmem:[%s2292_s0 + $0x2c] sm:$0xf] }
  0x38   :  { %1087 = vmatpush.bf16.msrb.mxu2 %v1776_v2  ;;  %v1252_v2 = vld [vmem:[%s2292_s0 + $0x60] sm:$0xf0] }
  0x39   :  { %1101 = vmatpush.bf16.msrb.mxu3 %v1784_v3  ;;  %v1251_v3 = vor.u32 %v1724_v58, %v1250_v57 }
  0x3a   :  { %1060 = vmatpush.bf16.msrb.mxu0 %v1759_v4  ;;  %v1247_v4 = vor.u32 %v1716_v59, %v1244_v60 }
  0x3b   :  { %1074 = vmatpush.bf16.msrb.mxu1 %v1767_v5  ;;  %v1255_v5 = vor.u32 %v1717_v1, %v1252_v2 }
  0x3c   :  { %1088 = vmatpush.bf16.msrb.mxu2 %v1775_v6  ;;  %v1828_v6 = vld [vmem:[%s2290_s1 + $0x330] sm:$0xff] }
  0x3d   :  { %1102 = vmatpush.bf16.msrb.mxu3 %v1783_v7  ;;  %v1836_v7 = vld [vmem:[%s2290_s1 + $0x370] sm:$0xff] }
  0x3e   :  { %1061 = vmatpush.bf16.msrb.mxu0 %v1758_v8  ;;  %v1827_v8 = vld [vmem:[%s2290_s1 + $0x328] sm:$0xff] }
  0x3f   :  { %1075 = vmatpush.bf16.msrb.mxu1 %v1766_v9  ;;  %v1835_v9 = vld [vmem:[%s2290_s1 + $0x368] sm:$0xff] }
  0x40   :  { %1089 = vmatpush.bf16.msrb.mxu2 %v1774_v10  ;;  %v1826_v10 = vld [vmem:[%s2290_s1 + $0x320] sm:$0xff] }
  0x41   :  { %1103 = vmatpush.bf16.msrb.mxu3 %v1782_v20  ;;  %1062 = vmatmul.bf16.vlgmr.msrb.gmra.mxu0 %v1227_v23  ;;  %v1725_v20 = vld [vmem:[%s2292_s0 + $0x64] sm:$0xf0]  ;;  %v1260_v23 = vld [vmem:[%s2292_s0 + $0x68] sm:$0xf0] }
  0x42   :  { %1110 = vmatpush.bf16.msra.mxu0 %v1797_v11  ;;  %1076 = vmatmul.bf16.vlgmr.msrb.gmra.mxu1 %v1231_v26  ;;  %v1834_v11 = vld [vmem:[%s2290_s1 + $0x360] sm:$0xff] }
  0x43   :  { %1124 = vmatpush.bf16.msra.mxu1 %v1805_v12  ;;  %1090 = vmatmul.bf16.vlgmr.msrb.gmra.mxu2 %v1235_v24  ;;  %v1825_v12 = vld [vmem:[%s2290_s1 + $0x318] sm:$0xff]  ;;  %v1259_v24 = vor.u32 %v1725_v20, %v1258_v19 }
  0x44   :  { %1138 = vmatpush.bf16.msra.mxu2 %v1813_v17  ;;  %1104 = vmatmul.bf16.vlgmr.msrb.gmra.mxu3 %v1239_v27  ;;  %v1831_v17 = vld [vmem:[%s2290_s1 + $0x348] sm:$0xff] }
  0x45   :  { %1152 = vmatpush.bf16.msra.mxu3 %v1821_v25  ;;  %v1263_v25 = vor.u32 %v1718_v22, %v1260_v23 }
  0x46   :  { %1111 = vmatpush.bf16.msra.mxu0 %v1796_v28 }
  0x47   :  { %1125 = vmatpush.bf16.msra.mxu1 %v1804_v29 }
  0x48   :  { %1139 = vmatpush.bf16.msra.mxu2 %v1812_v30 }
  0x49   :  { %1153 = vmatpush.bf16.msra.mxu3 %v1820_v31 }
  0x4a   :  { %1112 = vmatpush.bf16.msra.mxu0 %v1795_v32  ;;  %v1843_v32 = vld [vmem:[%s2291_s2] ss:$0 sm:$0xff] }
  0x4b   :  { %1126 = vmatpush.bf16.msra.mxu1 %v1803_v33 }
  0x4c   :  { %1140 = vmatpush.bf16.msra.mxu2 %v1811_v34 }
  0x4d   :  { %1154 = vmatpush.bf16.msra.mxu3 %v1819_v35 }
  0x4e   :  { %1113 = vmatpush.bf16.msra.mxu0 %v1794_v36 }
  0x4f   :  { %1127 = vmatpush.bf16.msra.mxu1 %v1802_v37 }
  0x50   :  { %1141 = vmatpush.bf16.msra.mxu2 %v1810_v38 }
  0x51   :  { %1155 = vmatpush.bf16.msra.mxu3 %v1818_v39 }
  0x52   :  { %1114 = vmatpush.bf16.msra.mxu0 %v1793_v40 }
  0x53   :  { %1128 = vmatpush.bf16.msra.mxu1 %v1801_v41 }
  0x54   :  { %1142 = vmatpush.bf16.msra.mxu2 %v1809_v42 }
  0x55   :  { %1156 = vmatpush.bf16.msra.mxu3 %v1817_v43 }
  0x56   :  { %1115 = vmatpush.bf16.msra.mxu0 %v1792_v44 }
  0x57   :  { %1129 = vmatpush.bf16.msra.mxu1 %v1800_v45 }
  0x58   :  { %1143 = vmatpush.bf16.msra.mxu2 %v1808_v46 }
  0x59   :  { %1157 = vmatpush.bf16.msra.mxu3 %v1816_v47 }
  0x5a   :  { %1116 = vmatpush.bf16.msra.mxu0 %v1791_v48 }
  0x5b   :  { %1130 = vmatpush.bf16.msra.mxu1 %v1799_v49 }
  0x5c   :  { %1144 = vmatpush.bf16.msra.mxu2 %v1807_v50 }
  0x5d   :  { %1158 = vmatpush.bf16.msra.mxu3 %v1815_v51 }
  0x5e   :  { %1117 = vmatpush.bf16.msra.mxu0 %v1790_v52 }
  0x5f   :  { %1131 = vmatpush.bf16.msra.mxu1 %v1798_v53 }
  0x60   :  { %1145 = vmatpush.bf16.msra.mxu2 %v1806_v54 }
  0x61   :  { %1159 = vmatpush.bf16.msra.mxu3 %v1814_v63  ;;  %1118 = vmatmul.bf16.vlgmr.msra.gmra.mxu0 %v1243_v0 }
  0x62   :  { %1166 = vmatpush.bf16.msrb.mxu0 %v1829_v61  ;;  %1132 = vmatmul.bf16.vlgmr.msra.gmra.mxu1 %v1247_v4 }
  0x63   :  { %1180 = vmatpush.bf16.msrb.mxu1 %v1837_v62  ;;  %1146 = vmatmul.bf16.vlgmr.msra.gmra.mxu2 %v1251_v3 }
  0x64   :  { %1160 = vmatmul.bf16.vlgmr.msra.gmra.mxu3 %v1255_v5 }
  0x66   :  { %1167 = vmatpush.bf16.msrb.mxu0 %v1828_v6 }
  0x67   :  { %1181 = vmatpush.bf16.msrb.mxu1 %v1836_v7 }
  0x6a   :  { %1168 = vmatpush.bf16.msrb.mxu0 %v1827_v8 }
  0x6b   :  { %1182 = vmatpush.bf16.msrb.mxu1 %v1835_v9 }
  0x6e   :  { %1169 = vmatpush.bf16.msrb.mxu0 %v1826_v10 }
  0x6f   :  { %1183 = vmatpush.bf16.msrb.mxu1 %v1834_v11 }
  0x72   :  { %1170 = vmatpush.bf16.msrb.mxu0 %v1825_v12 }
  0x73   :  { %1184 = vmatpush.bf16.msrb.mxu1 %v1833_v13 }
  0x76   :  { %1171 = vmatpush.bf16.msrb.mxu0 %v1824_v14 }
  0x77   :  { %1185 = vmatpush.bf16.msrb.mxu1 %v1832_v15 }
  0x7a   :  { %1172 = vmatpush.bf16.msrb.mxu0 %v1823_v16 }
  0x7b   :  { %1186 = vmatpush.bf16.msrb.mxu1 %v1831_v17 }
  0x7e   :  { %1173 = vmatpush.bf16.msrb.mxu0 %v1822_v18 }
  0x7f   :  { %1187 = vmatpush.bf16.msrb.mxu1 %v1830_v21 }
  0x81   :  { %1174 = vmatmul.bf16.vlgmr.msrb.gmra.mxu0 %v1259_v24 }
  0x82   :  { %1188 = vmatmul.bf16.vlgmr.msrb.gmra.mxu1 %v1263_v25 }
  0x9e   :  { %v1007_v26 = vpop.f32.mrf.mxu0 }
  0x9f   :  { %v1021_v27 = vpop.f32.mrf.mxu1  ;;  %v1008_v33 = vadd.f32 %v1843_v32, %v1007_v26 }
  0xa1   :  { %v1022_v36 = vadd.f32 %v1021_v27, %v1008_v33 }
  0xa6   :  { %v1035_v28 = vpop.f32.mrf.mxu2  ;;  %v1009_v29 = vpop.f32.mrf.mxu0 }
  0xa7   :  { %v1023_v30 = vpop.f32.mrf.mxu1  ;;  %v1049_v31 = vpop.f32.mrf.mxu3  ;;  %v1036_v39 = vadd.f32 %v1035_v28, %v1022_v36  ;;  %v1010_v40 = vadd.f32 %v1843_v32, %v1009_v29 }
  0xa9   :  { %v1050_v42 = vadd.f32 %v1049_v31, %v1036_v39  ;;  %v1024_v44 = vadd.f32 %v1023_v30, %v1010_v40 }
  0xae   :  { %v1037_v34 = vpop.f32.mrf.mxu2 }
  0xaf   :  { %v1051_v38 = vpop.f32.mrf.mxu3  ;;  %v1038_v48 = vadd.f32 %v1037_v34, %v1024_v44 }
  0xb1   :  { %v1052_v52 = vadd.f32 %v1051_v38, %v1038_v48 }
  0xbe   :  { %v1063_v35 = vpop.f32.mrf.mxu0 }
  0xbf   :  { %v1077_v37 = vpop.f32.mrf.mxu1  ;;  %v1064_v47 = vadd.f32 %v1063_v35, %v1050_v42 }
  0xc1   :  { %v1078_v49 = vadd.f32 %v1077_v37, %v1064_v47 }
  0xc6   :  { %v1091_v41 = vpop.f32.mrf.mxu2  ;;  %v1065_v43 = vpop.f32.mrf.mxu0 }
  0xc7   :  { %v1079_v45 = vpop.f32.mrf.mxu1  ;;  %v1105_v46 = vpop.f32.mrf.mxu3  ;;  %v1092_v54 = vadd.f32 %v1091_v41, %v1078_v49  ;;  %v1066_v55 = vadd.f32 %v1065_v43, %v1052_v52 }
  0xc9   :  { %v1106_v57 = vadd.f32 %v1105_v46, %v1092_v54  ;;  %v1080_v58 = vadd.f32 %v1079_v45, %v1066_v55 }
  0xce   :  { %v1093_v50 = vpop.f32.mrf.mxu2 }
  0xcf   :  { %v1107_v56 = vpop.f32.mrf.mxu3  ;;  %v1094_v60 = vadd.f32 %v1093_v50, %v1080_v58 }
  0xd1   :  { %v1108_v1 = vadd.f32 %v1107_v56, %v1094_v60 }
  0xde   :  { %v1119_v51 = vpop.f32.mrf.mxu0 }
  0xdf   :  { %v1133_v53 = vpop.f32.mrf.mxu1  ;;  %v1120_v61 = vadd.f32 %v1119_v51, %v1106_v57 }
  0xe1   :  { %v1134_v2 = vadd.f32 %v1133_v53, %v1120_v61 }
  0xe6   :  { %v1147_v59 = vpop.f32.mrf.mxu2  ;;  %v1121_v62 = vpop.f32.mrf.mxu0 }
  0xe7   :  { %v1135_v63 = vpop.f32.mrf.mxu1  ;;  %v1161_v0 = vpop.f32.mrf.mxu3  ;;  %v1148_v3 = vadd.f32 %v1147_v59, %v1134_v2  ;;  %v1122_v4 = vadd.f32 %v1121_v62, %v1108_v1 }
  0xe9   :  { %v1162_v7 = vadd.f32 %v1161_v0, %v1148_v3  ;;  %v1136_v8 = vadd.f32 %v1135_v63, %v1122_v4 }
  0xee   :  { %v1149_v5 = vpop.f32.mrf.mxu2 }
  0xef   :  { %v1150_v10 = vadd.f32 %v1149_v5, %v1136_v8  ;;  %v1163_v12 = vpop.f32.mrf.mxu3 }
  0xf1   :  { %v1164_v13 = vadd.f32 %v1163_v12, %v1150_v10 }
  0xfe   :  { %v1175_v6 = vpop.f32.mrf.mxu0 }
  0xff   :  { %v1189_v9 = vpop.f32.mrf.mxu1  ;;  %v1176_v11 = vadd.f32 %v1175_v6, %v1162_v7 }
 0x101   :  { %v1190_v14 = vadd.f32 %v1189_v9, %v1176_v11 }
 0x103   :  { %v1196_v18 = vmul.f32 0.01, %v1190_v14  ;;  %vm1194_vm0 = vcmp.gt.f32.partialorder %v1190_v14, 0.0 }
 0x105   :  { %v1198_v21 = vsel %vm1194_vm0, %v1190_v14, %v1196_v18 }
 0x106   :  { %v1177_v15 = vpop.f32.mrf.mxu0 }
 0x107   :  { %v1178_v16 = vadd.f32 %v1177_v15, %v1164_v13  ;;  %v1191_v17 = vpop.f32.mrf.mxu1 }
 0x109   :  { %v1192_v19 = vadd.f32 %v1191_v17, %v1178_v16 }
 0x10b   :  { %vm1195_vm1 = vcmp.gt.f32.partialorder %v1192_v19, 0.0  ;;  %v1197_v20 = vmul.f32 0.01, %v1192_v19 }
 0x10d   :  { %v1199_v22 = vsel %vm1195_vm1, %v1192_v19, %v1197_v20 }
 0x10e   :  { %v1841_v23 = vpack.c.bf16 %v1199_v22, %v1198_v21 }
 0x110   :  { %1842 = vst [vmem:[%s2293_s3] sm:$0xff] %v1841_v23  }

// kernel: autoencoder_pc_forward.12
= control target key start
LH: loop header
LB: loop body
LE: loop exit
PB: predicated region body
PF: predicated region fallthrough
CT: control target
= control target key end

     0   :  { %s1341_s1 = inlined_call_operand.vmem [shape: bf16[256,512], index: 1, kind: input, shape index: {}]   ;;  %s1342_s0 = inlined_call_operand.vmem [shape: bf16[16,256], index: 0, kind: input, shape index: {}]   ;;  %s1343_s2 = inlined_call_operand.vmem [shape: f32[1,512], index: 2, kind: input, shape index: {}]   ;;  %s1344_s3 = inlined_call_operand.vmem [shape: bf16[16,512], index: 3, kind: output, shape index: {}]  }
   0x1   :  { %v690_v0 = vld [vmem:[%s1341_s1 + $0xe0] sm:$0xf]  ;;  %v864_v1 = vld [vmem:[%s1341_s1 + $0xec] sm:$0xf0]  ;;  %v862_v5 = vld [vmem:[%s1341_s1 + $0xe4] sm:$0xf] }
   0x2   :  { %v818_v2 = vld [vmem:[%s1341_s1 + $0x1e0] sm:$0xf]  ;;  %v691_v3 = vor.u32 %v864_v1, %v690_v0  ;;  %v896_v4 = vld [vmem:[%s1341_s1 + $0x1ec] sm:$0xf0]  ;;  %v692_v6 = vld [vmem:[%s1341_s1 + $0xf0] sm:$0xf0] }
   0x3   :  { %v819_v7 = vor.u32 %v896_v4, %v818_v2  ;;  %v695_v8 = vor.u32 %v862_v5, %v692_v6  ;;  %v894_v9 = vld [vmem:[%s1341_s1 + $0x1e4] sm:$0xf]  ;;  %v820_v10 = vld [vmem:[%s1341_s1 + $0x1f0] sm:$0xf0]  ;;  %v674_v11 = vld [vmem:[%s1341_s1 + $0xc0] sm:$0xf] }
   0x4   :  { %420 = vmatpush.bf16.msra.mxu0 %v691_v3  ;;  %v823_v12 = vor.u32 %v894_v9, %v820_v10  ;;  %v860_v13 = vld [vmem:[%s1341_s1 + $0xcc] sm:$0xf0]  ;;  %v802_v14 = vld [vmem:[%s1341_s1 + $0x1c0] sm:$0xf]  ;;  %v858_v18 = vld [vmem:[%s1341_s1 + $0xc4] sm:$0xf] }
   0x5   :  { %v892_v15 = vld [vmem:[%s1341_s1 + $0x1cc] sm:$0xf0]  ;;  %434 = vmatpush.bf16.msra.mxu1 %v819_v7  ;;  %448 = vmatpush.bf16.msra.mxu2 %v695_v8  ;;  %v675_v16 = vor.u32 %v860_v13, %v674_v11  ;;  %v676_v19 = vld [vmem:[%s1341_s1 + $0xd0] sm:$0xf0]  ;;  %v890_v20 = vld [vmem:[%s1341_s1 + $0x1c4] sm:$0xf] }
   0x6   :  { %v803_v17 = vor.u32 %v892_v15, %v802_v14  ;;  %462 = vmatpush.bf16.msra.mxu3 %v823_v12  ;;  %v679_v21 = vor.u32 %v858_v18, %v676_v19  ;;  %v804_v22 = vld [vmem:[%s1341_s1 + $0x1d0] sm:$0xf0]  ;;  %v658_v23 = vld [vmem:[%s1341_s1 + $0xa0] sm:$0xf]  ;;  %v856_v24 = vld [vmem:[%s1341_s1 + $0xac] sm:$0xf0] }
   0x7   :  { %v807_v25 = vor.u32 %v890_v20, %v804_v22  ;;  %v786_v26 = vld [vmem:[%s1341_s1 + $0x1a0] sm:$0xf]  ;;  %v888_v27 = vld [vmem:[%s1341_s1 + $0x1ac] sm:$0xf0]  ;;  %v854_v28 = vld [vmem:[%s1341_s1 + $0xa4] sm:$0xf]  ;;  %v659_v29 = vor.u32 %v856_v24, %v658_v23 }
   0x8   :  { %421 = vmatpush.bf16.msra.mxu0 %v675_v16  ;;  %v660_v30 = vld [vmem:[%s1341_s1 + $0xb0] sm:$0xf0]  ;;  %v886_v31 = vld [vmem:[%s1341_s1 + $0x1a4] sm:$0xf]  ;;  %v787_v33 = vor.u32 %v888_v27, %v786_v26  ;;  %v642_v35 = vld [vmem:[%s1341_s1 + $0x80] sm:$0xf] }
   0x9   :  { %v788_v32 = vld [vmem:[%s1341_s1 + $0x1b0] sm:$0xf0]  ;;  %435 = vmatpush.bf16.msra.mxu1 %v803_v17  ;;  %449 = vmatpush.bf16.msra.mxu2 %v679_v21  ;;  %v663_v34 = vor.u32 %v854_v28, %v660_v30  ;;  %v852_v36 = vld [vmem:[%s1341_s1 + $0x8c] sm:$0xf0]  ;;  %v770_v37 = vld [vmem:[%s1341_s1 + $0x180] sm:$0xf] }
   0xa   :  { %463 = vmatpush.bf16.msra.mxu3 %v807_v25  ;;  %v791_v38 = vor.u32 %v886_v31, %v788_v32  ;;  %v884_v39 = vld [vmem:[%s1341_s1 + $0x18c] sm:$0xf0]  ;;  %v850_v40 = vld [vmem:[%s1341_s1 + $0x84] sm:$0xf]  ;;  %v644_v41 = vld [vmem:[%s1341_s1 + $0x90] sm:$0xf0]  ;;  %v643_v44 = vor.u32 %v852_v36, %v642_v35 }
   0xb   :  { %v882_v42 = vld [vmem:[%s1341_s1 + $0x184] sm:$0xf]  ;;  %v772_v43 = vld [vmem:[%s1341_s1 + $0x190] sm:$0xf0]  ;;  %v771_v45 = vor.u32 %v884_v39, %v770_v37  ;;  %v647_v46 = vor.u32 %v850_v40, %v644_v41  ;;  %v626_v47 = vld [vmem:[%s1341_s1 + $0x60] sm:$0xf] }
   0xc   :  { %422 = vmatpush.bf16.msra.mxu0 %v659_v29  ;;  %v848_v48 = vld [vmem:[%s1341_s1 + $0x6c] sm:$0xf0]  ;;  %v754_v49 = vld [vmem:[%s1341_s1 + $0x160] sm:$0xf]  ;;  %v775_v50 = vor.u32 %v882_v42, %v772_v43  ;;  %v846_v52 = vld [vmem:[%s1341_s1 + $0x64] sm:$0xf] }
   0xd   :  { %436 = vmatpush.bf16.msra.mxu1 %v787_v33  ;;  %450 = vmatpush.bf16.msra.mxu2 %v663_v34  ;;  %v880_v51 = vld [vmem:[%s1341_s1 + $0x16c] sm:$0xf0]  ;;  %v628_v53 = vld [vmem:[%s1341_s1 + $0x70] sm:$0xf0]  ;;  %v878_v54 = vld [vmem:[%s1341_s1 + $0x164] sm:$0xf]  ;;  %v627_v56 = vor.u32 %v848_v48, %v626_v47 }
   0xe   :  { %464 = vmatpush.bf16.msra.mxu3 %v791_v38  ;;  %v756_v55 = vld [vmem:[%s1341_s1 + $0x170] sm:$0xf0]  ;;  %v755_v57 = vor.u32 %v880_v51, %v754_v49  ;;  %v631_v58 = vor.u32 %v846_v52, %v628_v53  ;;  %v610_v59 = vld [vmem:[%s1341_s1 + $0x40] sm:$0xf]  ;;  %v844_v60 = vld [vmem:[%s1341_s1 + $0x4c] sm:$0xf0] }
   0xf   :  { %v738_v61 = vld [vmem:[%s1341_s1 + $0x140] sm:$0xf]  ;;  %v759_v62 = vor.u32 %v878_v54, %v756_v55  ;;  %v876_v63 = vld [vmem:[%s1341_s1 + $0x14c] sm:$0xf0]  ;;  %v842_v0 = vld [vmem:[%s1341_s1 + $0x44] sm:$0xf]  ;;  %v611_v4 = vor.u32 %v844_v60, %v610_v59 }
  0x10   :  { %423 = vmatpush.bf16.msra.mxu0 %v643_v44  ;;  %v612_v1 = vld [vmem:[%s1341_s1 + $0x50] sm:$0xf0]  ;;  %v874_v2 = vld [vmem:[%s1341_s1 + $0x144] sm:$0xf]  ;;  %v739_v5 = vor.u32 %v876_v63, %v738_v61  ;;  %v594_v7 = vld [vmem:[%s1341_s1 + $0x20] sm:$0xf] }
  0x11   :  { %437 = vmatpush.bf16.msra.mxu1 %v771_v45  ;;  %451 = vmatpush.bf16.msra.mxu2 %v647_v46  ;;  %v740_v3 = vld [vmem:[%s1341_s1 + $0x150] sm:$0xf0]  ;;  %v615_v6 = vor.u32 %v842_v0, %v612_v1  ;;  %v840_v8 = vld [vmem:[%s1341_s1 + $0x2c] sm:$0xf0]  ;;  %v722_v9 = vld [vmem:[%s1341_s1 + $0x120] sm:$0xf] }
  0x12   :  { %465 = vmatpush.bf16.msra.mxu3 %v775_v50  ;;  %v743_v10 = vor.u32 %v874_v2, %v740_v3  ;;  %v872_v11 = vld [vmem:[%s1341_s1 + $0x12c] sm:$0xf0]  ;;  %v838_v12 = vld [vmem:[%s1341_s1 + $0x24] sm:$0xf]  ;;  %v596_v13 = vld [vmem:[%s1341_s1 + $0x30] sm:$0xf0]  ;;  %v595_v16 = vor.u32 %v840_v8, %v594_v7 }
  0x13   :  { %v870_v14 = vld [vmem:[%s1341_s1 + $0x124] sm:$0xf]  ;;  %v724_v15 = vld [vmem:[%s1341_s1 + $0x130] sm:$0xf0]  ;;  %v578_v17 = vld [vmem:[%s1341_s1] sm:$0xf]  ;;  %v723_v20 = vor.u32 %v872_v11, %v722_v9  ;;  %v599_v21 = vor.u32 %v838_v12, %v596_v13 }
  0x14   :  { %424 = vmatpush.bf16.msra.mxu0 %v627_v56  ;;  %v836_v18 = vld [vmem:[%s1341_s1 + $0xc] sm:$0xf0]  ;;  %v706_v19 = vld [vmem:[%s1341_s1 + $0x100] sm:$0xf]  ;;  %v834_v23 = vld [vmem:[%s1341_s1 + $0x4] sm:$0xf]  ;;  %v727_v25 = vor.u32 %v870_v14, %v724_v15 }
  0x15   :  { %438 = vmatpush.bf16.msra.mxu1 %v755_v57  ;;  %452 = vmatpush.bf16.msra.mxu2 %v631_v58  ;;  %v868_v22 = vld [vmem:[%s1341_s1 + $0x10c] sm:$0xf0]  ;;  %v580_v24 = vld [vmem:[%s1341_s1 + $0x10] sm:$0xf0]  ;;  %v866_v26 = vld [vmem:[%s1341_s1 + $0x104] sm:$0xf]  ;;  %v579_v32 = vor.u32 %v836_v18, %v578_v17 }
  0x16   :  { %466 = vmatpush.bf16.msra.mxu3 %v759_v62  ;;  %v708_v27 = vld [vmem:[%s1341_s1 + $0x110] sm:$0xf0]  ;;  %v698_v28 = vld [vmem:[%s1341_s1 + $0xe8] sm:$0xf]  ;;  %v865_v29 = vld [vmem:[%s1341_s1 + $0xf4] sm:$0xf0]  ;;  %v707_v36 = vor.u32 %v868_v22, %v706_v19  ;;  %v583_v37 = vor.u32 %v834_v23, %v580_v24 }
  0x17   :  { %v826_v30 = vld [vmem:[%s1341_s1 + $0x1e8] sm:$0xf]  ;;  %v897_v31 = vld [vmem:[%s1341_s1 + $0x1f4] sm:$0xf0]  ;;  %v863_v33 = vld [vmem:[%s1341_s1 + $0xec] sm:$0xf]  ;;  %v711_v41 = vor.u32 %v866_v26, %v708_v27  ;;  %v699_v42 = vor.u32 %v865_v29, %v698_v28 }
  0x18   :  { %425 = vmatpush.bf16.msra.mxu0 %v611_v4  ;;  %v700_v34 = vld [vmem:[%s1341_s1 + $0xf8] sm:$0xf0]  ;;  %v895_v35 = vld [vmem:[%s1341_s1 + $0x1ec] sm:$0xf]  ;;  %v570_v39 = vld [vmem:[%s1342_s0] sm:$0xf]  ;;  %v827_v45 = vor.u32 %v897_v31, %v826_v30 }
  0x19   :  { %439 = vmatpush.bf16.msra.mxu1 %v739_v5  ;;  %453 = vmatpush.bf16.msra.mxu2 %v615_v6  ;;  %v828_v38 = vld [vmem:[%s1341_s1 + $0x1f8] sm:$0xf0]  ;;  %v833_v40 = vld [vmem:[%s1342_s0 + $0x4] sm:$0xf0]  ;;  %v832_v43 = vld [vmem:[%s1342_s0 + $0x4] sm:$0xf]  ;;  %v703_v46 = vor.u32 %v863_v33, %v700_v34 }
  0x1a   :  { %467 = vmatpush.bf16.msra.mxu3 %v743_v10  ;;  %v572_v44 = vld [vmem:[%s1342_s0 + $0x8] sm:$0xf0]  ;;  %v682_v47 = vld [vmem:[%s1341_s1 + $0xc8] sm:$0xf]  ;;  %v861_v48 = vld [vmem:[%s1341_s1 + $0xd4] sm:$0xf0]  ;;  %v831_v50 = vor.u32 %v895_v35, %v828_v38  ;;  %v1164_v54 = vor.u32 %v833_v40, %v570_v39 }
  0x1b   :  { %v810_v49 = vld [vmem:[%s1341_s1 + $0x1c8] sm:$0xf]  ;;  %v893_v51 = vld [vmem:[%s1341_s1 + $0x1d4] sm:$0xf0]  ;;  %v859_v52 = vld [vmem:[%s1341_s1 + $0xcc] sm:$0xf]  ;;  %v1172_v57 = vor.u32 %v832_v43, %v572_v44  ;;  %v683_v58 = vor.u32 %v861_v48, %v682_v47 }
  0x1c   :  { %426 = vmatpush.bf16.msra.mxu0 %v595_v16  ;;  %v684_v53 = vld [vmem:[%s1341_s1 + $0xd8] sm:$0xf0]  ;;  %v891_v55 = vld [vmem:[%s1341_s1 + $0x1cc] sm:$0xf]  ;;  %v811_v59 = vor.u32 %v893_v51, %v810_v49  ;;  %v666_v61 = vld [vmem:[%s1341_s1 + $0xa8] sm:$0xf] }
  0x1d   :  { %440 = vmatpush.bf16.msra.mxu1 %v723_v20  ;;  %454 = vmatpush.bf16.msra.mxu2 %v599_v21  ;;  %v812_v56 = vld [vmem:[%s1341_s1 + $0x1d8] sm:$0xf0]  ;;  %v687_v60 = vor.u32 %v859_v52, %v684_v53  ;;  %v857_v62 = vld [vmem:[%s1341_s1 + $0xb4] sm:$0xf0]  ;;  %v794_v63 = vld [vmem:[%s1341_s1 + $0x1a8] sm:$0xf] }
  0x1e   :  { %468 = vmatpush.bf16.msra.mxu3 %v727_v25  ;;  %v815_v0 = vor.u32 %v891_v55, %v812_v56  ;;  %v889_v1 = vld [vmem:[%s1341_s1 + $0x1b4] sm:$0xf0]  ;;  %v855_v2 = vld [vmem:[%s1341_s1 + $0xac] sm:$0xf]  ;;  %v668_v3 = vld [vmem:[%s1341_s1 + $0xb8] sm:$0xf0]  ;;  %v667_v6 = vor.u32 %v857_v62, %v666_v61 }
  0x1f   :  { %v887_v4 = vld [vmem:[%s1341_s1 + $0x1ac] sm:$0xf]  ;;  %v796_v5 = vld [vmem:[%s1341_s1 + $0x1b8] sm:$0xf0]  ;;  %v795_v7 = vor.u32 %v889_v1, %v794_v63  ;;  %v671_v8 = vor.u32 %v855_v2, %v668_v3  ;;  %v650_v9 = vld [vmem:[%s1341_s1 + $0x88] sm:$0xf] }
  0x20   :  { %427 = vmatpush.bf16.msra.mxu0 %v579_v32  ;;  %v853_v10 = vld [vmem:[%s1341_s1 + $0x94] sm:$0xf0]  ;;  %v778_v11 = vld [vmem:[%s1341_s1 + $0x188] sm:$0xf]  ;;  %v799_v12 = vor.u32 %v887_v4, %v796_v5  ;;  %v851_v14 = vld [vmem:[%s1341_s1 + $0x8c] sm:$0xf] }
  0x21   :  { %441 = vmatpush.bf16.msra.mxu1 %v707_v36  ;;  %455 = vmatpush.bf16.msra.mxu2 %v583_v37  ;;  %v885_v13 = vld [vmem:[%s1341_s1 + $0x194] sm:$0xf0]  ;;  %v652_v15 = vld [vmem:[%s1341_s1 + $0x98] sm:$0xf0]  ;;  %v883_v16 = vld [vmem:[%s1341_s1 + $0x18c] sm:$0xf]  ;;  %v651_v18 = vor.u32 %v853_v10, %v650_v9 }
  0x22   :  { %469 = vmatpush.bf16.msra.mxu3 %v711_v41  ;;  %v780_v17 = vld [vmem:[%s1341_s1 + $0x198] sm:$0xf0]  ;;  %v779_v19 = vor.u32 %v885_v13, %v778_v11  ;;  %v655_v20 = vor.u32 %v851_v14, %v652_v15  ;;  %v634_v21 = vld [vmem:[%s1341_s1 + $0x68] sm:$0xf]  ;;  %v849_v22 = vld [vmem:[%s1341_s1 + $0x74] sm:$0xf0] }
  0x23   :  { %428 = vmatmul.bf16.vlgmr.msra.gmra.mxu0 %v1164_v54  ;;  %v762_v23 = vld [vmem:[%s1341_s1 + $0x168] sm:$0xf]  ;;  %v783_v24 = vor.u32 %v883_v16, %v780_v17  ;;  %v881_v25 = vld [vmem:[%s1341_s1 + $0x174] sm:$0xf0]  ;;  %v847_v26 = vld [vmem:[%s1341_s1 + $0x6c] sm:$0xf]  ;;  %v635_v30 = vor.u32 %v849_v22, %v634_v21 }
  0x24   :  { %476 = vmatpush.bf16.msrb.mxu0 %v699_v42  ;;  %456 = vmatmul.bf16.vlgmr.msra.gmra.mxu2 %v1164_v54  ;;  %v636_v27 = vld [vmem:[%s1341_s1 + $0x78] sm:$0xf0]  ;;  %v879_v28 = vld [vmem:[%s1341_s1 + $0x16c] sm:$0xf]  ;;  %v763_v31 = vor.u32 %v881_v25, %v762_v23  ;;  %v618_v33 = vld [vmem:[%s1341_s1 + $0x48] sm:$0xf] }
  0x25   :  { %490 = vmatpush.bf16.msrb.mxu1 %v827_v45  ;;  %504 = vmatpush.bf16.msrb.mxu2 %v703_v46  ;;  %v764_v29 = vld [vmem:[%s1341_s1 + $0x178] sm:$0xf0]  ;;  %v639_v32 = vor.u32 %v847_v26, %v636_v27  ;;  %v845_v34 = vld [vmem:[%s1341_s1 + $0x54] sm:$0xf0]  ;;  %v746_v35 = vld [vmem:[%s1341_s1 + $0x148] sm:$0xf] }
  0x26   :  { %518 = vmatpush.bf16.msrb.mxu3 %v831_v50  ;;  %442 = vmatmul.bf16.vlgmr.msra.gmra.mxu1 %v1172_v57  ;;  %v767_v36 = vor.u32 %v879_v28, %v764_v29  ;;  %v877_v37 = vld [vmem:[%s1341_s1 + $0x154] sm:$0xf0]  ;;  %v843_v38 = vld [vmem:[%s1341_s1 + $0x4c] sm:$0xf]  ;;  %v620_v39 = vld [vmem:[%s1341_s1 + $0x58] sm:$0xf0]  ;;  %v619_v42 = vor.u32 %v845_v34, %v618_v33 }
  0x27   :  { %470 = vmatmul.bf16.vlgmr.msra.gmra.mxu3 %v1172_v57  ;;  %v875_v40 = vld [vmem:[%s1341_s1 + $0x14c] sm:$0xf]  ;;  %v748_v41 = vld [vmem:[%s1341_s1 + $0x158] sm:$0xf0]  ;;  %v747_v43 = vor.u32 %v877_v37, %v746_v35  ;;  %v623_v44 = vor.u32 %v843_v38, %v620_v39  ;;  %v602_v45 = vld [vmem:[%s1341_s1 + $0x28] sm:$0xf] }
  0x28   :  { %477 = vmatpush.bf16.msrb.mxu0 %v683_v58  ;;  %v841_v46 = vld [vmem:[%s1341_s1 + $0x34] sm:$0xf0]  ;;  %v730_v47 = vld [vmem:[%s1341_s1 + $0x128] sm:$0xf]  ;;  %v751_v48 = vor.u32 %v875_v40, %v748_v41  ;;  %v839_v50 = vld [vmem:[%s1341_s1 + $0x2c] sm:$0xf] }
  0x29   :  { %491 = vmatpush.bf16.msrb.mxu1 %v811_v59  ;;  %505 = vmatpush.bf16.msrb.mxu2 %v687_v60  ;;  %v873_v49 = vld [vmem:[%s1341_s1 + $0x134] sm:$0xf0]  ;;  %v604_v51 = vld [vmem:[%s1341_s1 + $0x38] sm:$0xf0]  ;;  %v871_v52 = vld [vmem:[%s1341_s1 + $0x12c] sm:$0xf]  ;;  %v603_v55 = vor.u32 %v841_v46, %v602_v45 }
  0x2a   :  { %519 = vmatpush.bf16.msrb.mxu3 %v815_v0  ;;  %v732_v53 = vld [vmem:[%s1341_s1 + $0x138] sm:$0xf0]  ;;  %v731_v56 = vor.u32 %v873_v49, %v730_v47  ;;  %v607_v58 = vor.u32 %v839_v50, %v604_v51  ;;  %v586_v59 = vld [vmem:[%s1341_s1 + $0x8] sm:$0xf]  ;;  %v837_v60 = vld [vmem:[%s1341_s1 + $0x14] sm:$0xf0] }
  0x2b   :  { %v714_v61 = vld [vmem:[%s1341_s1 + $0x108] sm:$0xf]  ;;  %v735_v62 = vor.u32 %v871_v52, %v732_v53  ;;  %v869_v63 = vld [vmem:[%s1341_s1 + $0x114] sm:$0xf0]  ;;  %v835_v0 = vld [vmem:[%s1341_s1 + $0xc] sm:$0xf]  ;;  %v587_v4 = vor.u32 %v837_v60, %v586_v59 }
  0x2c   :  { %478 = vmatpush.bf16.msrb.mxu0 %v667_v6  ;;  %v588_v1 = vld [vmem:[%s1341_s1 + $0x18] sm:$0xf0]  ;;  %v867_v2 = vld [vmem:[%s1341_s1 + $0x10c] sm:$0xf]  ;;  %v715_v5 = vor.u32 %v869_v63, %v714_v61 }
  0x2d   :  { %492 = vmatpush.bf16.msrb.mxu1 %v795_v7  ;;  %506 = vmatpush.bf16.msrb.mxu2 %v671_v8  ;;  %v716_v3 = vld [vmem:[%s1341_s1 + $0x118] sm:$0xf0]  ;;  %v591_v6 = vor.u32 %v835_v0, %v588_v1  ;;  %v80_v8 = vld [vmem:[%s1343_s2] sm:$0xf] }
  0x2e   :  { %520 = vmatpush.bf16.msrb.mxu3 %v799_v12  ;;  %v719_v7 = vor.u32 %v867_v2, %v716_v3  ;;  %v82_v9 = vperm.slane %v80_v8, 0  ;;  %v83_v13 = vperm.slane %v80_v8, 1  ;;  %v84_v35 = vperm.slane %v80_v8, 2 }
  0x2f   :  { %v85_v39 = vperm.slane %v80_v8, 3 }
  0x30   :  { %479 = vmatpush.bf16.msrb.mxu0 %v651_v18 }
  0x31   :  { %493 = vmatpush.bf16.msrb.mxu1 %v779_v19  ;;  %507 = vmatpush.bf16.msrb.mxu2 %v655_v20 }
  0x32   :  { %521 = vmatpush.bf16.msrb.mxu3 %v783_v24 }
  0x34   :  { %480 = vmatpush.bf16.msrb.mxu0 %v635_v30 }
  0x35   :  { %494 = vmatpush.bf16.msrb.mxu1 %v763_v31  ;;  %508 = vmatpush.bf16.msrb.mxu2 %v639_v32 }
  0x36   :  { %522 = vmatpush.bf16.msrb.mxu3 %v767_v36 }
  0x38   :  { %481 = vmatpush.bf16.msrb.mxu0 %v619_v42 }
  0x39   :  { %495 = vmatpush.bf16.msrb.mxu1 %v747_v43  ;;  %509 = vmatpush.bf16.msrb.mxu2 %v623_v44 }
  0x3a   :  { %523 = vmatpush.bf16.msrb.mxu3 %v751_v48 }
  0x3c   :  { %482 = vmatpush.bf16.msrb.mxu0 %v603_v55 }
  0x3d   :  { %496 = vmatpush.bf16.msrb.mxu1 %v731_v56  ;;  %510 = vmatpush.bf16.msrb.mxu2 %v607_v58 }
  0x3e   :  { %524 = vmatpush.bf16.msrb.mxu3 %v735_v62 }
  0x40   :  { %483 = vmatpush.bf16.msrb.mxu0 %v587_v4 }
  0x41   :  { %497 = vmatpush.bf16.msrb.mxu1 %v715_v5  ;;  %511 = vmatpush.bf16.msrb.mxu2 %v591_v6 }
  0x42   :  { %525 = vmatpush.bf16.msrb.mxu3 %v719_v7 }
  0x43   :  { %484 = vmatmul.bf16.vlgmr.msrb.gmra.mxu0 %v1164_v54 }
  0x44   :  { %498 = vmatmul.bf16.vlgmr.msrb.gmra.mxu1 %v1172_v57  ;;  %512 = vmatmul.bf16.vlgmr.msrb.gmra.mxu2 %v1164_v54 }
  0x45   :  { %526 = vmatmul.bf16.vlgmr.msrb.gmra.mxu3 %v1172_v57 }
  0xa0   :  { %v429_v10 = vpop.f32.mrf.mxu0 }
  0xa1   :  { %v430_v11 = vadd.f32 %v429_v10, %v82_v9 }
  0xa3   :  { %v443_v12 = vpop.f32.mrf.mxu1 }
  0xa4   :  { %v444_v14 = vadd.f32 %v443_v12, %v430_v11 }
  0xa6   :  { %v540_v17 = vmul.f32 0.01, %v444_v14  ;;  %vm532_vm0 = vcmp.gt.f32.partialorder %v444_v14, 0.0 }
  0xa7   :  { %v457_v15 = vpop.f32.mrf.mxu2 }
  0xa8   :  { %v458_v16 = vadd.f32 %v457_v15, %v83_v13  ;;  %v431_v20 = vpop.f32.mrf.mxu0  ;;  %v548_v57 = vsel %vm532_vm0, %v444_v14, %v540_v17 }
  0xa9   :  { %v432_v54 = vadd.f32 %v431_v20, %v82_v9 }
  0xaa   :  { %v471_v18 = vpop.f32.mrf.mxu3 }
  0xab   :  { %v472_v19 = vadd.f32 %v471_v18, %v458_v16  ;;  %v445_v21 = vpop.f32.mrf.mxu1 }
  0xac   :  { %v446_v23 = vadd.f32 %v445_v21, %v432_v54 }
  0xad   :  { %vm533_vm1 = vcmp.gt.f32.partialorder %v472_v19, 0.0  ;;  %v541_v22 = vmul.f32 0.01, %v472_v19 }
  0xae   :  { %v544_v28 = vmul.f32 0.01, %v446_v23  ;;  %vm536_vm2 = vcmp.gt.f32.partialorder %v446_v23, 0.0 }
  0xaf   :  { %v549_v24 = vsel %vm533_vm1, %v472_v19, %v541_v22  ;;  %v459_v26 = vpop.f32.mrf.mxu2 }
  0xb0   :  { %v556_v25 = vpack.c.bf16 %v549_v24, %v548_v57  ;;  %v460_v27 = vadd.f32 %v459_v26, %v83_v13  ;;  %v552_v31 = vsel %vm536_vm2, %v446_v23, %v544_v28 }
  0xb2   :  { %v473_v29 = vpop.f32.mrf.mxu3  ;;  %560 = vst [vmem:[%s1344_s3] sm:$0xff] %v556_v25 }
  0xb3   :  { %v474_v30 = vadd.f32 %v473_v29, %v460_v27 }
  0xb5   :  { %vm537_vm3 = vcmp.gt.f32.partialorder %v474_v30, 0.0  ;;  %v545_v32 = vmul.f32 0.01, %v474_v30 }
  0xb7   :  { %v553_v33 = vsel %vm537_vm3, %v474_v30, %v545_v32 }
  0xb8   :  { %v558_v34 = vpack.c.bf16 %v553_v33, %v552_v31 }
  0xba   :  { %562 = vst [vmem:[%s1344_s3 + $0x10] sm:$0xff] %v558_v34 }
  0xc0   :  { %v485_v36 = vpop.f32.mrf.mxu0 }
  0xc1   :  { %v486_v37 = vadd.f32 %v485_v36, %v84_v35  ;;  %v499_v38 = vpop.f32.mrf.mxu1 }
  0xc3   :  { %v500_v40 = vadd.f32 %v499_v38, %v486_v37 }
  0xc5   :  { %v542_v45 = vmul.f32 0.01, %v500_v40  ;;  %vm534_vm4 = vcmp.gt.f32.partialorder %v500_v40, 0.0 }
  0xc7   :  { %v513_v41 = vpop.f32.mrf.mxu2  ;;  %v550_v50 = vsel %vm534_vm4, %v500_v40, %v542_v45 }
  0xc8   :  { %v514_v42 = vadd.f32 %v513_v41, %v85_v39  ;;  %v527_v43 = vpop.f32.mrf.mxu3  ;;  %v487_v44 = vpop.f32.mrf.mxu0 }
  0xc9   :  { %v488_v47 = vadd.f32 %v487_v44, %v84_v35  ;;  %v501_v49 = vpop.f32.mrf.mxu1 }
  0xca   :  { %v528_v46 = vadd.f32 %v527_v43, %v514_v42 }
  0xcb   :  { %v502_v52 = vadd.f32 %v501_v49, %v488_v47 }
  0xcc   :  { %vm535_vm5 = vcmp.gt.f32.partialorder %v528_v46, 0.0  ;;  %v543_v48 = vmul.f32 0.01, %v528_v46 }
  0xcd   :  { %v546_v59 = vmul.f32 0.01, %v502_v52  ;;  %vm538_vm6 = vcmp.gt.f32.partialorder %v502_v52, 0.0 }
  0xce   :  { %v551_v51 = vsel %vm535_vm5, %v528_v46, %v543_v48 }
  0xcf   :  { %v557_v53 = vpack.c.bf16 %v551_v51, %v550_v50  ;;  %v515_v55 = vpop.f32.mrf.mxu2  ;;  %v554_v62 = vsel %vm538_vm6, %v502_v52, %v546_v59 }
  0xd0   :  { %v516_v56 = vadd.f32 %v515_v55, %v85_v39  ;;  %v529_v58 = vpop.f32.mrf.mxu3 }
  0xd1   :  { %561 = vst [vmem:[%s1344_s3 + $0x8] sm:$0xff] %v557_v53 }
  0xd2   :  { %v530_v60 = vadd.f32 %v529_v58, %v516_v56 }
  0xd4   :  { %vm539_vm7 = vcmp.gt.f32.partialorder %v530_v60, 0.0  ;;  %v547_v61 = vmul.f32 0.01, %v530_v60 }
  0xd6   :  { %v555_v63 = vsel %vm539_vm7, %v530_v60, %v547_v61 }
  0xd7   :  { %v559_v0 = vpack.c.bf16 %v555_v63, %v554_v62 }
  0xd9   :  { %563 = vst [vmem:[%s1344_s3 + $0x18] sm:$0xff] %v559_v0 }

// kernel: autoencoder_pc_forward.13
= control target key start
LH: loop header
LB: loop body
LE: loop exit
PB: predicated region body
PF: predicated region fallthrough
CT: control target
= control target key end

     0   :  { %s2593_s1 = inlined_call_operand.vmem [shape: bf16[512,512], index: 1, kind: input, shape index: {}]   ;;  %s2594_s0 = inlined_call_operand.vmem [shape: bf16[16,512], index: 0, kind: input, shape index: {}]   ;;  %s2595_s2 = inlined_call_operand.vmem [shape: f32[1,512], index: 2, kind: input, shape index: {}]   ;;  %s2596_s3 = inlined_call_operand.vmem [shape: bf16[16,512], index: 3, kind: output, shape index: {}]  }
   0x1   :  { %v1206_v0 = vld [vmem:[%s2593_s1 + $0xe0] sm:$0xf]  ;;  %v1638_v1 = vld [vmem:[%s2593_s1 + $0xec] sm:$0xf0] }
   0x2   :  { %v1334_v2 = vld [vmem:[%s2593_s1 + $0x1e0] sm:$0xf]  ;;  %v1207_v3 = vor.u32 %v1638_v1, %v1206_v0  ;;  %v1670_v4 = vld [vmem:[%s2593_s1 + $0x1ec] sm:$0xf0] }
   0x3   :  { %v1462_v5 = vld [vmem:[%s2593_s1 + $0x2e0] sm:$0xf]  ;;  %v1702_v6 = vld [vmem:[%s2593_s1 + $0x2ec] sm:$0xf0]  ;;  %v1335_v7 = vor.u32 %v1670_v4, %v1334_v2 }
   0x4   :  { %v1463_v8 = vor.u32 %v1702_v6, %v1462_v5  ;;  %v1590_v9 = vld [vmem:[%s2593_s1 + $0x3e0] sm:$0xf]  ;;  %v1734_v10 = vld [vmem:[%s2593_s1 + $0x3ec] sm:$0xf0]  ;;  %816 = vmatpush.bf16.msra.mxu0 %v1207_v3 }
   0x5   :  { %v1190_v11 = vld [vmem:[%s2593_s1 + $0xc0] sm:$0xf]  ;;  %v1591_v12 = vor.u32 %v1734_v10, %v1590_v9  ;;  %v1634_v13 = vld [vmem:[%s2593_s1 + $0xcc] sm:$0xf0]  ;;  %830 = vmatpush.bf16.msra.mxu1 %v1335_v7 }
   0x6   :  { %v1318_v14 = vld [vmem:[%s2593_s1 + $0x1c0] sm:$0xf]  ;;  %v1666_v15 = vld [vmem:[%s2593_s1 + $0x1cc] sm:$0xf0]  ;;  %844 = vmatpush.bf16.msra.mxu2 %v1463_v8  ;;  %v1191_v16 = vor.u32 %v1634_v13, %v1190_v11 }
   0x7   :  { %v1319_v17 = vor.u32 %v1666_v15, %v1318_v14  ;;  %v1446_v18 = vld [vmem:[%s2593_s1 + $0x2c0] sm:$0xf]  ;;  %v1698_v19 = vld [vmem:[%s2593_s1 + $0x2cc] sm:$0xf0]  ;;  %858 = vmatpush.bf16.msra.mxu3 %v1591_v12 }
   0x8   :  { %v1574_v20 = vld [vmem:[%s2593_s1 + $0x3c0] sm:$0xf]  ;;  %v1447_v21 = vor.u32 %v1698_v19, %v1446_v18  ;;  %v1730_v22 = vld [vmem:[%s2593_s1 + $0x3cc] sm:$0xf0]  ;;  %817 = vmatpush.bf16.msra.mxu0 %v1191_v16 }
   0x9   :  { %v1174_v23 = vld [vmem:[%s2593_s1 + $0xa0] sm:$0xf]  ;;  %v1630_v24 = vld [vmem:[%s2593_s1 + $0xac] sm:$0xf0]  ;;  %v1575_v25 = vor.u32 %v1730_v22, %v1574_v20  ;;  %831 = vmatpush.bf16.msra.mxu1 %v1319_v17 }
   0xa   :  { %v1302_v26 = vld [vmem:[%s2593_s1 + $0x1a0] sm:$0xf]  ;;  %v1662_v27 = vld [vmem:[%s2593_s1 + $0x1ac] sm:$0xf0]  ;;  %v1175_v29 = vor.u32 %v1630_v24, %v1174_v23  ;;  %845 = vmatpush.bf16.msra.mxu2 %v1447_v21 }
   0xb   :  { %v1430_v28 = vld [vmem:[%s2593_s1 + $0x2a0] sm:$0xf]  ;;  %v1694_v30 = vld [vmem:[%s2593_s1 + $0x2ac] sm:$0xf0]  ;;  %v1303_v33 = vor.u32 %v1662_v27, %v1302_v26  ;;  %859 = vmatpush.bf16.msra.mxu3 %v1575_v25 }
   0xc   :  { %v1558_v31 = vld [vmem:[%s2593_s1 + $0x3a0] sm:$0xf]  ;;  %v1726_v32 = vld [vmem:[%s2593_s1 + $0x3ac] sm:$0xf0]  ;;  %v1431_v34 = vor.u32 %v1694_v30, %v1430_v28  ;;  %818 = vmatpush.bf16.msra.mxu0 %v1175_v29  ;;  %v1636_v28 = vld [vmem:[%s2593_s1 + $0xe4] sm:$0xf] }
   0xd   :  { %v1158_v35 = vld [vmem:[%s2593_s1 + $0x80] sm:$0xf]  ;;  %v1626_v36 = vld [vmem:[%s2593_s1 + $0x8c] sm:$0xf0]  ;;  %v1559_v38 = vor.u32 %v1726_v32, %v1558_v31  ;;  %832 = vmatpush.bf16.msra.mxu1 %v1303_v33  ;;  %v1208_v29 = vld [vmem:[%s2593_s1 + $0xf0] sm:$0xf0] }
   0xe   :  { %v1286_v37 = vld [vmem:[%s2593_s1 + $0x180] sm:$0xf]  ;;  %v1658_v39 = vld [vmem:[%s2593_s1 + $0x18c] sm:$0xf0]  ;;  %v1159_v44 = vor.u32 %v1626_v36, %v1158_v35  ;;  %846 = vmatpush.bf16.msra.mxu2 %v1431_v34  ;;  %v1668_v30 = vld [vmem:[%s2593_s1 + $0x1e4] sm:$0xf] }
   0xf   :  { %v1414_v40 = vld [vmem:[%s2593_s1 + $0x280] sm:$0xf]  ;;  %v1690_v41 = vld [vmem:[%s2593_s1 + $0x28c] sm:$0xf0]  ;;  %v1287_v45 = vor.u32 %v1658_v39, %v1286_v37  ;;  %860 = vmatpush.bf16.msra.mxu3 %v1559_v38  ;;  %v1336_v32 = vld [vmem:[%s2593_s1 + $0x1f0] sm:$0xf0] }
  0x10   :  { %v1542_v42 = vld [vmem:[%s2593_s1 + $0x380] sm:$0xf]  ;;  %v1722_v43 = vld [vmem:[%s2593_s1 + $0x38c] sm:$0xf0]  ;;  %v1415_v46 = vor.u32 %v1690_v41, %v1414_v40  ;;  %819 = vmatpush.bf16.msra.mxu0 %v1159_v44  ;;  %v1700_v33 = vld [vmem:[%s2593_s1 + $0x2e4] sm:$0xf]  ;;  %v1211_v40 = vor.u32 %v1636_v28, %v1208_v29 }
  0x11   :  { %v1142_v47 = vld [vmem:[%s2593_s1 + $0x60] sm:$0xf]  ;;  %v1622_v48 = vld [vmem:[%s2593_s1 + $0x6c] sm:$0xf0]  ;;  %v1543_v50 = vor.u32 %v1722_v43, %v1542_v42  ;;  %833 = vmatpush.bf16.msra.mxu1 %v1287_v45  ;;  %v1464_v34 = vld [vmem:[%s2593_s1 + $0x2f0] sm:$0xf0]  ;;  %v1339_v43 = vor.u32 %v1668_v30, %v1336_v32 }
  0x12   :  { %v1270_v49 = vld [vmem:[%s2593_s1 + $0x160] sm:$0xf]  ;;  %v1654_v51 = vld [vmem:[%s2593_s1 + $0x16c] sm:$0xf0]  ;;  %v1143_v56 = vor.u32 %v1622_v48, %v1142_v47  ;;  %847 = vmatpush.bf16.msra.mxu2 %v1415_v46  ;;  %v1732_v37 = vld [vmem:[%s2593_s1 + $0x3e4] sm:$0xf]  ;;  %v1467_v44 = vor.u32 %v1700_v33, %v1464_v34 }
  0x13   :  { %v1398_v52 = vld [vmem:[%s2593_s1 + $0x260] sm:$0xf]  ;;  %v1686_v53 = vld [vmem:[%s2593_s1 + $0x26c] sm:$0xf0]  ;;  %v1271_v57 = vor.u32 %v1654_v51, %v1270_v49  ;;  %861 = vmatpush.bf16.msra.mxu3 %v1543_v50  ;;  %v1592_v38 = vld [vmem:[%s2593_s1 + $0x3f0] sm:$0xf0] }
  0x14   :  { %v1526_v54 = vld [vmem:[%s2593_s1 + $0x360] sm:$0xf]  ;;  %v1718_v55 = vld [vmem:[%s2593_s1 + $0x36c] sm:$0xf0]  ;;  %v1399_v58 = vor.u32 %v1686_v53, %v1398_v52  ;;  %820 = vmatpush.bf16.msra.mxu0 %v1143_v56  ;;  %v1632_v41 = vld [vmem:[%s2593_s1 + $0xc4] sm:$0xf]  ;;  %v1595_v48 = vor.u32 %v1732_v37, %v1592_v38 }
  0x15   :  { %v1126_v59 = vld [vmem:[%s2593_s1 + $0x40] sm:$0xf]  ;;  %v1618_v60 = vld [vmem:[%s2593_s1 + $0x4c] sm:$0xf0]  ;;  %v1527_v62 = vor.u32 %v1718_v55, %v1526_v54  ;;  %834 = vmatpush.bf16.msra.mxu1 %v1271_v57  ;;  %v1192_v42 = vld [vmem:[%s2593_s1 + $0xd0] sm:$0xf0] }
  0x16   :  { %v1254_v61 = vld [vmem:[%s2593_s1 + $0x140] sm:$0xf]  ;;  %v1650_v63 = vld [vmem:[%s2593_s1 + $0x14c] sm:$0xf0]  ;;  %v1127_v4 = vor.u32 %v1618_v60, %v1126_v59  ;;  %848 = vmatpush.bf16.msra.mxu2 %v1399_v58  ;;  %v1664_v45 = vld [vmem:[%s2593_s1 + $0x1c4] sm:$0xf]  ;;  %v1195_v55 = vor.u32 %v1632_v41, %v1192_v42 }
  0x17   :  { %v1382_v0 = vld [vmem:[%s2593_s1 + $0x240] sm:$0xf]  ;;  %v1682_v1 = vld [vmem:[%s2593_s1 + $0x24c] sm:$0xf0]  ;;  %v1255_v5 = vor.u32 %v1650_v63, %v1254_v61  ;;  %862 = vmatpush.bf16.msra.mxu3 %v1527_v62  ;;  %v1320_v46 = vld [vmem:[%s2593_s1 + $0x1d0] sm:$0xf0] }
  0x18   :  { %v1510_v2 = vld [vmem:[%s2593_s1 + $0x340] sm:$0xf]  ;;  %v1714_v3 = vld [vmem:[%s2593_s1 + $0x34c] sm:$0xf0]  ;;  %v1383_v6 = vor.u32 %v1682_v1, %v1382_v0  ;;  %821 = vmatpush.bf16.msra.mxu0 %v1127_v4  ;;  %v1696_v47 = vld [vmem:[%s2593_s1 + $0x2c4] sm:$0xf]  ;;  %v1323_v60 = vor.u32 %v1664_v45, %v1320_v46 }
  0x19   :  { %v1110_v7 = vld [vmem:[%s2593_s1 + $0x20] sm:$0xf]  ;;  %v1614_v8 = vld [vmem:[%s2593_s1 + $0x2c] sm:$0xf0]  ;;  %v1511_v10 = vor.u32 %v1714_v3, %v1510_v2  ;;  %835 = vmatpush.bf16.msra.mxu1 %v1255_v5  ;;  %v1448_v49 = vld [vmem:[%s2593_s1 + $0x2d0] sm:$0xf0] }
  0x1a   :  { %v1238_v9 = vld [vmem:[%s2593_s1 + $0x120] sm:$0xf]  ;;  %v1646_v11 = vld [vmem:[%s2593_s1 + $0x12c] sm:$0xf0]  ;;  %v1111_v16 = vor.u32 %v1614_v8, %v1110_v7  ;;  %849 = vmatpush.bf16.msra.mxu2 %v1383_v6  ;;  %v1728_v50 = vld [vmem:[%s2593_s1 + $0x3c4] sm:$0xf]  ;;  %v1451_v61 = vor.u32 %v1696_v47, %v1448_v49 }
  0x1b   :  { %v1366_v12 = vld [vmem:[%s2593_s1 + $0x220] sm:$0xf]  ;;  %v1678_v13 = vld [vmem:[%s2593_s1 + $0x22c] sm:$0xf0]  ;;  %v1239_v19 = vor.u32 %v1646_v11, %v1238_v9  ;;  %863 = vmatpush.bf16.msra.mxu3 %v1511_v10  ;;  %v1576_v51 = vld [vmem:[%s2593_s1 + $0x3d0] sm:$0xf0] }
  0x1c   :  { %v1494_v14 = vld [vmem:[%s2593_s1 + $0x320] sm:$0xf]  ;;  %v1710_v15 = vld [vmem:[%s2593_s1 + $0x32c] sm:$0xf0]  ;;  %v1367_v20 = vor.u32 %v1678_v13, %v1366_v12  ;;  %822 = vmatpush.bf16.msra.mxu0 %v1111_v16  ;;  %v1628_v52 = vld [vmem:[%s2593_s1 + $0xa4] sm:$0xf]  ;;  %v1579_v1 = vor.u32 %v1728_v50, %v1576_v51 }
  0x1d   :  { %v1094_v17 = vld [vmem:[%s2593_s1] sm:$0xf]  ;;  %v1610_v18 = vld [vmem:[%s2593_s1 + $0xc] sm:$0xf0]  ;;  %v1495_v24 = vor.u32 %v1710_v15, %v1494_v14  ;;  %836 = vmatpush.bf16.msra.mxu1 %v1239_v19  ;;  %v1086_v53 = vld [vmem:[%s2594_s0 + $0x8] sm:$0xf] }
  0x1e   :  { %v1222_v21 = vld [vmem:[%s2593_s1 + $0x100] sm:$0xf]  ;;  %v1642_v22 = vld [vmem:[%s2593_s1 + $0x10c] sm:$0xf0]  ;;  %v1095_v31 = vor.u32 %v1610_v18, %v1094_v17  ;;  %850 = vmatpush.bf16.msra.mxu2 %v1367_v20  ;;  %v1607_v54 = vld [vmem:[%s2594_s0 + $0x14] sm:$0xf0] }
  0x1f   :  { %v1350_v23 = vld [vmem:[%s2593_s1 + $0x200] sm:$0xf]  ;;  %v1674_v25 = vld [vmem:[%s2593_s1 + $0x20c] sm:$0xf0]  ;;  %v1223_v35 = vor.u32 %v1642_v22, %v1222_v21  ;;  %864 = vmatpush.bf16.msra.mxu3 %v1495_v24  ;;  %v1176_v56 = vld [vmem:[%s2593_s1 + $0xb0] sm:$0xf0]  ;;  %v2014_v59 = vor.u32 %v1607_v54, %v1086_v53 }
  0x20   :  { %v1478_v26 = vld [vmem:[%s2593_s1 + $0x300] sm:$0xf]  ;;  %v1706_v27 = vld [vmem:[%s2593_s1 + $0x30c] sm:$0xf0]  ;;  %v1351_v36 = vor.u32 %v1674_v25, %v1350_v23  ;;  %823 = vmatpush.bf16.msra.mxu0 %v1095_v31  ;;  %v1660_v57 = vld [vmem:[%s2593_s1 + $0x1a4] sm:$0xf]  ;;  %v1179_v9 = vor.u32 %v1628_v52, %v1176_v56 }
  0x21   :  { %v1479_v39 = vor.u32 %v1706_v27, %v1478_v26  ;;  %837 = vmatpush.bf16.msra.mxu1 %v1223_v35  ;;  %v1304_v58 = vld [vmem:[%s2593_s1 + $0x1b0] sm:$0xf0]  ;;  %v1692_v62 = vld [vmem:[%s2593_s1 + $0x2a4] sm:$0xf]  ;;  %v1078_v3 = vld [vmem:[%s2594_s0] sm:$0xf] }
  0x22   :  { %851 = vmatpush.bf16.msra.mxu2 %v1351_v36  ;;  %v1432_v63 = vld [vmem:[%s2593_s1 + $0x2b0] sm:$0xf0]  ;;  %v1724_v0 = vld [vmem:[%s2593_s1 + $0x3a4] sm:$0xf]  ;;  %v1606_v4 = vld [vmem:[%s2594_s0 + $0xc] sm:$0xf0]  ;;  %v1307_v12 = vor.u32 %v1660_v57, %v1304_v58 }
  0x23   :  { %865 = vmatpush.bf16.msra.mxu3 %v1479_v39  ;;  %v1560_v2 = vld [vmem:[%s2593_s1 + $0x3b0] sm:$0xf0]  ;;  %v2035_v5 = vor.u32 %v1606_v4, %v1078_v3  ;;  %v1605_v6 = vld [vmem:[%s2594_s0 + $0xc] sm:$0xf]  ;;  %v1088_v7 = vld [vmem:[%s2594_s0 + $0x18] sm:$0xf0]  ;;  %v1435_v13 = vor.u32 %v1692_v62, %v1432_v63 }
  0x24   :  { %872 = vmatpush.bf16.msrb.mxu0 %v1211_v40  ;;  %v1604_v8 = vld [vmem:[%s2594_s0 + $0x4] sm:$0xf]  ;;  %v2046_v10 = vor.u32 %v1605_v6, %v1088_v7  ;;  %v1080_v11 = vld [vmem:[%s2594_s0 + $0x10] sm:$0xf0]  ;;  %v1563_v18 = vor.u32 %v1724_v0, %v1560_v2 }
  0x25   :  { %886 = vmatpush.bf16.msrb.mxu1 %v1339_v43  ;;  %852 = vmatmul.bf16.vlgmr.msra.gmra.mxu2 %v2014_v59  ;;  %v1624_v14 = vld [vmem:[%s2593_s1 + $0x84] sm:$0xf]  ;;  %v1160_v15 = vld [vmem:[%s2593_s1 + $0x90] sm:$0xf0]  ;;  %v2060_v17 = vor.u32 %v1604_v8, %v1080_v11  ;;  %v1214_v11 = vld [vmem:[%s2593_s1 + $0xe8] sm:$0xf] }
  0x26   :  { %900 = vmatpush.bf16.msrb.mxu2 %v1467_v44  ;;  %v1656_v16 = vld [vmem:[%s2593_s1 + $0x184] sm:$0xf]  ;;  %v1288_v19 = vld [vmem:[%s2593_s1 + $0x190] sm:$0xf0]  ;;  %824 = vmatmul.bf16.vlgmr.msra.gmra.mxu0 %v2035_v5  ;;  %v1163_v24 = vor.u32 %v1624_v14, %v1160_v15  ;;  %v1671_v15 = vld [vmem:[%s2593_s1 + $0x1f4] sm:$0xf0] }
  0x27   :  { %914 = vmatpush.bf16.msrb.mxu3 %v1595_v48  ;;  %v1688_v20 = vld [vmem:[%s2593_s1 + $0x284] sm:$0xf]  ;;  %v1416_v21 = vld [vmem:[%s2593_s1 + $0x290] sm:$0xf0]  ;;  %838 = vmatmul.bf16.vlgmr.msra.gmra.mxu1 %v2060_v17  ;;  %v1291_v25 = vor.u32 %v1656_v16, %v1288_v19  ;;  %v1470_v16 = vld [vmem:[%s2593_s1 + $0x2e8] sm:$0xf] }
  0x28   :  { %873 = vmatpush.bf16.msrb.mxu0 %v1195_v55  ;;  %v1720_v22 = vld [vmem:[%s2593_s1 + $0x384] sm:$0xf]  ;;  %v1544_v23 = vld [vmem:[%s2593_s1 + $0x390] sm:$0xf0]  ;;  %866 = vmatmul.bf16.vlgmr.msra.gmra.mxu3 %v2046_v10  ;;  %v1419_v26 = vor.u32 %v1688_v20, %v1416_v21  ;;  %v1598_v21 = vld [vmem:[%s2593_s1 + $0x3e8] sm:$0xf] }
  0x29   :  { %887 = vmatpush.bf16.msrb.mxu1 %v1323_v60  ;;  %v1620_v27 = vld [vmem:[%s2593_s1 + $0x64] sm:$0xf]  ;;  %v1144_v28 = vld [vmem:[%s2593_s1 + $0x70] sm:$0xf0]  ;;  %v1547_v30 = vor.u32 %v1720_v22, %v1544_v23  ;;  %v1735_v22 = vld [vmem:[%s2593_s1 + $0x3f4] sm:$0xf0] }
  0x2a   :  { %901 = vmatpush.bf16.msrb.mxu2 %v1451_v61  ;;  %v1652_v29 = vld [vmem:[%s2593_s1 + $0x164] sm:$0xf]  ;;  %v1272_v31 = vld [vmem:[%s2593_s1 + $0x170] sm:$0xf0]  ;;  %v1147_v36 = vor.u32 %v1620_v27, %v1144_v28  ;;  %v1198_v27 = vld [vmem:[%s2593_s1 + $0xc8] sm:$0xf] }
  0x2b   :  { %915 = vmatpush.bf16.msrb.mxu3 %v1579_v1  ;;  %v1684_v32 = vld [vmem:[%s2593_s1 + $0x264] sm:$0xf]  ;;  %v1400_v33 = vld [vmem:[%s2593_s1 + $0x270] sm:$0xf0]  ;;  %v1275_v37 = vor.u32 %v1652_v29, %v1272_v31  ;;  %v1635_v28 = vld [vmem:[%s2593_s1 + $0xd4] sm:$0xf0] }
  0x2c   :  { %874 = vmatpush.bf16.msrb.mxu0 %v1179_v9  ;;  %v1716_v34 = vld [vmem:[%s2593_s1 + $0x364] sm:$0xf]  ;;  %v1528_v35 = vld [vmem:[%s2593_s1 + $0x370] sm:$0xf0]  ;;  %v1403_v38 = vor.u32 %v1684_v32, %v1400_v33  ;;  %v1326_v29 = vld [vmem:[%s2593_s1 + $0x1c8] sm:$0xf] }
  0x2d   :  { %888 = vmatpush.bf16.msrb.mxu1 %v1307_v12  ;;  %v1616_v39 = vld [vmem:[%s2593_s1 + $0x44] sm:$0xf]  ;;  %v1128_v40 = vld [vmem:[%s2593_s1 + $0x50] sm:$0xf0]  ;;  %v1531_v42 = vor.u32 %v1716_v34, %v1528_v35  ;;  %v1639_v12 = vld [vmem:[%s2593_s1 + $0xf4] sm:$0xf0] }
  0x2e   :  { %902 = vmatpush.bf16.msrb.mxu2 %v1435_v13  ;;  %v1648_v41 = vld [vmem:[%s2593_s1 + $0x144] sm:$0xf]  ;;  %v1256_v43 = vld [vmem:[%s2593_s1 + $0x150] sm:$0xf0]  ;;  %v1131_v48 = vor.u32 %v1616_v39, %v1128_v40  ;;  %v1342_v13 = vld [vmem:[%s2593_s1 + $0x1e8] sm:$0xf] }
  0x2f   :  { %916 = vmatpush.bf16.msrb.mxu3 %v1563_v18  ;;  %v1680_v44 = vld [vmem:[%s2593_s1 + $0x244] sm:$0xf]  ;;  %v1384_v45 = vld [vmem:[%s2593_s1 + $0x250] sm:$0xf0]  ;;  %v1259_v49 = vor.u32 %v1648_v41, %v1256_v43  ;;  %v1703_v18 = vld [vmem:[%s2593_s1 + $0x2f4] sm:$0xf0] }
  0x30   :  { %875 = vmatpush.bf16.msrb.mxu0 %v1163_v24  ;;  %v1712_v46 = vld [vmem:[%s2593_s1 + $0x344] sm:$0xf]  ;;  %v1512_v47 = vld [vmem:[%s2593_s1 + $0x350] sm:$0xf0]  ;;  %v1387_v50 = vor.u32 %v1680_v44, %v1384_v45  ;;  %v1215_v24 = vor.u32 %v1639_v12, %v1214_v11  ;;  %v1667_v31 = vld [vmem:[%s2593_s1 + $0x1d4] sm:$0xf0] }
  0x31   :  { %889 = vmatpush.bf16.msrb.mxu1 %v1291_v25  ;;  %v1612_v51 = vld [vmem:[%s2593_s1 + $0x24] sm:$0xf]  ;;  %v1112_v52 = vld [vmem:[%s2593_s1 + $0x30] sm:$0xf0]  ;;  %v1515_v54 = vor.u32 %v1712_v46, %v1512_v47  ;;  %v1343_v25 = vor.u32 %v1671_v15, %v1342_v13  ;;  %v1454_v32 = vld [vmem:[%s2593_s1 + $0x2c8] sm:$0xf] }
  0x32   :  { %903 = vmatpush.bf16.msrb.mxu2 %v1419_v26  ;;  %v1644_v53 = vld [vmem:[%s2593_s1 + $0x124] sm:$0xf]  ;;  %v1240_v55 = vld [vmem:[%s2593_s1 + $0x130] sm:$0xf0]  ;;  %v1115_v61 = vor.u32 %v1612_v51, %v1112_v52  ;;  %v1471_v26 = vor.u32 %v1703_v18, %v1470_v16  ;;  %v1699_v33 = vld [vmem:[%s2593_s1 + $0x2d4] sm:$0xf0] }
  0x33   :  { %917 = vmatpush.bf16.msrb.mxu3 %v1547_v30  ;;  %v1676_v56 = vld [vmem:[%s2593_s1 + $0x224] sm:$0xf]  ;;  %v1368_v57 = vld [vmem:[%s2593_s1 + $0x230] sm:$0xf0]  ;;  %v1243_v0 = vor.u32 %v1644_v53, %v1240_v55  ;;  %v1599_v30 = vor.u32 %v1735_v22, %v1598_v21  ;;  %v1582_v34 = vld [vmem:[%s2593_s1 + $0x3c8] sm:$0xf] }
  0x34   :  { %876 = vmatpush.bf16.msrb.mxu0 %v1147_v36  ;;  %v1708_v58 = vld [vmem:[%s2593_s1 + $0x324] sm:$0xf]  ;;  %v1496_v60 = vld [vmem:[%s2593_s1 + $0x330] sm:$0xf0]  ;;  %v1371_v1 = vor.u32 %v1676_v56, %v1368_v57  ;;  %v1731_v35 = vld [vmem:[%s2593_s1 + $0x3d4] sm:$0xf0]  ;;  %v1199_v36 = vor.u32 %v1635_v28, %v1198_v27 }
  0x35   :  { %890 = vmatpush.bf16.msrb.mxu1 %v1275_v37  ;;  %v1608_v62 = vld [vmem:[%s2593_s1 + $0x4] sm:$0xf]  ;;  %v1096_v63 = vld [vmem:[%s2593_s1 + $0x10] sm:$0xf0]  ;;  %v1499_v6 = vor.u32 %v1708_v58, %v1496_v60  ;;  %v1327_v37 = vor.u32 %v1667_v31, %v1326_v29  ;;  %v1182_v39 = vld [vmem:[%s2593_s1 + $0xa8] sm:$0xf] }
  0x36   :  { %904 = vmatpush.bf16.msrb.mxu2 %v1403_v38  ;;  %v1640_v2 = vld [vmem:[%s2593_s1 + $0x104] sm:$0xf]  ;;  %v1224_v3 = vld [vmem:[%s2593_s1 + $0x110] sm:$0xf0]  ;;  %v1099_v14 = vor.u32 %v1608_v62, %v1096_v63  ;;  %v1455_v38 = vor.u32 %v1699_v33, %v1454_v32  ;;  %v1631_v40 = vld [vmem:[%s2593_s1 + $0xb4] sm:$0xf0] }
  0x37   :  { %918 = vmatpush.bf16.msrb.mxu3 %v1531_v42  ;;  %v1672_v4 = vld [vmem:[%s2593_s1 + $0x204] sm:$0xf]  ;;  %v1352_v7 = vld [vmem:[%s2593_s1 + $0x210] sm:$0xf0]  ;;  %v1227_v19 = vor.u32 %v1640_v2, %v1224_v3  ;;  %v1310_v41 = vld [vmem:[%s2593_s1 + $0x1a8] sm:$0xf]  ;;  %v1583_v42 = vor.u32 %v1731_v35, %v1582_v34 }
  0x38   :  { %877 = vmatpush.bf16.msrb.mxu0 %v1131_v48  ;;  %v1704_v8 = vld [vmem:[%s2593_s1 + $0x304] sm:$0xf]  ;;  %v1480_v9 = vld [vmem:[%s2593_s1 + $0x310] sm:$0xf0]  ;;  %v1355_v20 = vor.u32 %v1672_v4, %v1352_v7  ;;  %v1663_v43 = vld [vmem:[%s2593_s1 + $0x1b4] sm:$0xf0]  ;;  %v1183_v48 = vor.u32 %v1631_v40, %v1182_v39 }
  0x39   :  { %891 = vmatpush.bf16.msrb.mxu1 %v1259_v49  ;;  %v1483_v23 = vor.u32 %v1704_v8, %v1480_v9  ;;  %v1438_v44 = vld [vmem:[%s2593_s1 + $0x2a8] sm:$0xf]  ;;  %v1695_v45 = vld [vmem:[%s2593_s1 + $0x2b4] sm:$0xf0]  ;;  %v1311_v49 = vor.u32 %v1663_v43, %v1310_v41 }
  0x3a   :  { %905 = vmatpush.bf16.msrb.mxu2 %v1387_v50  ;;  %v1566_v46 = vld [vmem:[%s2593_s1 + $0x3a8] sm:$0xf]  ;;  %v1727_v47 = vld [vmem:[%s2593_s1 + $0x3b4] sm:$0xf0]  ;;  %v1439_v50 = vor.u32 %v1695_v45, %v1438_v44 }
  0x3b   :  { %919 = vmatpush.bf16.msrb.mxu3 %v1515_v54  ;;  %v1166_v51 = vld [vmem:[%s2593_s1 + $0x88] sm:$0xf]  ;;  %v1627_v52 = vld [vmem:[%s2593_s1 + $0x94] sm:$0xf0]  ;;  %v1567_v54 = vor.u32 %v1727_v47, %v1566_v46 }
  0x3c   :  { %878 = vmatpush.bf16.msrb.mxu0 %v1115_v61  ;;  %v1294_v53 = vld [vmem:[%s2593_s1 + $0x188] sm:$0xf]  ;;  %v1659_v55 = vld [vmem:[%s2593_s1 + $0x194] sm:$0xf0]  ;;  %v1167_v61 = vor.u32 %v1627_v52, %v1166_v51  ;;  %v1344_v52 = vld [vmem:[%s2593_s1 + $0x1f8] sm:$0xf0] }
  0x3d   :  { %892 = vmatpush.bf16.msrb.mxu1 %v1243_v0  ;;  %v1422_v56 = vld [vmem:[%s2593_s1 + $0x288] sm:$0xf]  ;;  %v1691_v57 = vld [vmem:[%s2593_s1 + $0x294] sm:$0xf0]  ;;  %v1295_v62 = vor.u32 %v1659_v55, %v1294_v53  ;;  %v1701_v53 = vld [vmem:[%s2593_s1 + $0x2ec] sm:$0xf] }
  0x3e   :  { %906 = vmatpush.bf16.msrb.mxu2 %v1371_v1  ;;  %v1550_v58 = vld [vmem:[%s2593_s1 + $0x388] sm:$0xf]  ;;  %v1723_v60 = vld [vmem:[%s2593_s1 + $0x394] sm:$0xf0]  ;;  %v1423_v63 = vor.u32 %v1691_v57, %v1422_v56  ;;  %v1733_v57 = vld [vmem:[%s2593_s1 + $0x3ec] sm:$0xf] }
  0x3f   :  { %920 = vmatpush.bf16.msrb.mxu3 %v1499_v6  ;;  %v1150_v0 = vld [vmem:[%s2593_s1 + $0x68] sm:$0xf]  ;;  %v1623_v1 = vld [vmem:[%s2593_s1 + $0x74] sm:$0xf0]  ;;  %v1551_v3 = vor.u32 %v1723_v60, %v1550_v58  ;;  %v1600_v58 = vld [vmem:[%s2593_s1 + $0x3f8] sm:$0xf0] }
  0x40   :  { %879 = vmatpush.bf16.msrb.mxu0 %v1099_v14  ;;  %v1278_v2 = vld [vmem:[%s2593_s1 + $0x168] sm:$0xf]  ;;  %v1655_v4 = vld [vmem:[%s2593_s1 + $0x174] sm:$0xf0]  ;;  %v1151_v11 = vor.u32 %v1623_v1, %v1150_v0  ;;  %v1633_v0 = vld [vmem:[%s2593_s1 + $0xcc] sm:$0xf] }
  0x41   :  { %893 = vmatpush.bf16.msrb.mxu1 %v1227_v19  ;;  %v1406_v6 = vld [vmem:[%s2593_s1 + $0x268] sm:$0xf]  ;;  %v1687_v7 = vld [vmem:[%s2593_s1 + $0x274] sm:$0xf0]  ;;  %v1279_v12 = vor.u32 %v1655_v4, %v1278_v2  ;;  %v1200_v1 = vld [vmem:[%s2593_s1 + $0xd8] sm:$0xf0] }
  0x42   :  { %907 = vmatpush.bf16.msrb.mxu2 %v1355_v20  ;;  %v1534_v8 = vld [vmem:[%s2593_s1 + $0x368] sm:$0xf]  ;;  %v1719_v9 = vld [vmem:[%s2593_s1 + $0x374] sm:$0xf0]  ;;  %v1407_v13 = vor.u32 %v1687_v7, %v1406_v6  ;;  %v1665_v2 = vld [vmem:[%s2593_s1 + $0x1cc] sm:$0xf] }
  0x43   :  { %921 = vmatpush.bf16.msrb.mxu3 %v1483_v23  ;;  %880 = vmatmul.bf16.vlgmr.msrb.gmra.mxu0 %v2035_v5  ;;  %v1134_v14 = vld [vmem:[%s2593_s1 + $0x48] sm:$0xf]  ;;  %v1619_v15 = vld [vmem:[%s2593_s1 + $0x54] sm:$0xf0]  ;;  %v1535_v18 = vor.u32 %v1719_v9, %v1534_v8  ;;  %v1328_v4 = vld [vmem:[%s2593_s1 + $0x1d8] sm:$0xf0] }
  0x44   :  { %928 = vmatpush.bf16.msra.mxu0 %v1215_v24  ;;  %894 = vmatmul.bf16.vlgmr.msrb.gmra.mxu1 %v2060_v17  ;;  %v1262_v16 = vld [vmem:[%s2593_s1 + $0x148] sm:$0xf]  ;;  %v1651_v19 = vld [vmem:[%s2593_s1 + $0x154] sm:$0xf0]  ;;  %v1135_v24 = vor.u32 %v1619_v15, %v1134_v14  ;;  %v1697_v6 = vld [vmem:[%s2593_s1 + $0x2cc] sm:$0xf] }
  0x45   :  { %942 = vmatpush.bf16.msra.mxu1 %v1343_v25  ;;  %908 = vmatmul.bf16.vlgmr.msrb.gmra.mxu2 %v2014_v59  ;;  %v1390_v20 = vld [vmem:[%s2593_s1 + $0x248] sm:$0xf]  ;;  %v1683_v21 = vld [vmem:[%s2593_s1 + $0x254] sm:$0xf0]  ;;  %v1263_v25 = vor.u32 %v1651_v19, %v1262_v16  ;;  %v1456_v7 = vld [vmem:[%s2593_s1 + $0x2d8] sm:$0xf0] }
  0x46   :  { %956 = vmatpush.bf16.msra.mxu2 %v1471_v26  ;;  %922 = vmatmul.bf16.vlgmr.msrb.gmra.mxu3 %v2046_v10  ;;  %v1518_v22 = vld [vmem:[%s2593_s1 + $0x348] sm:$0xf]  ;;  %v1715_v23 = vld [vmem:[%s2593_s1 + $0x354] sm:$0xf0]  ;;  %v1391_v26 = vor.u32 %v1683_v21, %v1390_v20  ;;  %v1729_v8 = vld [vmem:[%s2593_s1 + $0x3cc] sm:$0xf] }
  0x47   :  { %970 = vmatpush.bf16.msra.mxu3 %v1599_v30  ;;  %v1118_v27 = vld [vmem:[%s2593_s1 + $0x28] sm:$0xf]  ;;  %v1615_v28 = vld [vmem:[%s2593_s1 + $0x34] sm:$0xf0]  ;;  %v1519_v30 = vor.u32 %v1715_v23, %v1518_v22  ;;  %v1584_v9 = vld [vmem:[%s2593_s1 + $0x3d8] sm:$0xf0] }
  0x48   :  { %929 = vmatpush.bf16.msra.mxu0 %v1199_v36  ;;  %v1246_v29 = vld [vmem:[%s2593_s1 + $0x128] sm:$0xf]  ;;  %v1647_v31 = vld [vmem:[%s2593_s1 + $0x134] sm:$0xf0]  ;;  %v1119_v36 = vor.u32 %v1615_v28, %v1118_v27  ;;  %v1629_v14 = vld [vmem:[%s2593_s1 + $0xac] sm:$0xf] }
  0x49   :  { %943 = vmatpush.bf16.msra.mxu1 %v1327_v37  ;;  %v1374_v32 = vld [vmem:[%s2593_s1 + $0x228] sm:$0xf]  ;;  %v1679_v33 = vld [vmem:[%s2593_s1 + $0x234] sm:$0xf0]  ;;  %v1247_v39 = vor.u32 %v1647_v31, %v1246_v29  ;;  %v1184_v15 = vld [vmem:[%s2593_s1 + $0xb8] sm:$0xf0] }
  0x4a   :  { %957 = vmatpush.bf16.msra.mxu2 %v1455_v38  ;;  %v1502_v34 = vld [vmem:[%s2593_s1 + $0x328] sm:$0xf]  ;;  %v1711_v35 = vld [vmem:[%s2593_s1 + $0x334] sm:$0xf0]  ;;  %v1375_v40 = vor.u32 %v1679_v33, %v1374_v32  ;;  %v1661_v16 = vld [vmem:[%s2593_s1 + $0x1ac] sm:$0xf] }
  0x4b   :  { %971 = vmatpush.bf16.msra.mxu3 %v1583_v42  ;;  %v1102_v37 = vld [vmem:[%s2593_s1 + $0x8] sm:$0xf]  ;;  %v1611_v38 = vld [vmem:[%s2593_s1 + $0x14] sm:$0xf0]  ;;  %v1503_v44 = vor.u32 %v1711_v35, %v1502_v34  ;;  %v1312_v19 = vld [vmem:[%s2593_s1 + $0x1b8] sm:$0xf0] }
  0x4c   :  { %930 = vmatpush.bf16.msra.mxu0 %v1183_v48  ;;  %v1230_v41 = vld [vmem:[%s2593_s1 + $0x108] sm:$0xf]  ;;  %v1643_v42 = vld [vmem:[%s2593_s1 + $0x114] sm:$0xf0]  ;;  %v1637_v48 = vld [vmem:[%s2593_s1 + $0xec] sm:$0xf]  ;;  %v1103_v51 = vor.u32 %v1611_v38, %v1102_v37 }
  0x4d   :  { %944 = vmatpush.bf16.msra.mxu1 %v1311_v49  ;;  %v1358_v43 = vld [vmem:[%s2593_s1 + $0x208] sm:$0xf]  ;;  %v1675_v45 = vld [vmem:[%s2593_s1 + $0x214] sm:$0xf0]  ;;  %v1216_v49 = vld [vmem:[%s2593_s1 + $0xf8] sm:$0xf0]  ;;  %v1231_v55 = vor.u32 %v1643_v42, %v1230_v41 }
  0x4e   :  { %958 = vmatpush.bf16.msra.mxu2 %v1439_v50  ;;  %v1486_v46 = vld [vmem:[%s2593_s1 + $0x308] sm:$0xf]  ;;  %v1707_v47 = vld [vmem:[%s2593_s1 + $0x314] sm:$0xf0]  ;;  %v1669_v50 = vld [vmem:[%s2593_s1 + $0x1ec] sm:$0xf]  ;;  %v1359_v56 = vor.u32 %v1675_v45, %v1358_v43 }
  0x4f   :  { %972 = vmatpush.bf16.msra.mxu3 %v1567_v54  ;;  %v1472_v54 = vld [vmem:[%s2593_s1 + $0x2f8] sm:$0xf0]  ;;  %v1487_v60 = vor.u32 %v1707_v47, %v1486_v46  ;;  %v1693_v20 = vld [vmem:[%s2593_s1 + $0x2ac] sm:$0xf] }
  0x50   :  { %931 = vmatpush.bf16.msra.mxu0 %v1167_v61  ;;  %v1219_v61 = vor.u32 %v1637_v48, %v1216_v49  ;;  %v1440_v21 = vld [vmem:[%s2593_s1 + $0x2b8] sm:$0xf0]  ;;  %v1725_v22 = vld [vmem:[%s2593_s1 + $0x3ac] sm:$0xf] }
  0x51   :  { %945 = vmatpush.bf16.msra.mxu1 %v1295_v62  ;;  %v1347_v62 = vor.u32 %v1669_v50, %v1344_v52  ;;  %v1568_v23 = vld [vmem:[%s2593_s1 + $0x3b8] sm:$0xf0]  ;;  %v1625_v27 = vld [vmem:[%s2593_s1 + $0x8c] sm:$0xf] }
  0x52   :  { %959 = vmatpush.bf16.msra.mxu2 %v1423_v63  ;;  %v1475_v63 = vor.u32 %v1701_v53, %v1472_v54  ;;  %v1168_v28 = vld [vmem:[%s2593_s1 + $0x98] sm:$0xf0]  ;;  %v1657_v29 = vld [vmem:[%s2593_s1 + $0x18c] sm:$0xf] }
  0x53   :  { %973 = vmatpush.bf16.msra.mxu3 %v1551_v3  ;;  %v1603_v3 = vor.u32 %v1733_v57, %v1600_v58  ;;  %v1296_v31 = vld [vmem:[%s2593_s1 + $0x198] sm:$0xf0]  ;;  %v1689_v32 = vld [vmem:[%s2593_s1 + $0x28c] sm:$0xf] }
  0x54   :  { %932 = vmatpush.bf16.msra.mxu0 %v1151_v11  ;;  %v1203_v11 = vor.u32 %v1633_v0, %v1200_v1  ;;  %v1424_v33 = vld [vmem:[%s2593_s1 + $0x298] sm:$0xf0]  ;;  %v1721_v34 = vld [vmem:[%s2593_s1 + $0x38c] sm:$0xf]  ;;  %v1299_v37 = vor.u32 %v1657_v29, %v1296_v31 }
  0x55   :  { %946 = vmatpush.bf16.msra.mxu1 %v1279_v12  ;;  %v1331_v12 = vor.u32 %v1665_v2, %v1328_v4  ;;  %v1552_v35 = vld [vmem:[%s2593_s1 + $0x398] sm:$0xf0]  ;;  %v1427_v38 = vor.u32 %v1689_v32, %v1424_v33  ;;  %v1653_v41 = vld [vmem:[%s2593_s1 + $0x16c] sm:$0xf] }
  0x56   :  { %960 = vmatpush.bf16.msra.mxu2 %v1407_v13  ;;  %v1459_v13 = vor.u32 %v1697_v6, %v1456_v7  ;;  %v1555_v42 = vor.u32 %v1721_v34, %v1552_v35  ;;  %v1280_v43 = vld [vmem:[%s2593_s1 + $0x178] sm:$0xf0]  ;;  %v1717_v46 = vld [vmem:[%s2593_s1 + $0x36c] sm:$0xf] }
  0x57   :  { %974 = vmatpush.bf16.msra.mxu3 %v1535_v18  ;;  %v1587_v18 = vor.u32 %v1729_v8, %v1584_v9  ;;  %v1408_v45 = vld [vmem:[%s2593_s1 + $0x278] sm:$0xf0]  ;;  %v1283_v49 = vor.u32 %v1653_v41, %v1280_v43  ;;  %v1649_v53 = vld [vmem:[%s2593_s1 + $0x14c] sm:$0xf] }
  0x58   :  { %933 = vmatpush.bf16.msra.mxu0 %v1135_v24  ;;  %v1187_v24 = vor.u32 %v1629_v14, %v1184_v15  ;;  %v1536_v47 = vld [vmem:[%s2593_s1 + $0x378] sm:$0xf0]  ;;  %v1713_v58 = vld [vmem:[%s2593_s1 + $0x34c] sm:$0xf] }
  0x59   :  { %947 = vmatpush.bf16.msra.mxu1 %v1263_v25  ;;  %v1315_v25 = vor.u32 %v1661_v16, %v1312_v19  ;;  %v1136_v52 = vld [vmem:[%s2593_s1 + $0x58] sm:$0xf0]  ;;  %v1539_v54 = vor.u32 %v1717_v46, %v1536_v47  ;;  %v1613_v0 = vld [vmem:[%s2593_s1 + $0x2c] sm:$0xf] }
  0x5a   :  { %961 = vmatpush.bf16.msra.mxu2 %v1391_v26  ;;  %v1443_v26 = vor.u32 %v1693_v20, %v1440_v21  ;;  %v1392_v57 = vld [vmem:[%s2593_s1 + $0x258] sm:$0xf0]  ;;  %v1645_v2 = vld [vmem:[%s2593_s1 + $0x12c] sm:$0xf] }
  0x5b   :  { %975 = vmatpush.bf16.msra.mxu3 %v1519_v30  ;;  %v1571_v30 = vor.u32 %v1725_v22, %v1568_v23  ;;  %v1120_v1 = vld [vmem:[%s2593_s1 + $0x38] sm:$0xf0]  ;;  %v1677_v6 = vld [vmem:[%s2593_s1 + $0x22c] sm:$0xf] }
  0x5c   :  { %934 = vmatpush.bf16.msra.mxu0 %v1119_v36  ;;  %v1171_v36 = vor.u32 %v1625_v27, %v1168_v28  ;;  %v1248_v4 = vld [vmem:[%s2593_s1 + $0x138] sm:$0xf0]  ;;  %v1709_v8 = vld [vmem:[%s2593_s1 + $0x32c] sm:$0xf] }
  0x5d   :  { %948 = vmatpush.bf16.msra.mxu1 %v1247_v39  ;;  %v1621_v39 = vld [vmem:[%s2593_s1 + $0x6c] sm:$0xf]  ;;  %v1376_v7 = vld [vmem:[%s2593_s1 + $0x238] sm:$0xf0] }
  0x5e   :  { %962 = vmatpush.bf16.msra.mxu2 %v1375_v40  ;;  %v1152_v40 = vld [vmem:[%s2593_s1 + $0x78] sm:$0xf0]  ;;  %v1609_v14 = vld [vmem:[%s2593_s1 + $0xc] sm:$0xf] }
  0x5f   :  { %976 = vmatpush.bf16.msra.mxu3 %v1503_v44  ;;  %v1685_v44 = vld [vmem:[%s2593_s1 + $0x26c] sm:$0xf]  ;;  %v1155_v48 = vor.u32 %v1621_v39, %v1152_v40  ;;  %v1504_v9 = vld [vmem:[%s2593_s1 + $0x338] sm:$0xf0] }
  0x60   :  { %935 = vmatpush.bf16.msra.mxu0 %v1103_v51  ;;  %v1411_v50 = vor.u32 %v1685_v44, %v1408_v45  ;;  %v1617_v51 = vld [vmem:[%s2593_s1 + $0x4c] sm:$0xf]  ;;  %v1104_v15 = vld [vmem:[%s2593_s1 + $0x18] sm:$0xf0] }
  0x61   :  { %949 = vmatpush.bf16.msra.mxu1 %v1231_v55  ;;  %v1264_v55 = vld [vmem:[%s2593_s1 + $0x158] sm:$0xf0]  ;;  %v1641_v16 = vld [vmem:[%s2593_s1 + $0x10c] sm:$0xf] }
  0x62   :  { %963 = vmatpush.bf16.msra.mxu2 %v1359_v56  ;;  %v1681_v56 = vld [vmem:[%s2593_s1 + $0x24c] sm:$0xf]  ;;  %v1232_v19 = vld [vmem:[%s2593_s1 + $0x118] sm:$0xf0] }
  0x63   :  { %977 = vmatpush.bf16.msra.mxu3 %v1487_v60  ;;  %936 = vmatmul.bf16.vlgmr.msra.gmra.mxu0 %v2035_v5  ;;  %v1520_v60 = vld [vmem:[%s2593_s1 + $0x358] sm:$0xf0]  ;;  %v1673_v20 = vld [vmem:[%s2593_s1 + $0x20c] sm:$0xf] }
  0x64   :  { %984 = vmatpush.bf16.msrb.mxu0 %v1219_v61  ;;  %950 = vmatmul.bf16.vlgmr.msra.gmra.mxu1 %v2060_v17  ;;  %v1139_v61 = vor.u32 %v1617_v51, %v1136_v52  ;;  %v1360_v21 = vld [vmem:[%s2593_s1 + $0x218] sm:$0xf0]  ;;  %v1705_v22 = vld [vmem:[%s2593_s1 + $0x30c] sm:$0xf] }
  0x65   :  { %998 = vmatpush.bf16.msrb.mxu1 %v1347_v62  ;;  %964 = vmatmul.bf16.vlgmr.msra.gmra.mxu2 %v2014_v59  ;;  %v1267_v62 = vor.u32 %v1649_v53, %v1264_v55  ;;  %v1488_v23 = vld [vmem:[%s2593_s1 + $0x318] sm:$0xf0] }
  0x66   :  { %1012 = vmatpush.bf16.msrb.mxu2 %v1475_v63  ;;  %978 = vmatmul.bf16.vlgmr.msra.gmra.mxu3 %v2046_v10  ;;  %v1395_v63 = vor.u32 %v1681_v56, %v1392_v57  ;;  %v1491_v27 = vor.u32 %v1705_v22, %v1488_v23 }
  0x67   :  { %1026 = vmatpush.bf16.msrb.mxu3 %v1603_v3  ;;  %v1523_v3 = vor.u32 %v1713_v58, %v1520_v60 }
  0x68   :  { %985 = vmatpush.bf16.msrb.mxu0 %v1203_v11  ;;  %v1123_v11 = vor.u32 %v1613_v0, %v1120_v1 }
  0x69   :  { %999 = vmatpush.bf16.msrb.mxu1 %v1331_v12  ;;  %v1251_v12 = vor.u32 %v1645_v2, %v1248_v4 }
  0x6a   :  { %1013 = vmatpush.bf16.msrb.mxu2 %v1459_v13  ;;  %v1379_v13 = vor.u32 %v1677_v6, %v1376_v7 }
  0x6b   :  { %1027 = vmatpush.bf16.msrb.mxu3 %v1587_v18  ;;  %v1507_v18 = vor.u32 %v1709_v8, %v1504_v9 }
  0x6c   :  { %986 = vmatpush.bf16.msrb.mxu0 %v1187_v24  ;;  %v1107_v24 = vor.u32 %v1609_v14, %v1104_v15 }
  0x6d   :  { %1000 = vmatpush.bf16.msrb.mxu1 %v1315_v25  ;;  %v1235_v25 = vor.u32 %v1641_v16, %v1232_v19 }
  0x6e   :  { %1014 = vmatpush.bf16.msrb.mxu2 %v1443_v26  ;;  %v1363_v26 = vor.u32 %v1673_v20, %v1360_v21 }
  0x6f   :  { %1028 = vmatpush.bf16.msrb.mxu3 %v1571_v30  ;;  %v2575_v30 = vld [vmem:[%s2595_s2] sm:$0xf] }
  0x70   :  { %987 = vmatpush.bf16.msrb.mxu0 %v1171_v36  ;;  %v148_v33 = vperm.slane %v2575_v30, 0  ;;  %v151_v16 = vperm.slane %v2575_v30, 3 }
  0x71   :  { %1001 = vmatpush.bf16.msrb.mxu1 %v1299_v37 }
  0x72   :  { %1015 = vmatpush.bf16.msrb.mxu2 %v1427_v38 }
  0x73   :  { %1029 = vmatpush.bf16.msrb.mxu3 %v1555_v42 }
  0x74   :  { %988 = vmatpush.bf16.msrb.mxu0 %v1155_v48 }
  0x75   :  { %1002 = vmatpush.bf16.msrb.mxu1 %v1283_v49 }
  0x76   :  { %1016 = vmatpush.bf16.msrb.mxu2 %v1411_v50 }
  0x77   :  { %1030 = vmatpush.bf16.msrb.mxu3 %v1539_v54 }
  0x78   :  { %989 = vmatpush.bf16.msrb.mxu0 %v1139_v61 }
  0x79   :  { %1003 = vmatpush.bf16.msrb.mxu1 %v1267_v62 }
  0x7a   :  { %1017 = vmatpush.bf16.msrb.mxu2 %v1395_v63 }
  0x7b   :  { %1031 = vmatpush.bf16.msrb.mxu3 %v1523_v3 }
  0x7c   :  { %990 = vmatpush.bf16.msrb.mxu0 %v1123_v11  ;;  %v150_v11 = vperm.slane %v2575_v30, 2 }
  0x7d   :  { %1004 = vmatpush.bf16.msrb.mxu1 %v1251_v12 }
  0x7e   :  { %1018 = vmatpush.bf16.msrb.mxu2 %v1379_v13 }
  0x7f   :  { %1032 = vmatpush.bf16.msrb.mxu3 %v1507_v18 }
  0x80   :  { %991 = vmatpush.bf16.msrb.mxu0 %v1107_v24 }
  0x81   :  { %1005 = vmatpush.bf16.msrb.mxu1 %v1235_v25 }
  0x82   :  { %1019 = vmatpush.bf16.msrb.mxu2 %v1363_v26 }
  0x83   :  { %1033 = vmatpush.bf16.msrb.mxu3 %v1491_v27  ;;  %992 = vmatmul.bf16.vlgmr.msrb.gmra.mxu0 %v2035_v5 }
  0x84   :  { %1006 = vmatmul.bf16.vlgmr.msrb.gmra.mxu1 %v2060_v17 }
  0x85   :  { %1020 = vmatmul.bf16.vlgmr.msrb.gmra.mxu2 %v2014_v59  ;;  %v149_v59 = vperm.slane %v2575_v30, 1 }
  0x86   :  { %1034 = vmatmul.bf16.vlgmr.msrb.gmra.mxu3 %v2046_v10 }
  0xa3   :  { %v825_v28 = vpop.f32.mrf.mxu0 }
  0xa4   :  { %v839_v29 = vpop.f32.mrf.mxu1  ;;  %v826_v5 = vadd.f32 %v825_v28, %v148_v33 }
  0xa6   :  { %v840_v17 = vadd.f32 %v839_v29, %v826_v5 }
  0xa8   :  { %v853_v31 = vpop.f32.mrf.mxu2 }
  0xa9   :  { %v854_v10 = vadd.f32 %v853_v31, %v840_v17 }
  0xab   :  { %v867_v32 = vpop.f32.mrf.mxu3  ;;  %v827_v34 = vpop.f32.mrf.mxu0 }
  0xac   :  { %v841_v35 = vpop.f32.mrf.mxu1  ;;  %v828_v38 = vadd.f32 %v827_v34, %v148_v33  ;;  %v868_v43 = vadd.f32 %v867_v32, %v854_v10 }
  0xae   :  { %v842_v44 = vadd.f32 %v841_v35, %v828_v38  ;;  %v1048_v48 = vmul.f32 0.01, %v868_v43  ;;  %vm1040_vm0 = vcmp.gt.f32.partialorder %v868_v43, 0.0 }
  0xb0   :  { %v855_v36 = vpop.f32.mrf.mxu2  ;;  %v1056_v56 = vsel %vm1040_vm0, %v868_v43, %v1048_v48 }
  0xb1   :  { %v856_v49 = vadd.f32 %v855_v36, %v842_v44 }
  0xb3   :  { %v869_v37 = vpop.f32.mrf.mxu3 }
  0xb4   :  { %v870_v57 = vadd.f32 %v869_v37, %v856_v49 }
  0xb6   :  { %v1052_v0 = vmul.f32 0.01, %v870_v57  ;;  %vm1044_vm2 = vcmp.gt.f32.partialorder %v870_v57, 0.0 }
  0xb8   :  { %v1060_v3 = vsel %vm1044_vm2, %v870_v57, %v1052_v0 }
  0xc0   :  { %v881_v39 = vpop.f32.mrf.mxu0 }
  0xc1   :  { %v882_v40 = vadd.f32 %v881_v39, %v149_v59  ;;  %v895_v41 = vpop.f32.mrf.mxu1 }
  0xc3   :  { %v896_v42 = vadd.f32 %v895_v41, %v882_v40 }
  0xc8   :  { %v909_v45 = vpop.f32.mrf.mxu2  ;;  %v883_v51 = vpop.f32.mrf.mxu0 }
  0xc9   :  { %v910_v46 = vadd.f32 %v909_v45, %v896_v42  ;;  %v923_v47 = vpop.f32.mrf.mxu3  ;;  %v884_v52 = vadd.f32 %v883_v51, %v149_v59  ;;  %v897_v53 = vpop.f32.mrf.mxu1 }
  0xcb   :  { %v924_v50 = vadd.f32 %v923_v47, %v910_v46  ;;  %v898_v55 = vadd.f32 %v897_v53, %v884_v52 }
  0xcd   :  { %vm1041_vm1 = vcmp.gt.f32.partialorder %v924_v50, 0.0  ;;  %v1049_v54 = vmul.f32 0.01, %v924_v50 }
  0xcf   :  { %v1057_v58 = vsel %vm1041_vm1, %v924_v50, %v1049_v54 }
  0xd0   :  { %v1064_v60 = vpack.c.bf16 %v1057_v58, %v1056_v56  ;;  %v911_v61 = vpop.f32.mrf.mxu2 }
  0xd1   :  { %v912_v62 = vadd.f32 %v911_v61, %v898_v55  ;;  %v925_v63 = vpop.f32.mrf.mxu3 }
  0xd2   :  { %1068 = vst [vmem:[%s2596_s3] sm:$0xff] %v1064_v60 }
  0xd3   :  { %v926_v1 = vadd.f32 %v925_v63, %v912_v62 }
  0xd5   :  { %vm1045_vm3 = vcmp.gt.f32.partialorder %v926_v1, 0.0  ;;  %v1053_v2 = vmul.f32 0.01, %v926_v1 }
  0xd7   :  { %v1061_v4 = vsel %vm1045_vm3, %v926_v1, %v1053_v2 }
  0xd8   :  { %v1066_v6 = vpack.c.bf16 %v1061_v4, %v1060_v3 }
  0xda   :  { %1070 = vst [vmem:[%s2596_s3 + $0x10] sm:$0xff] %v1066_v6 }
  0xe0   :  { %v937_v7 = vpop.f32.mrf.mxu0 }
  0xe1   :  { %v951_v8 = vpop.f32.mrf.mxu1  ;;  %v938_v14 = vadd.f32 %v937_v7, %v150_v11 }
  0xe3   :  { %v952_v18 = vadd.f32 %v951_v8, %v938_v14 }
  0xe8   :  { %v965_v9 = vpop.f32.mrf.mxu2  ;;  %v939_v13 = vpop.f32.mrf.mxu0 }
  0xe9   :  { %v979_v12 = vpop.f32.mrf.mxu3  ;;  %v953_v15 = vpop.f32.mrf.mxu1  ;;  %v966_v23 = vadd.f32 %v965_v9, %v952_v18  ;;  %v940_v24 = vadd.f32 %v939_v13, %v150_v11 }
  0xeb   :  { %v980_v27 = vadd.f32 %v979_v12, %v966_v23  ;;  %v954_v28 = vadd.f32 %v953_v15, %v940_v24 }
  0xed   :  { %v1050_v34 = vmul.f32 0.01, %v980_v27  ;;  %vm1042_vm4 = vcmp.gt.f32.partialorder %v980_v27, 0.0 }
  0xef   :  { %v1058_v37 = vsel %vm1042_vm4, %v980_v27, %v1050_v34 }
  0xf0   :  { %v967_v19 = vpop.f32.mrf.mxu2 }
  0xf1   :  { %v981_v20 = vpop.f32.mrf.mxu3  ;;  %v968_v35 = vadd.f32 %v967_v19, %v954_v28 }
  0xf3   :  { %v982_v59 = vadd.f32 %v981_v20, %v968_v35 }
  0xf5   :  { %v1054_v43 = vmul.f32 0.01, %v982_v59  ;;  %vm1046_vm6 = vcmp.gt.f32.partialorder %v982_v59, 0.0 }
  0xf7   :  { %v1062_v46 = vsel %vm1046_vm6, %v982_v59, %v1054_v43 }
 0x100   :  { %v993_v21 = vpop.f32.mrf.mxu0 }
 0x101   :  { %v994_v22 = vadd.f32 %v993_v21, %v151_v16  ;;  %v1007_v25 = vpop.f32.mrf.mxu1 }
 0x103   :  { %v1008_v26 = vadd.f32 %v1007_v25, %v994_v22 }
 0x108   :  { %v1021_v29 = vpop.f32.mrf.mxu2  ;;  %v995_v33 = vpop.f32.mrf.mxu0 }
 0x109   :  { %v1022_v31 = vadd.f32 %v1021_v29, %v1008_v26  ;;  %v1035_v32 = vpop.f32.mrf.mxu3  ;;  %v996_v36 = vadd.f32 %v995_v33, %v151_v16  ;;  %v1009_v17 = vpop.f32.mrf.mxu1 }
 0x10b   :  { %v1036_v5 = vadd.f32 %v1035_v32, %v1022_v31  ;;  %v1010_v38 = vadd.f32 %v1009_v17, %v996_v36 }
 0x10d   :  { %vm1043_vm5 = vcmp.gt.f32.partialorder %v1036_v5, 0.0  ;;  %v1051_v30 = vmul.f32 0.01, %v1036_v5 }
 0x10f   :  { %v1059_v10 = vsel %vm1043_vm5, %v1036_v5, %v1051_v30 }
 0x110   :  { %v1065_v39 = vpack.c.bf16 %v1059_v10, %v1058_v37  ;;  %v1023_v40 = vpop.f32.mrf.mxu2 }
 0x111   :  { %v1024_v41 = vadd.f32 %v1023_v40, %v1010_v38  ;;  %v1037_v42 = vpop.f32.mrf.mxu3 }
 0x112   :  { %1069 = vst [vmem:[%s2596_s3 + $0x8] sm:$0xff] %v1065_v39 }
 0x113   :  { %v1038_v44 = vadd.f32 %v1037_v42, %v1024_v41 }
 0x115   :  { %vm1047_vm7 = vcmp.gt.f32.partialorder %v1038_v44, 0.0  ;;  %v1055_v45 = vmul.f32 0.01, %v1038_v44 }
 0x117   :  { %v1063_v47 = vsel %vm1047_vm7, %v1038_v44, %v1055_v45 }
 0x118   :  { %v1067_v48 = vpack.c.bf16 %v1063_v47, %v1062_v46 }
 0x11a   :  { %1071 = vst [vmem:[%s2596_s3 + $0x18] sm:$0xff] %v1067_v48 }

// kernel: autoencoder_pc_forward.14
= control target key start
LH: loop header
LB: loop body
LE: loop exit
PB: predicated region body
PF: predicated region fallthrough
CT: control target
= control target key end

     0   :  { %s2495_s1 = inlined_call_operand.vmem [shape: bf16[512,256], index: 1, kind: input, shape index: {}]   ;;  %s2496_s0 = inlined_call_operand.vmem [shape: bf16[128,512], index: 0, kind: input, shape index: {}]   ;;  %s2497_s2 = inlined_call_operand.vmem [shape: f32[1,256], index: 2, kind: input, shape index: {}]   ;;  %s2498_s3 = inlined_call_operand.vmem [shape: bf16[128,256], index: 3, kind: output, shape index: {}]  }
   0x1   :  { %v1306_v0 = vld [vmem:[%s2495_s1 + $0x70] sm:$0xf]  ;;  %v1551_v1 = vld [vmem:[%s2495_s1 + $0x74] sm:$0xf0]  ;;  %v1298_v11 = vld [vmem:[%s2495_s1 + $0x60] sm:$0xf] }
   0x2   :  { %v1370_v2 = vld [vmem:[%s2495_s1 + $0xf0] sm:$0xf]  ;;  %v1307_v3 = vor.u32 %v1551_v1, %v1306_v0  ;;  %v1567_v4 = vld [vmem:[%s2495_s1 + $0xf4] sm:$0xf0]  ;;  %v1549_v13 = vld [vmem:[%s2495_s1 + $0x64] sm:$0xf0] }
   0x3   :  { %v1434_v5 = vld [vmem:[%s2495_s1 + $0x170] sm:$0xf]  ;;  %v1583_v6 = vld [vmem:[%s2495_s1 + $0x174] sm:$0xf0]  ;;  %v1371_v7 = vor.u32 %v1567_v4, %v1370_v2  ;;  %v1362_v14 = vld [vmem:[%s2495_s1 + $0xe0] sm:$0xf]  ;;  %v1299_v16 = vor.u32 %v1549_v13, %v1298_v11 }
   0x4   :  { %v1435_v8 = vor.u32 %v1583_v6, %v1434_v5  ;;  %v1498_v9 = vld [vmem:[%s2495_s1 + $0x1f0] sm:$0xf]  ;;  %v1599_v10 = vld [vmem:[%s2495_s1 + $0x1f4] sm:$0xf0]  ;;  %596 = vmatpush.bf16.msra.mxu0 %v1307_v3  ;;  %v1565_v15 = vld [vmem:[%s2495_s1 + $0xe4] sm:$0xf0] }
   0x5   :  { %v1499_v12 = vor.u32 %v1599_v10, %v1498_v9  ;;  %645 = vmatpush.bf16.msra.mxu1 %v1371_v7  ;;  %v1363_v17 = vor.u32 %v1565_v15, %v1362_v14  ;;  %v1426_v18 = vld [vmem:[%s2495_s1 + $0x160] sm:$0xf]  ;;  %v1581_v19 = vld [vmem:[%s2495_s1 + $0x164] sm:$0xf0]  ;;  %v1290_v23 = vld [vmem:[%s2495_s1 + $0x50] sm:$0xf] }
   0x6   :  { %694 = vmatpush.bf16.msra.mxu2 %v1435_v8  ;;  %v1490_v20 = vld [vmem:[%s2495_s1 + $0x1e0] sm:$0xf]  ;;  %v1427_v21 = vor.u32 %v1581_v19, %v1426_v18  ;;  %v1597_v22 = vld [vmem:[%s2495_s1 + $0x1e4] sm:$0xf0]  ;;  %v1547_v24 = vld [vmem:[%s2495_s1 + $0x54] sm:$0xf0] }
   0x7   :  { %743 = vmatpush.bf16.msra.mxu3 %v1499_v12  ;;  %v1491_v25 = vor.u32 %v1597_v22, %v1490_v20  ;;  %v1354_v26 = vld [vmem:[%s2495_s1 + $0xd0] sm:$0xf]  ;;  %v1563_v27 = vld [vmem:[%s2495_s1 + $0xd4] sm:$0xf0]  ;;  %v1291_v29 = vor.u32 %v1547_v24, %v1290_v23  ;;  %v1282_v35 = vld [vmem:[%s2495_s1 + $0x40] sm:$0xf] }
   0x8   :  { %v1418_v28 = vld [vmem:[%s2495_s1 + $0x150] sm:$0xf]  ;;  %597 = vmatpush.bf16.msra.mxu0 %v1299_v16  ;;  %v1579_v30 = vld [vmem:[%s2495_s1 + $0x154] sm:$0xf0]  ;;  %v1355_v33 = vor.u32 %v1563_v27, %v1354_v26  ;;  %v1545_v36 = vld [vmem:[%s2495_s1 + $0x44] sm:$0xf0] }
   0x9   :  { %v1482_v31 = vld [vmem:[%s2495_s1 + $0x1d0] sm:$0xf]  ;;  %v1595_v32 = vld [vmem:[%s2495_s1 + $0x1d4] sm:$0xf0]  ;;  %646 = vmatpush.bf16.msra.mxu1 %v1363_v17  ;;  %v1419_v34 = vor.u32 %v1579_v30, %v1418_v28  ;;  %v1346_v37 = vld [vmem:[%s2495_s1 + $0xc0] sm:$0xf]  ;;  %v1283_v44 = vor.u32 %v1545_v36, %v1282_v35 }
   0xa   :  { %695 = vmatpush.bf16.msra.mxu2 %v1427_v21  ;;  %v1483_v38 = vor.u32 %v1595_v32, %v1482_v31  ;;  %v1561_v39 = vld [vmem:[%s2495_s1 + $0xc4] sm:$0xf0]  ;;  %v1410_v40 = vld [vmem:[%s2495_s1 + $0x140] sm:$0xf]  ;;  %v1274_v47 = vld [vmem:[%s2495_s1 + $0x30] sm:$0xf] }
   0xb   :  { %744 = vmatpush.bf16.msra.mxu3 %v1491_v25  ;;  %v1577_v41 = vld [vmem:[%s2495_s1 + $0x144] sm:$0xf0]  ;;  %v1474_v42 = vld [vmem:[%s2495_s1 + $0x1c0] sm:$0xf]  ;;  %v1347_v45 = vor.u32 %v1561_v39, %v1346_v37  ;;  %v1543_v48 = vld [vmem:[%s2495_s1 + $0x34] sm:$0xf0] }
   0xc   :  { %v1593_v43 = vld [vmem:[%s2495_s1 + $0x1c4] sm:$0xf0]  ;;  %598 = vmatpush.bf16.msra.mxu0 %v1291_v29  ;;  %v1411_v46 = vor.u32 %v1577_v41, %v1410_v40  ;;  %v1338_v49 = vld [vmem:[%s2495_s1 + $0xb0] sm:$0xf]  ;;  %v1559_v51 = vld [vmem:[%s2495_s1 + $0xb4] sm:$0xf0]  ;;  %v1275_v56 = vor.u32 %v1543_v48, %v1274_v47 }
   0xd   :  { %647 = vmatpush.bf16.msra.mxu1 %v1355_v33  ;;  %v1475_v50 = vor.u32 %v1593_v43, %v1474_v42  ;;  %v1402_v52 = vld [vmem:[%s2495_s1 + $0x130] sm:$0xf]  ;;  %v1575_v53 = vld [vmem:[%s2495_s1 + $0x134] sm:$0xf0]  ;;  %v1339_v57 = vor.u32 %v1559_v51, %v1338_v49  ;;  %v1266_v59 = vld [vmem:[%s2495_s1 + $0x20] sm:$0xf] }
   0xe   :  { %696 = vmatpush.bf16.msra.mxu2 %v1419_v34  ;;  %v1466_v54 = vld [vmem:[%s2495_s1 + $0x1b0] sm:$0xf]  ;;  %v1591_v55 = vld [vmem:[%s2495_s1 + $0x1b4] sm:$0xf0]  ;;  %v1403_v58 = vor.u32 %v1575_v53, %v1402_v52  ;;  %v1541_v60 = vld [vmem:[%s2495_s1 + $0x24] sm:$0xf0] }
   0xf   :  { %745 = vmatpush.bf16.msra.mxu3 %v1483_v38  ;;  %v1330_v61 = vld [vmem:[%s2495_s1 + $0xa0] sm:$0xf]  ;;  %v1467_v62 = vor.u32 %v1591_v55, %v1466_v54  ;;  %v1557_v63 = vld [vmem:[%s2495_s1 + $0xa4] sm:$0xf0]  ;;  %v1267_v4 = vor.u32 %v1541_v60, %v1266_v59  ;;  %v1258_v7 = vld [vmem:[%s2495_s1 + $0x10] sm:$0xf] }
  0x10   :  { %599 = vmatpush.bf16.msra.mxu0 %v1283_v44  ;;  %v1394_v0 = vld [vmem:[%s2495_s1 + $0x120] sm:$0xf]  ;;  %v1573_v1 = vld [vmem:[%s2495_s1 + $0x124] sm:$0xf0]  ;;  %v1331_v5 = vor.u32 %v1557_v63, %v1330_v61  ;;  %v1539_v8 = vld [vmem:[%s2495_s1 + $0x14] sm:$0xf0] }
  0x11   :  { %648 = vmatpush.bf16.msra.mxu1 %v1347_v45  ;;  %v1458_v2 = vld [vmem:[%s2495_s1 + $0x1a0] sm:$0xf]  ;;  %v1589_v3 = vld [vmem:[%s2495_s1 + $0x1a4] sm:$0xf0]  ;;  %v1395_v6 = vor.u32 %v1573_v1, %v1394_v0  ;;  %v1322_v9 = vld [vmem:[%s2495_s1 + $0x90] sm:$0xf]  ;;  %v1259_v17 = vor.u32 %v1539_v8, %v1258_v7 }
  0x12   :  { %697 = vmatpush.bf16.msra.mxu2 %v1411_v46  ;;  %v1459_v10 = vor.u32 %v1589_v3, %v1458_v2  ;;  %v1555_v11 = vld [vmem:[%s2495_s1 + $0x94] sm:$0xf0]  ;;  %v1386_v12 = vld [vmem:[%s2495_s1 + $0x110] sm:$0xf]  ;;  %v1250_v16 = vld [vmem:[%s2495_s1] sm:$0xf] }
  0x13   :  { %746 = vmatpush.bf16.msra.mxu3 %v1475_v50  ;;  %v1571_v13 = vld [vmem:[%s2495_s1 + $0x114] sm:$0xf0]  ;;  %v1450_v14 = vld [vmem:[%s2495_s1 + $0x190] sm:$0xf]  ;;  %v1537_v18 = vld [vmem:[%s2495_s1 + $0x4] sm:$0xf0]  ;;  %v1323_v21 = vor.u32 %v1555_v11, %v1322_v9 }
  0x14   :  { %600 = vmatpush.bf16.msra.mxu0 %v1275_v56  ;;  %v1587_v15 = vld [vmem:[%s2495_s1 + $0x194] sm:$0xf0]  ;;  %v1314_v19 = vld [vmem:[%s2495_s1 + $0x80] sm:$0xf]  ;;  %v1553_v20 = vld [vmem:[%s2495_s1 + $0x84] sm:$0xf0]  ;;  %v1387_v22 = vor.u32 %v1571_v13, %v1386_v12  ;;  %v1251_v34 = vor.u32 %v1537_v18, %v1250_v16 }
  0x15   :  { %649 = vmatpush.bf16.msra.mxu1 %v1339_v57  ;;  %v1378_v23 = vld [vmem:[%s2495_s1 + $0x100] sm:$0xf]  ;;  %v1569_v24 = vld [vmem:[%s2495_s1 + $0x104] sm:$0xf0]  ;;  %v1451_v26 = vor.u32 %v1587_v15, %v1450_v14  ;;  %v1506_v29 = vld [vmem:[%s2496_s0 + $0xc] sm:$0xf0]  ;;  %v1315_v38 = vor.u32 %v1553_v20, %v1314_v19 }
  0x16   :  { %698 = vmatpush.bf16.msra.mxu2 %v1403_v58  ;;  %v1442_v25 = vld [vmem:[%s2495_s1 + $0x180] sm:$0xf]  ;;  %v1585_v27 = vld [vmem:[%s2495_s1 + $0x184] sm:$0xf0]  ;;  %v1504_v30 = vld [vmem:[%s2496_s0 + $0x4] sm:$0xf]  ;;  %v1379_v39 = vor.u32 %v1569_v24, %v1378_v23 }
  0x17   :  { %747 = vmatpush.bf16.msra.mxu3 %v1467_v62  ;;  %v1122_v28 = vld [vmem:[%s2496_s0] sm:$0xf]  ;;  %v1124_v31 = vld [vmem:[%s2496_s0 + $0x10] sm:$0xf0]  ;;  %v1436_v33 = vld [vmem:[%s2495_s1 + $0x178] sm:$0xf0]  ;;  %v1443_v43 = vor.u32 %v1585_v27, %v1442_v25 }
  0x18   :  { %601 = vmatpush.bf16.msra.mxu0 %v1267_v4  ;;  %v1582_v32 = vld [vmem:[%s2495_s1 + $0x174] sm:$0xf]  ;;  %v1130_v35 = vld [vmem:[%s2496_s0 + $0x8] sm:$0xf]  ;;  %v1500_v37 = vld [vmem:[%s2495_s1 + $0x1f8] sm:$0xf0]  ;;  %v1857_v48 = vor.u32 %v1506_v29, %v1122_v28  ;;  %v1868_v53 = vor.u32 %v1504_v30, %v1124_v31 }
  0x19   :  { %650 = vmatpush.bf16.msra.mxu1 %v1331_v5  ;;  %v1598_v36 = vld [vmem:[%s2495_s1 + $0x1f4] sm:$0xf]  ;;  %v1507_v40 = vld [vmem:[%s2496_s0 + $0x14] sm:$0xf0]  ;;  %v1505_v41 = vld [vmem:[%s2496_s0 + $0xc] sm:$0xf]  ;;  %v1439_v44 = vor.u32 %v1582_v32, %v1436_v33 }
  0x1a   :  { %699 = vmatpush.bf16.msra.mxu2 %v1395_v6  ;;  %v1132_v42 = vld [vmem:[%s2496_s0 + $0x18] sm:$0xf0]  ;;  %v1550_v45 = vld [vmem:[%s2495_s1 + $0x74] sm:$0xf]  ;;  %v1503_v49 = vor.u32 %v1598_v36, %v1500_v37  ;;  %v1580_v51 = vld [vmem:[%s2495_s1 + $0x164] sm:$0xf]  ;;  %v1870_v54 = vor.u32 %v1507_v40, %v1130_v35 }
  0x1b   :  { %748 = vmatpush.bf16.msra.mxu3 %v1459_v10  ;;  %v1308_v46 = vld [vmem:[%s2495_s1 + $0x78] sm:$0xf0]  ;;  %v1566_v47 = vld [vmem:[%s2495_s1 + $0xf4] sm:$0xf]  ;;  %v1428_v52 = vld [vmem:[%s2495_s1 + $0x168] sm:$0xf0]  ;;  %v1878_v57 = vor.u32 %v1505_v41, %v1132_v42 }
  0x1c   :  { %602 = vmatpush.bf16.msra.mxu0 %v1259_v17  ;;  %v1372_v50 = vld [vmem:[%s2495_s1 + $0xf8] sm:$0xf0]  ;;  %v1596_v55 = vld [vmem:[%s2495_s1 + $0x1e4] sm:$0xf]  ;;  %v1492_v56 = vld [vmem:[%s2495_s1 + $0x1e8] sm:$0xf0]  ;;  %v1311_v58 = vor.u32 %v1550_v45, %v1308_v46  ;;  %v1431_v60 = vor.u32 %v1580_v51, %v1428_v52 }
  0x1d   :  { %651 = vmatpush.bf16.msra.mxu1 %v1323_v21  ;;  %v1375_v59 = vor.u32 %v1566_v47, %v1372_v50  ;;  %v1548_v61 = vld [vmem:[%s2495_s1 + $0x64] sm:$0xf]  ;;  %v1300_v62 = vld [vmem:[%s2495_s1 + $0x68] sm:$0xf0]  ;;  %v1495_v63 = vor.u32 %v1596_v55, %v1492_v56  ;;  %v1578_v3 = vld [vmem:[%s2495_s1 + $0x154] sm:$0xf] }
  0x1e   :  { %700 = vmatpush.bf16.msra.mxu2 %v1387_v22  ;;  %v1564_v0 = vld [vmem:[%s2495_s1 + $0xe4] sm:$0xf]  ;;  %v1364_v1 = vld [vmem:[%s2495_s1 + $0xe8] sm:$0xf0]  ;;  %v1303_v2 = vor.u32 %v1548_v61, %v1300_v62  ;;  %v1420_v4 = vld [vmem:[%s2495_s1 + $0x158] sm:$0xf0] }
  0x1f   :  { %749 = vmatpush.bf16.msra.mxu3 %v1451_v26  ;;  %v1546_v5 = vld [vmem:[%s2495_s1 + $0x54] sm:$0xf]  ;;  %v1367_v6 = vor.u32 %v1564_v0, %v1364_v1  ;;  %v1423_v7 = vor.u32 %v1578_v3, %v1420_v4  ;;  %v1292_v8 = vld [vmem:[%s2495_s1 + $0x58] sm:$0xf0]  ;;  %v1138_v16 = vld [vmem:[%s2496_s0 + $0x20] sm:$0xf] }
  0x20   :  { %603 = vmatpush.bf16.msra.mxu0 %v1251_v34  ;;  %v1594_v9 = vld [vmem:[%s2495_s1 + $0x1d4] sm:$0xf]  ;;  %v1484_v10 = vld [vmem:[%s2495_s1 + $0x1d8] sm:$0xf0]  ;;  %v1295_v14 = vor.u32 %v1546_v5, %v1292_v8  ;;  %v1510_v17 = vld [vmem:[%s2496_s0 + $0x2c] sm:$0xf0] }
  0x21   :  { %652 = vmatpush.bf16.msra.mxu1 %v1315_v38  ;;  %v1487_v11 = vor.u32 %v1594_v9, %v1484_v10  ;;  %v1562_v12 = vld [vmem:[%s2495_s1 + $0xd4] sm:$0xf]  ;;  %v1356_v13 = vld [vmem:[%s2495_s1 + $0xd8] sm:$0xf0]  ;;  %v1508_v18 = vld [vmem:[%s2496_s0 + $0x24] sm:$0xf]  ;;  %v1944_v24 = vor.u32 %v1510_v17, %v1138_v16 }
  0x22   :  { %701 = vmatpush.bf16.msra.mxu2 %v1379_v39  ;;  %v1359_v15 = vor.u32 %v1562_v12, %v1356_v13  ;;  %v1140_v19 = vld [vmem:[%s2496_s0 + $0x30] sm:$0xf0]  ;;  %v1146_v20 = vld [vmem:[%s2496_s0 + $0x28] sm:$0xf]  ;;  %v1511_v21 = vld [vmem:[%s2496_s0 + $0x34] sm:$0xf0] }
  0x23   :  { %750 = vmatpush.bf16.msra.mxu3 %v1443_v43  ;;  %604 = vmatmul.bf16.vlgmr.msra.gmra.mxu0 %v1857_v48  ;;  %v1509_v22 = vld [vmem:[%s2496_s0 + $0x2c] sm:$0xf]  ;;  %v1148_v23 = vld [vmem:[%s2496_s0 + $0x38] sm:$0xf0]  ;;  %v1946_v25 = vor.u32 %v1508_v18, %v1140_v19  ;;  %v1948_v26 = vor.u32 %v1511_v21, %v1146_v20  ;;  %v1576_v28 = vld [vmem:[%s2495_s1 + $0x144] sm:$0xf] }
  0x24   :  { %653 = vmatmul.bf16.vlgmr.msra.gmra.mxu1 %v1868_v53  ;;  %792 = vmatpush.bf16.msrb.mxu0 %v1311_v58  ;;  %v1950_v27 = vor.u32 %v1509_v22, %v1148_v23  ;;  %v1412_v29 = vld [vmem:[%s2495_s1 + $0x148] sm:$0xf0]  ;;  %v1544_v30 = vld [vmem:[%s2495_s1 + $0x44] sm:$0xf]  ;;  %v1154_v40 = vld [vmem:[%s2496_s0 + $0x40] sm:$0xf] }
  0x25   :  { %702 = vmatmul.bf16.vlgmr.msra.gmra.mxu2 %v1870_v54  ;;  %841 = vmatpush.bf16.msrb.mxu1 %v1375_v59  ;;  %v1415_v31 = vor.u32 %v1576_v28, %v1412_v29  ;;  %v1284_v32 = vld [vmem:[%s2495_s1 + $0x48] sm:$0xf0]  ;;  %v1592_v33 = vld [vmem:[%s2495_s1 + $0x1c4] sm:$0xf]  ;;  %v1514_v41 = vld [vmem:[%s2496_s0 + $0x4c] sm:$0xf0] }
  0x26   :  { %890 = vmatpush.bf16.msrb.mxu2 %v1439_v44  ;;  %751 = vmatmul.bf16.vlgmr.msra.gmra.mxu3 %v1878_v57  ;;  %v1476_v34 = vld [vmem:[%s2495_s1 + $0x1c8] sm:$0xf0]  ;;  %v1287_v35 = vor.u32 %v1544_v30, %v1284_v32  ;;  %v1560_v37 = vld [vmem:[%s2495_s1 + $0xc4] sm:$0xf]  ;;  %v1156_v43 = vld [vmem:[%s2496_s0 + $0x50] sm:$0xf0] }
  0x27   :  { %939 = vmatpush.bf16.msrb.mxu3 %v1503_v49  ;;  %v1479_v36 = vor.u32 %v1592_v33, %v1476_v34  ;;  %v1348_v38 = vld [vmem:[%s2495_s1 + $0xc8] sm:$0xf0]  ;;  %v1512_v42 = vld [vmem:[%s2496_s0 + $0x44] sm:$0xf]  ;;  %v1162_v44 = vld [vmem:[%s2496_s0 + $0x48] sm:$0xf]  ;;  %v2004_v49 = vor.u32 %v1514_v41, %v1154_v40 }
  0x28   :  { %793 = vmatpush.bf16.msrb.mxu0 %v1303_v2  ;;  %v1351_v39 = vor.u32 %v1560_v37, %v1348_v38  ;;  %v1515_v45 = vld [vmem:[%s2496_s0 + $0x54] sm:$0xf0]  ;;  %v1513_v46 = vld [vmem:[%s2496_s0 + $0x4c] sm:$0xf]  ;;  %v1164_v47 = vld [vmem:[%s2496_s0 + $0x58] sm:$0xf0]  ;;  %v2006_v50 = vor.u32 %v1512_v42, %v1156_v43 }
  0x29   :  { %842 = vmatpush.bf16.msrb.mxu1 %v1367_v6  ;;  %v2008_v51 = vor.u32 %v1515_v45, %v1162_v44  ;;  %v2010_v52 = vor.u32 %v1513_v46, %v1164_v47  ;;  %v1574_v55 = vld [vmem:[%s2495_s1 + $0x134] sm:$0xf]  ;;  %v1404_v56 = vld [vmem:[%s2495_s1 + $0x138] sm:$0xf0]  ;;  %v1170_v4 = vld [vmem:[%s2496_s0 + $0x60] sm:$0xf] }
  0x2a   :  { %891 = vmatpush.bf16.msrb.mxu2 %v1431_v60  ;;  %v1542_v58 = vld [vmem:[%s2495_s1 + $0x34] sm:$0xf]  ;;  %v1407_v59 = vor.u32 %v1574_v55, %v1404_v56  ;;  %v1276_v60 = vld [vmem:[%s2495_s1 + $0x38] sm:$0xf0]  ;;  %v1518_v5 = vld [vmem:[%s2496_s0 + $0x6c] sm:$0xf0] }
  0x2b   :  { %940 = vmatpush.bf16.msrb.mxu3 %v1495_v63  ;;  %v1590_v61 = vld [vmem:[%s2495_s1 + $0x1b4] sm:$0xf]  ;;  %v1468_v62 = vld [vmem:[%s2495_s1 + $0x1b8] sm:$0xf0]  ;;  %v1279_v63 = vor.u32 %v1542_v58, %v1276_v60  ;;  %v1516_v6 = vld [vmem:[%s2496_s0 + $0x64] sm:$0xf]  ;;  %v2064_v12 = vor.u32 %v1518_v5, %v1170_v4 }
  0x2c   :  { %794 = vmatpush.bf16.msrb.mxu0 %v1295_v14  ;;  %v1471_v0 = vor.u32 %v1590_v61, %v1468_v62  ;;  %v1558_v1 = vld [vmem:[%s2495_s1 + $0xb4] sm:$0xf]  ;;  %v1340_v2 = vld [vmem:[%s2495_s1 + $0xb8] sm:$0xf0]  ;;  %v1178_v8 = vld [vmem:[%s2496_s0 + $0x68] sm:$0xf] }
  0x2d   :  { %843 = vmatpush.bf16.msrb.mxu1 %v1359_v15  ;;  %v1343_v3 = vor.u32 %v1558_v1, %v1340_v2  ;;  %v1519_v9 = vld [vmem:[%s2496_s0 + $0x74] sm:$0xf0]  ;;  %v1517_v10 = vld [vmem:[%s2496_s0 + $0x6c] sm:$0xf]  ;;  %v1572_v16 = vld [vmem:[%s2495_s1 + $0x124] sm:$0xf] }
  0x2e   :  { %892 = vmatpush.bf16.msrb.mxu2 %v1423_v7  ;;  %v1172_v7 = vld [vmem:[%s2496_s0 + $0x70] sm:$0xf0]  ;;  %v2068_v14 = vor.u32 %v1519_v9, %v1178_v8  ;;  %v1396_v17 = vld [vmem:[%s2495_s1 + $0x128] sm:$0xf0]  ;;  %v1540_v18 = vld [vmem:[%s2495_s1 + $0x24] sm:$0xf] }
  0x2f   :  { %941 = vmatpush.bf16.msrb.mxu3 %v1487_v11  ;;  %v1180_v11 = vld [vmem:[%s2496_s0 + $0x78] sm:$0xf0]  ;;  %v2066_v13 = vor.u32 %v1516_v6, %v1172_v7  ;;  %v1399_v19 = vor.u32 %v1572_v16, %v1396_v17  ;;  %v1268_v20 = vld [vmem:[%s2495_s1 + $0x28] sm:$0xf0]  ;;  %v1588_v21 = vld [vmem:[%s2495_s1 + $0x1a4] sm:$0xf] }
  0x30   :  { %795 = vmatpush.bf16.msrb.mxu0 %v1287_v35  ;;  %v2070_v15 = vor.u32 %v1517_v10, %v1180_v11  ;;  %v1460_v22 = vld [vmem:[%s2495_s1 + $0x1a8] sm:$0xf0]  ;;  %v1271_v23 = vor.u32 %v1540_v18, %v1268_v20  ;;  %v1556_v29 = vld [vmem:[%s2495_s1 + $0xa4] sm:$0xf]  ;;  %v1186_v32 = vld [vmem:[%s2496_s0 + $0x80] sm:$0xf] }
  0x31   :  { %844 = vmatpush.bf16.msrb.mxu1 %v1351_v39  ;;  %v1463_v28 = vor.u32 %v1588_v21, %v1460_v22  ;;  %v1332_v30 = vld [vmem:[%s2495_s1 + $0xa8] sm:$0xf0]  ;;  %v1522_v33 = vld [vmem:[%s2496_s0 + $0x8c] sm:$0xf0]  ;;  %v1520_v34 = vld [vmem:[%s2496_s0 + $0x84] sm:$0xf] }
  0x32   :  { %893 = vmatpush.bf16.msrb.mxu2 %v1415_v31  ;;  %v1335_v31 = vor.u32 %v1556_v29, %v1332_v30  ;;  %v1188_v35 = vld [vmem:[%s2496_s0 + $0x90] sm:$0xf0]  ;;  %v1523_v37 = vld [vmem:[%s2496_s0 + $0x94] sm:$0xf0]  ;;  %v1521_v38 = vld [vmem:[%s2496_s0 + $0x8c] sm:$0xf]  ;;  %v2124_v40 = vor.u32 %v1522_v33, %v1186_v32 }
  0x33   :  { %609 = vmatmul.bf16.gmra.mxu0 %v1944_v24  ;;  %942 = vmatpush.bf16.msrb.mxu3 %v1479_v36  ;;  %v1194_v36 = vld [vmem:[%s2496_s0 + $0x88] sm:$0xf]  ;;  %v1196_v39 = vld [vmem:[%s2496_s0 + $0x98] sm:$0xf0]  ;;  %v2126_v41 = vor.u32 %v1520_v34, %v1188_v35  ;;  %v1570_v44 = vld [vmem:[%s2495_s1 + $0x114] sm:$0xf] }
  0x34   :  { %658 = vmatmul.bf16.gmra.mxu1 %v1946_v25  ;;  %796 = vmatpush.bf16.msrb.mxu0 %v1279_v63  ;;  %v2128_v42 = vor.u32 %v1523_v37, %v1194_v36  ;;  %v2130_v43 = vor.u32 %v1521_v38, %v1196_v39  ;;  %v1388_v45 = vld [vmem:[%s2495_s1 + $0x118] sm:$0xf0]  ;;  %v1538_v46 = vld [vmem:[%s2495_s1 + $0x14] sm:$0xf]  ;;  %v1526_v1 = vld [vmem:[%s2496_s0 + $0xac] sm:$0xf0] }
  0x35   :  { %707 = vmatmul.bf16.gmra.mxu2 %v1948_v26  ;;  %845 = vmatpush.bf16.msrb.mxu1 %v1343_v3  ;;  %v1391_v47 = vor.u32 %v1570_v44, %v1388_v45  ;;  %v1260_v55 = vld [vmem:[%s2495_s1 + $0x18] sm:$0xf0]  ;;  %v1586_v56 = vld [vmem:[%s2495_s1 + $0x194] sm:$0xf]  ;;  %v1524_v2 = vld [vmem:[%s2496_s0 + $0xa4] sm:$0xf] }
  0x36   :  { %756 = vmatmul.bf16.gmra.mxu3 %v1950_v27  ;;  %894 = vmatpush.bf16.msrb.mxu2 %v1407_v59  ;;  %v1452_v58 = vld [vmem:[%s2495_s1 + $0x198] sm:$0xf0]  ;;  %v1263_v59 = vor.u32 %v1538_v46, %v1260_v55  ;;  %v1554_v61 = vld [vmem:[%s2495_s1 + $0x94] sm:$0xf]  ;;  %v1210_v4 = vld [vmem:[%s2496_s0 + $0xa8] sm:$0xf] }
  0x37   :  { %943 = vmatpush.bf16.msrb.mxu3 %v1471_v0  ;;  %v1455_v60 = vor.u32 %v1586_v56, %v1452_v58  ;;  %v1324_v62 = vld [vmem:[%s2495_s1 + $0x98] sm:$0xf0]  ;;  %v1202_v0 = vld [vmem:[%s2496_s0 + $0xa0] sm:$0xf]  ;;  %v1204_v3 = vld [vmem:[%s2496_s0 + $0xb0] sm:$0xf0] }
  0x38   :  { %797 = vmatpush.bf16.msrb.mxu0 %v1271_v23  ;;  %v1327_v63 = vor.u32 %v1554_v61, %v1324_v62  ;;  %v1527_v5 = vld [vmem:[%s2496_s0 + $0xb4] sm:$0xf0]  ;;  %v1525_v6 = vld [vmem:[%s2496_s0 + $0xac] sm:$0xf]  ;;  %v1212_v7 = vld [vmem:[%s2496_s0 + $0xb8] sm:$0xf0]  ;;  %v2184_v8 = vor.u32 %v1526_v1, %v1202_v0  ;;  %v2186_v9 = vor.u32 %v1524_v2, %v1204_v3 }
  0x39   :  { %846 = vmatpush.bf16.msrb.mxu1 %v1335_v31  ;;  %v2188_v10 = vor.u32 %v1527_v5, %v1210_v4  ;;  %v2190_v11 = vor.u32 %v1525_v6, %v1212_v7  ;;  %v1568_v16 = vld [vmem:[%s2495_s1 + $0x104] sm:$0xf]  ;;  %v1380_v17 = vld [vmem:[%s2495_s1 + $0x108] sm:$0xf0]  ;;  %v1218_v32 = vld [vmem:[%s2496_s0 + $0xc0] sm:$0xf] }
  0x3a   :  { %895 = vmatpush.bf16.msrb.mxu2 %v1399_v19  ;;  %v1536_v18 = vld [vmem:[%s2495_s1 + $0x4] sm:$0xf]  ;;  %v1383_v19 = vor.u32 %v1568_v16, %v1380_v17  ;;  %v1252_v20 = vld [vmem:[%s2495_s1 + $0x8] sm:$0xf0]  ;;  %v1530_v33 = vld [vmem:[%s2496_s0 + $0xcc] sm:$0xf0] }
  0x3b   :  { %944 = vmatpush.bf16.msrb.mxu3 %v1463_v28  ;;  %v1584_v21 = vld [vmem:[%s2495_s1 + $0x184] sm:$0xf]  ;;  %v1444_v22 = vld [vmem:[%s2495_s1 + $0x188] sm:$0xf0]  ;;  %v1255_v23 = vor.u32 %v1536_v18, %v1252_v20  ;;  %v1220_v35 = vld [vmem:[%s2496_s0 + $0xd0] sm:$0xf0]  ;;  %v2244_v44 = vor.u32 %v1530_v33, %v1218_v32 }
  0x3c   :  { %798 = vmatpush.bf16.msrb.mxu0 %v1263_v59  ;;  %v1447_v28 = vor.u32 %v1584_v21, %v1444_v22  ;;  %v1552_v29 = vld [vmem:[%s2495_s1 + $0x84] sm:$0xf]  ;;  %v1316_v30 = vld [vmem:[%s2495_s1 + $0x88] sm:$0xf0]  ;;  %v1226_v36 = vld [vmem:[%s2496_s0 + $0xc8] sm:$0xf] }
  0x3d   :  { %847 = vmatpush.bf16.msrb.mxu1 %v1327_v63  ;;  %v1319_v31 = vor.u32 %v1552_v29, %v1316_v30  ;;  %v1528_v34 = vld [vmem:[%s2496_s0 + $0xc4] sm:$0xf]  ;;  %v1531_v37 = vld [vmem:[%s2496_s0 + $0xd4] sm:$0xf0]  ;;  %v1529_v38 = vld [vmem:[%s2496_s0 + $0xcc] sm:$0xf] }
  0x3e   :  { %896 = vmatpush.bf16.msrb.mxu2 %v1391_v47  ;;  %v1228_v39 = vld [vmem:[%s2496_s0 + $0xd8] sm:$0xf0]  ;;  %v2246_v45 = vor.u32 %v1528_v34, %v1220_v35  ;;  %v2248_v46 = vor.u32 %v1531_v37, %v1226_v36  ;;  %v1234_v55 = vld [vmem:[%s2496_s0 + $0xe0] sm:$0xf]  ;;  %v1534_v56 = vld [vmem:[%s2496_s0 + $0xec] sm:$0xf0] }
  0x3f   :  { %945 = vmatpush.bf16.msrb.mxu3 %v1455_v60  ;;  %v2250_v47 = vor.u32 %v1529_v38, %v1228_v39  ;;  %v1532_v58 = vld [vmem:[%s2496_s0 + $0xe4] sm:$0xf]  ;;  %v1236_v59 = vld [vmem:[%s2496_s0 + $0xf0] sm:$0xf0]  ;;  %v1242_v60 = vld [vmem:[%s2496_s0 + $0xe8] sm:$0xf]  ;;  %v2280_v0 = vor.u32 %v1534_v56, %v1234_v55 }
  0x40   :  { %799 = vmatpush.bf16.msrb.mxu0 %v1255_v23  ;;  %v1535_v61 = vld [vmem:[%s2496_s0 + $0xf4] sm:$0xf0]  ;;  %v1533_v62 = vld [vmem:[%s2496_s0 + $0xec] sm:$0xf]  ;;  %v1244_v63 = vld [vmem:[%s2496_s0 + $0xf8] sm:$0xf0]  ;;  %v2282_v1 = vor.u32 %v1532_v58, %v1236_v59 }
  0x41   :  { %848 = vmatpush.bf16.msrb.mxu1 %v1319_v31  ;;  %v2284_v2 = vor.u32 %v1535_v61, %v1242_v60  ;;  %v2286_v3 = vor.u32 %v1533_v62, %v1244_v63  ;;  %v2295_v4 = vld [vmem:[%s2497_s2] sm:$0x3] }
  0x42   :  { %897 = vmatpush.bf16.msrb.mxu2 %v1383_v19  ;;  %v2298_v5 = vperm.slane %v2295_v4, 0 }
  0x43   :  { %614 = vmatmul.bf16.gmra.mxu0 %v2004_v49  ;;  %946 = vmatpush.bf16.msrb.mxu3 %v1447_v28 }
  0x44   :  { %663 = vmatmul.bf16.gmra.mxu1 %v2006_v50 }
  0x45   :  { %712 = vmatmul.bf16.gmra.mxu2 %v2008_v51 }
  0x46   :  { %761 = vmatmul.bf16.gmra.mxu3 %v2010_v52 }
  0x53   :  { %619 = vmatmul.bf16.gmra.mxu0 %v2064_v12 }
  0x54   :  { %668 = vmatmul.bf16.gmra.mxu1 %v2066_v13 }
  0x55   :  { %717 = vmatmul.bf16.gmra.mxu2 %v2068_v14 }
  0x56   :  { %766 = vmatmul.bf16.gmra.mxu3 %v2070_v15 }
  0x63   :  { %624 = vmatmul.bf16.gmra.mxu0 %v2124_v40 }
  0x64   :  { %673 = vmatmul.bf16.gmra.mxu1 %v2126_v41 }
  0x65   :  { %722 = vmatmul.bf16.gmra.mxu2 %v2128_v42 }
  0x66   :  { %771 = vmatmul.bf16.gmra.mxu3 %v2130_v43 }
  0x73   :  { %629 = vmatmul.bf16.gmra.mxu0 %v2184_v8 }
  0x74   :  { %678 = vmatmul.bf16.gmra.mxu1 %v2186_v9 }
  0x75   :  { %727 = vmatmul.bf16.gmra.mxu2 %v2188_v10 }
  0x76   :  { %776 = vmatmul.bf16.gmra.mxu3 %v2190_v11 }
  0x83   :  { %634 = vmatmul.bf16.gmra.mxu0 %v2244_v44 }
  0x84   :  { %683 = vmatmul.bf16.gmra.mxu1 %v2246_v45 }
  0x85   :  { %732 = vmatmul.bf16.gmra.mxu2 %v2248_v46 }
  0x86   :  { %781 = vmatmul.bf16.gmra.mxu3 %v2250_v47 }
  0x93   :  { %639 = vmatmul.bf16.gmra.mxu0 %v2280_v0 }
  0x94   :  { %688 = vmatmul.bf16.gmra.mxu1 %v2282_v1 }
  0x95   :  { %737 = vmatmul.bf16.gmra.mxu2 %v2284_v2 }
  0x96   :  { %786 = vmatmul.bf16.gmra.mxu3 %v2286_v3 }
  0xa0   :  { %v605_v6 = vpop.f32.mrf.mxu0 }
  0xa1   :  { %v606_v7 = vadd.f32 %v605_v6, %v2298_v5  ;;  %v654_v16 = vpop.f32.mrf.mxu1 }
  0xa3   :  { %v655_v17 = vadd.f32 %v654_v16, %v606_v7  ;;  %800 = vmatmul.bf16.vlgmr.msrb.gmra.mxu0 %v1857_v48 }
  0xa4   :  { %849 = vmatmul.bf16.vlgmr.msrb.gmra.mxu1 %v1868_v53 }
  0xa5   :  { %898 = vmatmul.bf16.vlgmr.msrb.gmra.mxu2 %v1870_v54 }
  0xa6   :  { %947 = vmatmul.bf16.vlgmr.msrb.gmra.mxu3 %v1878_v57 }
  0xa8   :  { %v703_v18 = vpop.f32.mrf.mxu2  ;;  %v607_v21 = vpop.f32.mrf.mxu0 }
  0xa9   :  { %v704_v19 = vadd.f32 %v703_v18, %v655_v17  ;;  %v752_v20 = vpop.f32.mrf.mxu3  ;;  %v608_v22 = vadd.f32 %v607_v21, %v2298_v5  ;;  %v656_v23 = vpop.f32.mrf.mxu1 }
  0xab   :  { %v2306_v28 = vadd.f32 %v752_v20, %v704_v19  ;;  %v657_v29 = vadd.f32 %v656_v23, %v608_v22 }
  0xad   :  { %vm988_vm0 = vcmp.gt.f32.partialorder %v2306_v28, 0.0 }
  0xb0   :  { %v705_v30 = vpop.f32.mrf.mxu2  ;;  %v610_v48 = vpop.f32.mrf.mxu0 }
  0xb1   :  { %v706_v31 = vadd.f32 %v705_v30, %v657_v29  ;;  %v754_v32 = vpop.f32.mrf.mxu3  ;;  %v611_v53 = vadd.f32 %v610_v48, %v2298_v5  ;;  %v659_v33 = vpop.f32.mrf.mxu1 }
  0xb3   :  { %v2309_v54 = vadd.f32 %v754_v32, %v706_v31  ;;  %v660_v57 = vadd.f32 %v659_v33, %v611_v53  ;;  %805 = vmatmul.bf16.gmra.mxu0 %v1944_v24 }
  0xb4   :  { %854 = vmatmul.bf16.gmra.mxu1 %v1946_v25 }
  0xb5   :  { %903 = vmatmul.bf16.gmra.mxu2 %v1948_v26  ;;  %vm990_vm2 = vcmp.gt.f32.partialorder %v2309_v54, 0.0 }
  0xb6   :  { %952 = vmatmul.bf16.gmra.mxu3 %v1950_v27 }
  0xb8   :  { %v708_v34 = vpop.f32.mrf.mxu2  ;;  %v612_v37 = vpop.f32.mrf.mxu0 }
  0xb9   :  { %v709_v35 = vadd.f32 %v708_v34, %v660_v57  ;;  %v757_v36 = vpop.f32.mrf.mxu3  ;;  %v613_v38 = vadd.f32 %v612_v37, %v2298_v5  ;;  %v661_v39 = vpop.f32.mrf.mxu1 }
  0xbb   :  { %v2316_v55 = vadd.f32 %v757_v36, %v709_v35  ;;  %v662_v56 = vadd.f32 %v661_v39, %v613_v38 }
  0xbd   :  { %vm992_vm4 = vcmp.gt.f32.partialorder %v2316_v55, 0.0 }
  0xc0   :  { %v710_v58 = vpop.f32.mrf.mxu2  ;;  %v615_v24 = vpop.f32.mrf.mxu0 }
  0xc1   :  { %v711_v59 = vadd.f32 %v710_v58, %v662_v56  ;;  %v759_v60 = vpop.f32.mrf.mxu3  ;;  %v616_v25 = vadd.f32 %v615_v24, %v2298_v5  ;;  %v664_v61 = vpop.f32.mrf.mxu1 }
  0xc3   :  { %v2319_v26 = vadd.f32 %v759_v60, %v711_v59  ;;  %v665_v27 = vadd.f32 %v664_v61, %v616_v25  ;;  %810 = vmatmul.bf16.gmra.mxu0 %v2004_v49 }
  0xc4   :  { %859 = vmatmul.bf16.gmra.mxu1 %v2006_v50 }
  0xc5   :  { %908 = vmatmul.bf16.gmra.mxu2 %v2008_v51  ;;  %vm994_vm6 = vcmp.gt.f32.partialorder %v2319_v26, 0.0 }
  0xc6   :  { %957 = vmatmul.bf16.gmra.mxu3 %v2010_v52 }
  0xc8   :  { %v713_v62 = vpop.f32.mrf.mxu2  ;;  %v617_v7 = vpop.f32.mrf.mxu0 }
  0xc9   :  { %v714_v63 = vadd.f32 %v713_v62, %v665_v27  ;;  %v762_v6 = vpop.f32.mrf.mxu3  ;;  %v618_v16 = vadd.f32 %v617_v7, %v2298_v5  ;;  %v666_v17 = vpop.f32.mrf.mxu1 }
  0xcb   :  { %v2326_v18 = vadd.f32 %v762_v6, %v714_v63  ;;  %v667_v19 = vadd.f32 %v666_v17, %v618_v16 }
  0xcd   :  { %vm996_vm8 = vcmp.gt.f32.partialorder %v2326_v18, 0.0 }
  0xd0   :  { %v715_v20 = vpop.f32.mrf.mxu2  ;;  %v620_v49 = vpop.f32.mrf.mxu0 }
  0xd1   :  { %v716_v21 = vadd.f32 %v715_v20, %v667_v19  ;;  %v764_v22 = vpop.f32.mrf.mxu3  ;;  %v621_v50 = vadd.f32 %v620_v49, %v2298_v5  ;;  %v669_v23 = vpop.f32.mrf.mxu1 }
  0xd3   :  { %v2329_v51 = vadd.f32 %v764_v22, %v716_v21  ;;  %v670_v52 = vadd.f32 %v669_v23, %v621_v50  ;;  %815 = vmatmul.bf16.gmra.mxu0 %v2064_v12 }
  0xd4   :  { %864 = vmatmul.bf16.gmra.mxu1 %v2066_v13 }
  0xd5   :  { %913 = vmatmul.bf16.gmra.mxu2 %v2068_v14  ;;  %vm998_vm10 = vcmp.gt.f32.partialorder %v2329_v51, 0.0 }
  0xd6   :  { %962 = vmatmul.bf16.gmra.mxu3 %v2070_v15 }
  0xd8   :  { %v718_v29 = vpop.f32.mrf.mxu2  ;;  %v622_v32 = vpop.f32.mrf.mxu0 }
  0xd9   :  { %v719_v30 = vadd.f32 %v718_v29, %v670_v52  ;;  %v767_v31 = vpop.f32.mrf.mxu3  ;;  %v623_v48 = vadd.f32 %v622_v32, %v2298_v5  ;;  %v671_v53 = vpop.f32.mrf.mxu1 }
  0xdb   :  { %v2336_v33 = vadd.f32 %v767_v31, %v719_v30  ;;  %v672_v57 = vadd.f32 %v671_v53, %v623_v48 }
  0xdd   :  { %vm1000_vm12 = vcmp.gt.f32.partialorder %v2336_v33, 0.0 }
  0xe0   :  { %v720_v34 = vpop.f32.mrf.mxu2  ;;  %v625_v12 = vpop.f32.mrf.mxu0 }
  0xe1   :  { %v721_v35 = vadd.f32 %v720_v34, %v672_v57  ;;  %v769_v36 = vpop.f32.mrf.mxu3  ;;  %v626_v13 = vadd.f32 %v625_v12, %v2298_v5  ;;  %v674_v37 = vpop.f32.mrf.mxu1 }
  0xe3   :  { %v2339_v14 = vadd.f32 %v769_v36, %v721_v35  ;;  %v675_v15 = vadd.f32 %v674_v37, %v626_v13  ;;  %820 = vmatmul.bf16.gmra.mxu0 %v2124_v40 }
  0xe4   :  { %869 = vmatmul.bf16.gmra.mxu1 %v2126_v41 }
  0xe5   :  { %918 = vmatmul.bf16.gmra.mxu2 %v2128_v42  ;;  %vm1002_vm14 = vcmp.gt.f32.partialorder %v2339_v14, 0.0 }
  0xe6   :  { %967 = vmatmul.bf16.gmra.mxu3 %v2130_v43 }
  0xe8   :  { %v723_v38 = vpop.f32.mrf.mxu2  ;;  %v627_v58 = vpop.f32.mrf.mxu0 }
  0xe9   :  { %v724_v39 = vadd.f32 %v723_v38, %v675_v15  ;;  %v772_v56 = vpop.f32.mrf.mxu3  ;;  %v628_v59 = vadd.f32 %v627_v58, %v2298_v5  ;;  %v676_v60 = vpop.f32.mrf.mxu1 }
  0xeb   :  { %v2346_v24 = vadd.f32 %v772_v56, %v724_v39  ;;  %v677_v25 = vadd.f32 %v676_v60, %v628_v59 }
  0xf0   :  { %v725_v61 = vpop.f32.mrf.mxu2  ;;  %v630_v40 = vpop.f32.mrf.mxu0 }
  0xf1   :  { %v726_v27 = vadd.f32 %v725_v61, %v677_v25  ;;  %v774_v62 = vpop.f32.mrf.mxu3  ;;  %v631_v41 = vadd.f32 %v630_v40, %v2298_v5  ;;  %v679_v63 = vpop.f32.mrf.mxu1  ;;  %v2379_v25 = vperm.slane %v2295_v4, 1 }
  0xf3   :  { %v2349_v42 = vadd.f32 %v774_v62, %v726_v27  ;;  %v680_v43 = vadd.f32 %v679_v63, %v631_v41  ;;  %825 = vmatmul.bf16.gmra.mxu0 %v2184_v8 }
  0xf4   :  { %874 = vmatmul.bf16.gmra.mxu1 %v2186_v9 }
  0xf5   :  { %923 = vmatmul.bf16.gmra.mxu2 %v2188_v10 }
  0xf6   :  { %972 = vmatmul.bf16.gmra.mxu3 %v2190_v11 }
  0xf8   :  { %v728_v6 = vpop.f32.mrf.mxu2  ;;  %v632_v17 = vpop.f32.mrf.mxu0 }
  0xf9   :  { %v729_v7 = vadd.f32 %v728_v6, %v680_v43  ;;  %v777_v16 = vpop.f32.mrf.mxu3  ;;  %v633_v19 = vadd.f32 %v632_v17, %v2298_v5  ;;  %v681_v20 = vpop.f32.mrf.mxu1 }
  0xfb   :  { %v2356_v21 = vadd.f32 %v777_v16, %v729_v7  ;;  %v682_v22 = vadd.f32 %v681_v20, %v633_v19  ;;  %v1020_v7 = vmul.f32 0.01, %v2306_v28 }
  0xfd   :  { %v1052_v19 = vsel %vm988_vm0, %v2306_v28, %v1020_v7  ;;  %vm1004_vm0 = vcmp.gt.f32.partialorder %v2346_v24, 0.0 }
 0x100   :  { %v730_v49 = vpop.f32.mrf.mxu2  ;;  %v635_v8 = vpop.f32.mrf.mxu0 }
 0x101   :  { %v731_v50 = vadd.f32 %v730_v49, %v682_v22  ;;  %v779_v23 = vpop.f32.mrf.mxu3  ;;  %v636_v9 = vadd.f32 %v635_v8, %v2298_v5  ;;  %v684_v52 = vpop.f32.mrf.mxu1 }
 0x103   :  { %v2359_v10 = vadd.f32 %v779_v23, %v731_v50  ;;  %v685_v11 = vadd.f32 %v684_v52, %v636_v9  ;;  %830 = vmatmul.bf16.gmra.mxu0 %v2244_v44 }
 0x104   :  { %879 = vmatmul.bf16.gmra.mxu1 %v2246_v45 }
 0x105   :  { %928 = vmatmul.bf16.gmra.mxu2 %v2248_v46 }
 0x106   :  { %977 = vmatmul.bf16.gmra.mxu3 %v2250_v47 }
 0x108   :  { %v733_v29 = vpop.f32.mrf.mxu2  ;;  %v637_v32 = vpop.f32.mrf.mxu0 }
 0x109   :  { %v734_v30 = vadd.f32 %v733_v29, %v685_v11  ;;  %v782_v31 = vpop.f32.mrf.mxu3  ;;  %v638_v48 = vadd.f32 %v637_v32, %v2298_v5  ;;  %v686_v53 = vpop.f32.mrf.mxu1  ;;  %v1022_v29 = vmul.f32 0.01, %v2309_v54 }
 0x10b   :  { %v2366_v57 = vadd.f32 %v782_v31, %v734_v30  ;;  %v687_v34 = vadd.f32 %v686_v53, %v638_v48  ;;  %v1054_v32 = vsel %vm990_vm2, %v2309_v54, %v1022_v29  ;;  %vm1006_vm2 = vcmp.gt.f32.partialorder %v2349_v42, 0.0 }
 0x110   :  { %v735_v35 = vpop.f32.mrf.mxu2  ;;  %v640_v44 = vpop.f32.mrf.mxu0 }
 0x111   :  { %v736_v36 = vadd.f32 %v735_v35, %v687_v34  ;;  %v784_v12 = vpop.f32.mrf.mxu3  ;;  %v641_v45 = vadd.f32 %v640_v44, %v2298_v5  ;;  %v689_v13 = vpop.f32.mrf.mxu1 }
 0x113   :  { %v2369_v46 = vadd.f32 %v784_v12, %v736_v36  ;;  %v690_v47 = vadd.f32 %v689_v13, %v641_v45  ;;  %835 = vmatmul.bf16.gmra.mxu0 %v2280_v0  ;;  %v1024_v45 = vmul.f32 0.01, %v2316_v55 }
 0x114   :  { %884 = vmatmul.bf16.gmra.mxu1 %v2282_v1 }
 0x115   :  { %933 = vmatmul.bf16.gmra.mxu2 %v2284_v2 }
 0x116   :  { %982 = vmatmul.bf16.gmra.mxu3 %v2286_v3 }
 0x118   :  { %v738_v37 = vpop.f32.mrf.mxu2  ;;  %v642_v39 = vpop.f32.mrf.mxu0 }
 0x119   :  { %v739_v15 = vadd.f32 %v738_v37, %v690_v47  ;;  %v787_v38 = vpop.f32.mrf.mxu3  ;;  %v643_v56 = vadd.f32 %v642_v39, %v2298_v5  ;;  %v691_v58 = vpop.f32.mrf.mxu1  ;;  %v1056_v37 = vsel %vm992_vm4, %v2316_v55, %v1024_v45  ;;  %v1032_v45 = vmul.f32 0.01, %v2336_v33 }
 0x11a   :  { %vm1008_vm4 = vcmp.gt.f32.partialorder %v2356_v21, 0.0 }
 0x11b   :  { %v2376_v59 = vadd.f32 %v787_v38, %v739_v15  ;;  %v692_v60 = vadd.f32 %v691_v58, %v643_v56 }
 0x120   :  { %v740_v0 = vpop.f32.mrf.mxu2  ;;  %v801_v27 = vpop.f32.mrf.mxu0 }
 0x121   :  { %v741_v61 = vadd.f32 %v740_v0, %v692_v60  ;;  %v789_v1 = vpop.f32.mrf.mxu3  ;;  %v802_v2 = vadd.f32 %v801_v27, %v2379_v25  ;;  %v850_v3 = vpop.f32.mrf.mxu1  ;;  %v1026_v27 = vmul.f32 0.01, %v2319_v26 }
 0x123   :  { %v2382_v62 = vadd.f32 %v789_v1, %v741_v61  ;;  %v851_v40 = vadd.f32 %v850_v3, %v802_v2 }
 0x128   :  { %v899_v41 = vpop.f32.mrf.mxu2  ;;  %v803_v43 = vpop.f32.mrf.mxu0 }
 0x129   :  { %v900_v63 = vadd.f32 %v899_v41, %v851_v40  ;;  %v948_v5 = vpop.f32.mrf.mxu3  ;;  %v852_v6 = vpop.f32.mrf.mxu1  ;;  %v804_v4 = vadd.f32 %v803_v43, %v2379_v25  ;;  %v1058_v40 = vsel %vm994_vm6, %v2319_v26, %v1026_v27  ;;  %vm1010_vm6 = vcmp.gt.f32.partialorder %v2359_v10, 0.0 }
 0x12b   :  { %v949_v16 = vadd.f32 %v948_v5, %v900_v63  ;;  %v853_v22 = vadd.f32 %v852_v6, %v804_v4  ;;  %v1028_v4 = vmul.f32 0.01, %v2326_v18 }
 0x12d   :  { %vm989_vm1 = vcmp.gt.f32.partialorder %v949_v16, 0.0  ;;  %v1021_v17 = vmul.f32 0.01, %v949_v16 }
 0x12f   :  { %v1053_v20 = vsel %vm989_vm1, %v949_v16, %v1021_v17 }
 0x130   :  { %v1084_v49 = vpack.c.bf16 %v1053_v20, %v1052_v19  ;;  %v901_v50 = vpop.f32.mrf.mxu2  ;;  %v806_v9 = vpop.f32.mrf.mxu0  ;;  %v1060_v20 = vsel %vm996_vm8, %v2326_v18, %v1028_v4  ;;  %vm1012_vm8 = vcmp.gt.f32.partialorder %v2366_v57, 0.0 }
 0x131   :  { %v902_v23 = vadd.f32 %v901_v50, %v853_v22  ;;  %v950_v8 = vpop.f32.mrf.mxu3  ;;  %v807_v52 = vadd.f32 %v806_v9, %v2379_v25  ;;  %v855_v11 = vpop.f32.mrf.mxu1 }
 0x132   :  { %1100 = vst [vmem:[%s2498_s3] sm:$0xff] %v1084_v49 }
 0x133   :  { %v951_v30 = vadd.f32 %v950_v8, %v902_v23  ;;  %v856_v31 = vadd.f32 %v855_v11, %v807_v52 }
 0x135   :  { %vm991_vm3 = vcmp.gt.f32.partialorder %v951_v30, 0.0  ;;  %v1023_v28 = vmul.f32 0.01, %v951_v30 }
 0x137   :  { %v1055_v48 = vsel %vm991_vm3, %v951_v30, %v1023_v28  ;;  %v1030_v30 = vmul.f32 0.01, %v2329_v51 }
 0x138   :  { %v1085_v53 = vpack.c.bf16 %v1055_v48, %v1054_v32  ;;  %v904_v34 = vpop.f32.mrf.mxu2  ;;  %v808_v12 = vpop.f32.mrf.mxu0 }
 0x139   :  { %v905_v35 = vadd.f32 %v904_v34, %v856_v31  ;;  %v953_v36 = vpop.f32.mrf.mxu3  ;;  %v857_v44 = vpop.f32.mrf.mxu1  ;;  %v809_v47 = vadd.f32 %v808_v12, %v2379_v25  ;;  %v1062_v32 = vsel %vm998_vm10, %v2329_v51, %v1030_v30  ;;  %vm1014_vm10 = vcmp.gt.f32.partialorder %v2369_v46, 0.0 }
 0x13a   :  { %1101 = vst [vmem:[%s2498_s3 + $0x8] sm:$0xff] %v1085_v53 }
 0x13b   :  { %v954_v13 = vadd.f32 %v953_v36, %v905_v35  ;;  %v858_v38 = vadd.f32 %v857_v44, %v809_v47 }
 0x13d   :  { %vm993_vm5 = vcmp.gt.f32.partialorder %v954_v13, 0.0  ;;  %v1025_v54 = vmul.f32 0.01, %v954_v13 }
 0x13f   :  { %v1057_v15 = vsel %vm993_vm5, %v954_v13, %v1025_v54  ;;  %v1064_v54 = vsel %vm1000_vm12, %v2336_v33, %v1032_v45  ;;  %vm1016_vm12 = vcmp.gt.f32.partialorder %v2376_v59, 0.0 }
 0x140   :  { %v1086_v39 = vpack.c.bf16 %v1057_v15, %v1056_v37  ;;  %v906_v56 = vpop.f32.mrf.mxu2  ;;  %v811_v0 = vpop.f32.mrf.mxu0 }
 0x141   :  { %v907_v58 = vadd.f32 %v906_v56, %v858_v38  ;;  %v955_v60 = vpop.f32.mrf.mxu3  ;;  %v812_v61 = vadd.f32 %v811_v0, %v2379_v25  ;;  %v860_v1 = vpop.f32.mrf.mxu1 }
 0x142   :  { %1102 = vst [vmem:[%s2498_s3 + $0x10] sm:$0xff] %v1086_v39 }
 0x143   :  { %v956_v2 = vadd.f32 %v955_v60, %v907_v58  ;;  %v861_v3 = vadd.f32 %v860_v1, %v812_v61  ;;  %v1034_v1 = vmul.f32 0.01, %v2339_v14 }
 0x145   :  { %vm995_vm7 = vcmp.gt.f32.partialorder %v956_v2, 0.0  ;;  %v1027_v55 = vmul.f32 0.01, %v956_v2 }
 0x147   :  { %v1059_v41 = vsel %vm995_vm7, %v956_v2, %v1027_v55  ;;  %v1066_v55 = vsel %vm1002_vm14, %v2339_v14, %v1034_v1  ;;  %vm1018_vm14 = vcmp.gt.f32.partialorder %v2382_v62, 0.0 }
 0x148   :  { %v1087_v63 = vpack.c.bf16 %v1059_v41, %v1058_v40  ;;  %v909_v5 = vpop.f32.mrf.mxu2  ;;  %v813_v7 = vpop.f32.mrf.mxu0 }
 0x149   :  { %v910_v43 = vadd.f32 %v909_v5, %v861_v3  ;;  %v958_v6 = vpop.f32.mrf.mxu3  ;;  %v862_v16 = vpop.f32.mrf.mxu1  ;;  %v814_v19 = vadd.f32 %v813_v7, %v2379_v25  ;;  %v1036_v7 = vmul.f32 0.01, %v2346_v24 }
 0x14a   :  { %1103 = vst [vmem:[%s2498_s3 + $0x18] sm:$0xff] %v1087_v63 }
 0x14b   :  { %v959_v17 = vadd.f32 %v958_v6, %v910_v43  ;;  %v863_v49 = vadd.f32 %v862_v16, %v814_v19 }
 0x14d   :  { %vm997_vm9 = vcmp.gt.f32.partialorder %v959_v17, 0.0  ;;  %v1029_v26 = vmul.f32 0.01, %v959_v17 }
 0x14f   :  { %v1061_v22 = vsel %vm997_vm9, %v959_v17, %v1029_v26  ;;  %v1068_v17 = vsel %vm1004_vm0, %v2346_v24, %v1036_v7 }
 0x150   :  { %v1088_v50 = vpack.c.bf16 %v1061_v22, %v1060_v20  ;;  %v911_v23 = vpop.f32.mrf.mxu2  ;;  %v816_v52 = vpop.f32.mrf.mxu0 }
 0x151   :  { %v912_v8 = vadd.f32 %v911_v23, %v863_v49  ;;  %v960_v9 = vpop.f32.mrf.mxu3  ;;  %v817_v11 = vadd.f32 %v816_v52, %v2379_v25  ;;  %v865_v29 = vpop.f32.mrf.mxu1  ;;  %v1038_v52 = vmul.f32 0.01, %v2349_v42 }
 0x152   :  { %1104 = vst [vmem:[%s2498_s3 + $0x20] sm:$0xff] %v1088_v50 }
 0x153   :  { %v961_v28 = vadd.f32 %v960_v9, %v912_v8  ;;  %v866_v31 = vadd.f32 %v865_v29, %v817_v11  ;;  %v1070_v30 = vsel %vm1006_vm2, %v2349_v42, %v1038_v52 }
 0x155   :  { %vm999_vm11 = vcmp.gt.f32.partialorder %v961_v28, 0.0  ;;  %v1031_v18 = vmul.f32 0.01, %v961_v28 }
 0x157   :  { %v1063_v48 = vsel %vm999_vm11, %v961_v28, %v1031_v18 }
 0x158   :  { %v1089_v53 = vpack.c.bf16 %v1063_v48, %v1062_v32  ;;  %v914_v34 = vpop.f32.mrf.mxu2  ;;  %v818_v12 = vpop.f32.mrf.mxu0 }
 0x159   :  { %v915_v35 = vadd.f32 %v914_v34, %v866_v31  ;;  %v963_v36 = vpop.f32.mrf.mxu3  ;;  %v867_v44 = vpop.f32.mrf.mxu1  ;;  %v819_v47 = vadd.f32 %v818_v12, %v2379_v25 }
 0x15a   :  { %1105 = vst [vmem:[%s2498_s3 + $0x28] sm:$0xff] %v1089_v53 }
 0x15b   :  { %v964_v13 = vadd.f32 %v963_v36, %v915_v35  ;;  %v868_v15 = vadd.f32 %v867_v44, %v819_v47  ;;  %v1040_v35 = vmul.f32 0.01, %v2356_v21 }
 0x15d   :  { %vm1001_vm13 = vcmp.gt.f32.partialorder %v964_v13, 0.0  ;;  %v1033_v51 = vmul.f32 0.01, %v964_v13  ;;  %v1072_v44 = vsel %vm1008_vm4, %v2356_v21, %v1040_v35 }
 0x15f   :  { %v1065_v37 = vsel %vm1001_vm13, %v964_v13, %v1033_v51 }
 0x160   :  { %v1090_v38 = vpack.c.bf16 %v1065_v37, %v1064_v54  ;;  %v916_v39 = vpop.f32.mrf.mxu2  ;;  %v821_v60 = vpop.f32.mrf.mxu0 }
 0x161   :  { %v917_v56 = vadd.f32 %v916_v39, %v868_v15  ;;  %v965_v58 = vpop.f32.mrf.mxu3  ;;  %v822_v0 = vadd.f32 %v821_v60, %v2379_v25  ;;  %v870_v61 = vpop.f32.mrf.mxu1 }
 0x162   :  { %1106 = vst [vmem:[%s2498_s3 + $0x30] sm:$0xff] %v1090_v38 }
 0x163   :  { %v966_v27 = vadd.f32 %v965_v58, %v917_v56  ;;  %v871_v2 = vadd.f32 %v870_v61, %v822_v0  ;;  %v1042_v56 = vmul.f32 0.01, %v2359_v10 }
 0x165   :  { %vm1003_vm15 = vcmp.gt.f32.partialorder %v966_v27, 0.0  ;;  %v1035_v33 = vmul.f32 0.01, %v966_v27  ;;  %v1074_v0 = vsel %vm1010_vm6, %v2359_v10, %v1042_v56 }
 0x167   :  { %v1067_v3 = vsel %vm1003_vm15, %v966_v27, %v1035_v33 }
 0x168   :  { %v1091_v40 = vpack.c.bf16 %v1067_v3, %v1066_v55  ;;  %v919_v41 = vpop.f32.mrf.mxu2  ;;  %v823_v43 = vpop.f32.mrf.mxu0 }
 0x169   :  { %v920_v63 = vadd.f32 %v919_v41, %v871_v2  ;;  %v968_v5 = vpop.f32.mrf.mxu3  ;;  %v872_v6 = vpop.f32.mrf.mxu1  ;;  %v824_v4 = vadd.f32 %v823_v43, %v2379_v25 }
 0x16a   :  { %1107 = vst [vmem:[%s2498_s3 + $0x38] sm:$0xff] %v1091_v40  ;;  %v1044_v40 = vmul.f32 0.01, %v2366_v57 }
 0x16b   :  { %v969_v16 = vadd.f32 %v968_v5, %v920_v63  ;;  %v873_v26 = vadd.f32 %v872_v6, %v824_v4 }
 0x16c   :  { %v1076_v5 = vsel %vm1012_vm8, %v2366_v57, %v1044_v40 }
 0x16d   :  { %vm1005_vm1 = vcmp.gt.f32.partialorder %v969_v16, 0.0  ;;  %v1037_v14 = vmul.f32 0.01, %v969_v16 }
 0x16f   :  { %v1069_v19 = vsel %vm1005_vm1, %v969_v16, %v1037_v14 }
 0x170   :  { %v1092_v20 = vpack.c.bf16 %v1069_v19, %v1068_v17  ;;  %v921_v22 = vpop.f32.mrf.mxu2  ;;  %v826_v23 = vpop.f32.mrf.mxu0 }
 0x171   :  { %v922_v49 = vadd.f32 %v921_v22, %v873_v26  ;;  %v970_v50 = vpop.f32.mrf.mxu3  ;;  %v827_v8 = vadd.f32 %v826_v23, %v2379_v25  ;;  %v875_v9 = vpop.f32.mrf.mxu1  ;;  %v1046_v26 = vmul.f32 0.01, %v2369_v46 }
 0x172   :  { %1108 = vst [vmem:[%s2498_s3 + $0x40] sm:$0xff] %v1092_v20 }
 0x173   :  { %v971_v11 = vadd.f32 %v970_v50, %v922_v49  ;;  %v876_v29 = vadd.f32 %v875_v9, %v827_v8  ;;  %v1078_v50 = vsel %vm1014_vm10, %v2369_v46, %v1046_v26 }
 0x175   :  { %vm1007_vm3 = vcmp.gt.f32.partialorder %v971_v11, 0.0  ;;  %v1039_v24 = vmul.f32 0.01, %v971_v11 }
 0x177   :  { %v1071_v28 = vsel %vm1007_vm3, %v971_v11, %v1039_v24 }
 0x178   :  { %v1093_v18 = vpack.c.bf16 %v1071_v28, %v1070_v30  ;;  %v924_v31 = vpop.f32.mrf.mxu2  ;;  %v828_v53 = vpop.f32.mrf.mxu0 }
 0x179   :  { %v925_v32 = vadd.f32 %v924_v31, %v876_v29  ;;  %v973_v48 = vpop.f32.mrf.mxu3  ;;  %v877_v34 = vpop.f32.mrf.mxu1  ;;  %v829_v12 = vadd.f32 %v828_v53, %v2379_v25  ;;  %v1048_v29 = vmul.f32 0.01, %v2376_v59 }
 0x17a   :  { %1109 = vst [vmem:[%s2498_s3 + $0x48] sm:$0xff] %v1093_v18 }
 0x17b   :  { %v974_v36 = vadd.f32 %v973_v48, %v925_v32  ;;  %v878_v13 = vadd.f32 %v877_v34, %v829_v12  ;;  %v1080_v31 = vsel %vm1016_vm12, %v2376_v59, %v1048_v29  ;;  %v1050_v12 = vmul.f32 0.01, %v2382_v62 }
 0x17d   :  { %vm1009_vm5 = vcmp.gt.f32.partialorder %v974_v36, 0.0  ;;  %v1041_v42 = vmul.f32 0.01, %v974_v36 }
 0x17f   :  { %v1073_v45 = vsel %vm1009_vm5, %v974_v36, %v1041_v42 }
 0x180   :  { %v1094_v47 = vpack.c.bf16 %v1073_v45, %v1072_v44  ;;  %v926_v51 = vpop.f32.mrf.mxu2  ;;  %v831_v15 = vpop.f32.mrf.mxu0  ;;  %v1082_v44 = vsel %vm1018_vm14, %v2382_v62, %v1050_v12 }
 0x181   :  { %v927_v54 = vadd.f32 %v926_v51, %v878_v13  ;;  %v975_v37 = vpop.f32.mrf.mxu3  ;;  %v832_v38 = vadd.f32 %v831_v15, %v2379_v25  ;;  %v880_v39 = vpop.f32.mrf.mxu1 }
 0x182   :  { %1110 = vst [vmem:[%s2498_s3 + $0x50] sm:$0xff] %v1094_v47 }
 0x183   :  { %v976_v58 = vadd.f32 %v975_v37, %v927_v54  ;;  %v881_v60 = vadd.f32 %v880_v39, %v832_v38 }
 0x185   :  { %vm1011_vm7 = vcmp.gt.f32.partialorder %v976_v58, 0.0  ;;  %v1043_v21 = vmul.f32 0.01, %v976_v58 }
 0x187   :  { %v1075_v61 = vsel %vm1011_vm7, %v976_v58, %v1043_v21 }
 0x188   :  { %v1095_v1 = vpack.c.bf16 %v1075_v61, %v1074_v0  ;;  %v929_v27 = vpop.f32.mrf.mxu2  ;;  %v833_v55 = vpop.f32.mrf.mxu0 }
 0x189   :  { %v930_v33 = vadd.f32 %v929_v27, %v881_v60  ;;  %v978_v2 = vpop.f32.mrf.mxu3  ;;  %v882_v3 = vpop.f32.mrf.mxu1  ;;  %v834_v63 = vadd.f32 %v833_v55, %v2379_v25 }
 0x18a   :  { %1111 = vst [vmem:[%s2498_s3 + $0x58] sm:$0xff] %v1095_v1 }
 0x18b   :  { %v979_v41 = vadd.f32 %v978_v2, %v930_v33  ;;  %v883_v6 = vadd.f32 %v882_v3, %v834_v63 }
 0x18d   :  { %vm1013_vm9 = vcmp.gt.f32.partialorder %v979_v41, 0.0  ;;  %v1045_v10 = vmul.f32 0.01, %v979_v41 }
 0x18f   :  { %v1077_v43 = vsel %vm1013_vm9, %v979_v41, %v1045_v10 }
 0x190   :  { %v1096_v7 = vpack.c.bf16 %v1077_v43, %v1076_v5  ;;  %v931_v16 = vpop.f32.mrf.mxu2  ;;  %v836_v17 = vpop.f32.mrf.mxu0 }
 0x191   :  { %v932_v4 = vadd.f32 %v931_v16, %v883_v6  ;;  %v980_v14 = vpop.f32.mrf.mxu3  ;;  %v837_v19 = vadd.f32 %v836_v17, %v2379_v25  ;;  %v885_v22 = vpop.f32.mrf.mxu1 }
 0x192   :  { %1112 = vst [vmem:[%s2498_s3 + $0x60] sm:$0xff] %v1096_v7 }
 0x193   :  { %v981_v20 = vadd.f32 %v980_v14, %v932_v4  ;;  %v886_v49 = vadd.f32 %v885_v22, %v837_v19 }
 0x195   :  { %vm1015_vm11 = vcmp.gt.f32.partialorder %v981_v20, 0.0  ;;  %v1047_v57 = vmul.f32 0.01, %v981_v20 }
 0x197   :  { %v1079_v23 = vsel %vm1015_vm11, %v981_v20, %v1047_v57 }
 0x198   :  { %v1097_v8 = vpack.c.bf16 %v1079_v23, %v1078_v50  ;;  %v934_v9 = vpop.f32.mrf.mxu2  ;;  %v838_v24 = vpop.f32.mrf.mxu0 }
 0x199   :  { %v935_v52 = vadd.f32 %v934_v9, %v886_v49  ;;  %v983_v11 = vpop.f32.mrf.mxu3  ;;  %v839_v28 = vadd.f32 %v838_v24, %v2379_v25  ;;  %v887_v46 = vpop.f32.mrf.mxu1 }
 0x19a   :  { %1113 = vst [vmem:[%s2498_s3 + $0x68] sm:$0xff] %v1097_v8 }
 0x19b   :  { %v984_v30 = vadd.f32 %v983_v11, %v935_v52  ;;  %v888_v48 = vadd.f32 %v887_v46, %v839_v28 }
 0x19d   :  { %vm1017_vm13 = vcmp.gt.f32.partialorder %v984_v30, 0.0  ;;  %v1049_v18 = vmul.f32 0.01, %v984_v30 }
 0x19f   :  { %v1081_v32 = vsel %vm1017_vm13, %v984_v30, %v1049_v18 }
 0x1a0   :  { %v1098_v53 = vpack.c.bf16 %v1081_v32, %v1080_v31  ;;  %v936_v34 = vpop.f32.mrf.mxu2 }
 0x1a1   :  { %v937_v35 = vadd.f32 %v936_v34, %v888_v48  ;;  %v985_v36 = vpop.f32.mrf.mxu3 }
 0x1a2   :  { %1114 = vst [vmem:[%s2498_s3 + $0x70] sm:$0xff] %v1098_v53 }
 0x1a3   :  { %v986_v25 = vadd.f32 %v985_v36, %v937_v35 }
 0x1a5   :  { %vm1019_vm15 = vcmp.gt.f32.partialorder %v986_v25, 0.0  ;;  %v1051_v42 = vmul.f32 0.01, %v986_v25 }
 0x1a7   :  { %v1083_v59 = vsel %vm1019_vm15, %v986_v25, %v1051_v42 }
 0x1a8   :  { %v1099_v45 = vpack.c.bf16 %v1083_v59, %v1082_v44 }
 0x1aa   :  { %1115 = vst [vmem:[%s2498_s3 + $0x78] sm:$0xff] %v1099_v45 }

// kernel: autoencoder_pc_forward.15
= control target key start
LH: loop header
LB: loop body
LE: loop exit
PB: predicated region body
PF: predicated region fallthrough
CT: control target
= control target key end

     0   :  { %s1105_s12 = smov 0   ;;  %s1314_s0 = inlined_call_operand.vmem [shape: bf16[1024,256], index: 0, kind: input, shape index: {}]   ;;  %s1315_s1 = inlined_call_operand.vmem [shape: bf16[256,128], index: 1, kind: input, shape index: {}]   ;;  %s1316_s2 = inlined_call_operand.vmem [shape: f32[1,128], index: 2, kind: input, shape index: {}]   ;;  %s1317_s3 = inlined_call_operand.vmem [shape: f32[1024,128], index: 3, kind: output, shape index: {}]  }
   0x1 LB: > { %s799_s13 = sadd.s32 4294967295, %s1083_s12   ;;  %p803_p0 = scmp.ge.s32.totalorder %s1083_s12, 1  ;;  %s1083_s12 = sphi %s1105_s12, %s13_s12  }
   0x2   : > { %p139_p1 = scmp.lt.s32.totalorder %s1083_s12, 5 }
   0x4   : > { %p140_p2 = pnand %p803_p0, %p139_p1 }
   0x5   : > { %s804_s26 = sshll.u32 (!%p140_p2), %s799_s13, 5 }
   0x6   : > { %143 = sbr.rel (%p140_p2) target bundleno = 302 (0x12e), region = 32  ;;  %p165_p3 = scmp.lt.s32.totalorder (!%p140_p2), %s804_s26, 127 }
   0xb   : > { %v1043_v0 = vld [vmem:[%s1315_s1 + $0x38] sm:$0xff]  ;;  %v1042_v2 = vld [vmem:[%s1315_s1 + $0x30] sm:$0xff]  ;;  %v1041_v4 = vld [vmem:[%s1315_s1 + $0x28] sm:$0xff]  ;;  %s1319_s26 = smov (!%p165_p3, %s804_s26), 127 }
   0xc   : > { %v1051_v1 = vld [vmem:[%s1315_s1 + $0x78] sm:$0xff]  ;;  %501 = vmatpush.bf16.msra.mxu0 %v1043_v0  ;;  %1052 = vmatpush.bf16.msra.mxu2 %v1043_v0  ;;  %v1050_v3 = vld [vmem:[%s1315_s1 + $0x70] sm:$0xff]  ;;  %v1049_v5 = vld [vmem:[%s1315_s1 + $0x68] sm:$0xff]  ;;  %s1003_s13 = sshll.u32 %s1319_s26, 3 }
   0xd   : > { %590 = vmatpush.bf16.msra.mxu1 %v1051_v1  ;;  %1060 = vmatpush.bf16.msra.mxu3 %v1051_v1  ;;  %v1040_v6 = vld [vmem:[%s1315_s1 + $0x20] sm:$0xff]  ;;  %v1039_v8 = vld [vmem:[%s1315_s1 + $0x18] sm:$0xff]  ;;  %v1038_v10 = vld [vmem:[%s1315_s1 + $0x10] sm:$0xff]  ;;  %s1160_s18 = scalar_lea.vmem %s1314_s0, %s1003_s13  ;;  %s1246_s30 = scalar_lea.vmem %s1317_s3, %s1003_s13 }
   0xe   : > { %v1048_v7 = vld [vmem:[%s1315_s1 + $0x60] sm:$0xff]  ;;  %v1047_v9 = vld [vmem:[%s1315_s1 + $0x58] sm:$0xff]  ;;  %v1046_v11 = vld [vmem:[%s1315_s1 + $0x50] sm:$0xff] }
   0xf   : > { %v1037_v12 = vld [vmem:[%s1315_s1 + $0x8] sm:$0xff]  ;;  %v1036_v14 = vld [vmem:[%s1315_s1] sm:$0xff]  ;;  %v819_v28 = vld [vmem:[%s1160_s18 + $0x10] sm:$0xf] }
  0x10   : > { %502 = vmatpush.bf16.msra.mxu0 %v1042_v2  ;;  %1053 = vmatpush.bf16.msra.mxu2 %v1042_v2  ;;  %v1045_v13 = vld [vmem:[%s1315_s1 + $0x48] sm:$0xff]  ;;  %v1044_v15 = vld [vmem:[%s1315_s1 + $0x40] sm:$0xff]  ;;  %v1007_v29 = vld [vmem:[%s1160_s18 + $0x14] sm:$0xf0] }
  0x11   : > { %591 = vmatpush.bf16.msra.mxu1 %v1050_v3  ;;  %1061 = vmatpush.bf16.msra.mxu3 %v1050_v3  ;;  %v811_v16 = vld [vmem:[%s1160_s18] sm:$0xf]  ;;  %v1005_v17 = vld [vmem:[%s1160_s18 + $0x4] sm:$0xf0]  ;;  %v1004_v20 = vld [vmem:[%s1160_s18 + $0x4] sm:$0xf]  ;;  %v820_v36 = vor.u32 %v1007_v29, %v819_v28 }
  0x12   : > { %v875_v18 = vld [vmem:[%s1160_s18 + $0x80] sm:$0xf]  ;;  %v1021_v19 = vld [vmem:[%s1160_s18 + $0x84] sm:$0xf0]  ;;  %v813_v21 = vld [vmem:[%s1160_s18 + $0x8] sm:$0xf0]  ;;  %v812_v24 = vor.u32 %v1005_v17, %v811_v16 }
  0x13   : > { %v1020_v22 = vld [vmem:[%s1160_s18 + $0x84] sm:$0xf]  ;;  %v877_v23 = vld [vmem:[%s1160_s18 + $0x88] sm:$0xf0]  ;;  %v876_v25 = vor.u32 %v1021_v19, %v875_v18  ;;  %v816_v26 = vor.u32 %v1004_v20, %v813_v21  ;;  %v883_v30 = vld [vmem:[%s1160_s18 + $0x90] sm:$0xf] }
  0x14   : > { %503 = vmatpush.bf16.msra.mxu0 %v1041_v4  ;;  %1054 = vmatpush.bf16.msra.mxu2 %v1041_v4  ;;  %v880_v27 = vor.u32 %v1020_v22, %v877_v23  ;;  %v1023_v31 = vld [vmem:[%s1160_s18 + $0x94] sm:$0xf0]  ;;  %v1006_v32 = vld [vmem:[%s1160_s18 + $0x14] sm:$0xf]  ;;  %v821_v33 = vld [vmem:[%s1160_s18 + $0x18] sm:$0xf0] }
  0x15   : > { %592 = vmatpush.bf16.msra.mxu1 %v1049_v5  ;;  %1062 = vmatpush.bf16.msra.mxu3 %v1049_v5  ;;  %v1022_v34 = vld [vmem:[%s1160_s18 + $0x94] sm:$0xf]  ;;  %v885_v35 = vld [vmem:[%s1160_s18 + $0x98] sm:$0xf0]  ;;  %v884_v37 = vor.u32 %v1023_v31, %v883_v30  ;;  %v824_v38 = vor.u32 %v1006_v32, %v821_v33  ;;  %v827_v40 = vld [vmem:[%s1160_s18 + $0x20] sm:$0xf] }
  0x16   : > { %v888_v39 = vor.u32 %v1022_v34, %v885_v35  ;;  %v1009_v41 = vld [vmem:[%s1160_s18 + $0x24] sm:$0xf0]  ;;  %v891_v42 = vld [vmem:[%s1160_s18 + $0xa0] sm:$0xf]  ;;  %v1008_v44 = vld [vmem:[%s1160_s18 + $0x24] sm:$0xf] }
  0x17   : > { %v1025_v43 = vld [vmem:[%s1160_s18 + $0xa4] sm:$0xf0]  ;;  %v829_v45 = vld [vmem:[%s1160_s18 + $0x28] sm:$0xf0]  ;;  %v1024_v46 = vld [vmem:[%s1160_s18 + $0xa4] sm:$0xf]  ;;  %v828_v48 = vor.u32 %v1009_v41, %v827_v40 }
  0x18   : > { %504 = vmatpush.bf16.msra.mxu0 %v1040_v6  ;;  %1055 = vmatpush.bf16.msra.mxu2 %v1040_v6  ;;  %v893_v47 = vld [vmem:[%s1160_s18 + $0xa8] sm:$0xf0]  ;;  %v892_v49 = vor.u32 %v1025_v43, %v891_v42  ;;  %v832_v50 = vor.u32 %v1008_v44, %v829_v45  ;;  %v835_v52 = vld [vmem:[%s1160_s18 + $0x30] sm:$0xf]  ;;  %v1011_v53 = vld [vmem:[%s1160_s18 + $0x34] sm:$0xf0] }
  0x19   : > { %593 = vmatpush.bf16.msra.mxu1 %v1048_v7  ;;  %1063 = vmatpush.bf16.msra.mxu3 %v1048_v7  ;;  %v896_v51 = vor.u32 %v1024_v46, %v893_v47  ;;  %v899_v54 = vld [vmem:[%s1160_s18 + $0xb0] sm:$0xf]  ;;  %v1027_v55 = vld [vmem:[%s1160_s18 + $0xb4] sm:$0xf0]  ;;  %v1010_v56 = vld [vmem:[%s1160_s18 + $0x34] sm:$0xf]  ;;  %v836_v60 = vor.u32 %v1011_v53, %v835_v52 }
  0x1a   : > { %v837_v57 = vld [vmem:[%s1160_s18 + $0x38] sm:$0xf0]  ;;  %v1026_v58 = vld [vmem:[%s1160_s18 + $0xb4] sm:$0xf]  ;;  %v900_v61 = vor.u32 %v1027_v55, %v899_v54  ;;  %v843_v0 = vld [vmem:[%s1160_s18 + $0x40] sm:$0xf] }
  0x1b   : > { %v901_v59 = vld [vmem:[%s1160_s18 + $0xb8] sm:$0xf0]  ;;  %v840_v62 = vor.u32 %v1010_v56, %v837_v57  ;;  %v1013_v1 = vld [vmem:[%s1160_s18 + $0x44] sm:$0xf0]  ;;  %v907_v2 = vld [vmem:[%s1160_s18 + $0xc0] sm:$0xf] }
  0x1c   : > { %505 = vmatpush.bf16.msra.mxu0 %v1039_v8  ;;  %1056 = vmatpush.bf16.msra.mxu2 %v1039_v8  ;;  %v904_v63 = vor.u32 %v1026_v58, %v901_v59  ;;  %v1029_v3 = vld [vmem:[%s1160_s18 + $0xc4] sm:$0xf0]  ;;  %v1012_v4 = vld [vmem:[%s1160_s18 + $0x44] sm:$0xf]  ;;  %v845_v5 = vld [vmem:[%s1160_s18 + $0x48] sm:$0xf0]  ;;  %v844_v8 = vor.u32 %v1013_v1, %v843_v0 }
  0x1d   : > { %594 = vmatpush.bf16.msra.mxu1 %v1047_v9  ;;  %1064 = vmatpush.bf16.msra.mxu3 %v1047_v9  ;;  %v1028_v6 = vld [vmem:[%s1160_s18 + $0xc4] sm:$0xf]  ;;  %v909_v7 = vld [vmem:[%s1160_s18 + $0xc8] sm:$0xf0]  ;;  %v908_v9 = vor.u32 %v1029_v3, %v907_v2  ;;  %v1014_v16 = vld [vmem:[%s1160_s18 + $0x54] sm:$0xf] }
  0x1e   : > { %v853_v17 = vld [vmem:[%s1160_s18 + $0x58] sm:$0xf0]  ;;  %v1030_v18 = vld [vmem:[%s1160_s18 + $0xd4] sm:$0xf]  ;;  %v1016_v28 = vld [vmem:[%s1160_s18 + $0x64] sm:$0xf] }
  0x1f   : > { %v917_v19 = vld [vmem:[%s1160_s18 + $0xd8] sm:$0xf0]  ;;  %v856_v22 = vor.u32 %v1014_v16, %v853_v17  ;;  %v861_v29 = vld [vmem:[%s1160_s18 + $0x68] sm:$0xf0]  ;;  %v1032_v30 = vld [vmem:[%s1160_s18 + $0xe4] sm:$0xf] }
  0x20   : > { %506 = vmatpush.bf16.msra.mxu0 %v1038_v10  ;;  %1057 = vmatpush.bf16.msra.mxu2 %v1038_v10  ;;  %v848_v10 = vor.u32 %v1012_v4, %v845_v5  ;;  %v920_v23 = vor.u32 %v1030_v18, %v917_v19  ;;  %v925_v31 = vld [vmem:[%s1160_s18 + $0xe8] sm:$0xf0]  ;;  %v864_v34 = vor.u32 %v1016_v28, %v861_v29  ;;  %v1018_v40 = vld [vmem:[%s1160_s18 + $0x74] sm:$0xf]  ;;  %v869_v41 = vld [vmem:[%s1160_s18 + $0x78] sm:$0xf0] }
  0x21   : > { %595 = vmatpush.bf16.msra.mxu1 %v1046_v11  ;;  %1065 = vmatpush.bf16.msra.mxu3 %v1046_v11  ;;  %v912_v11 = vor.u32 %v1028_v6, %v909_v7  ;;  %v928_v35 = vor.u32 %v1032_v30, %v925_v31  ;;  %v1034_v42 = vld [vmem:[%s1160_s18 + $0xf4] sm:$0xf]  ;;  %v933_v43 = vld [vmem:[%s1160_s18 + $0xf8] sm:$0xf0]  ;;  %v872_v46 = vor.u32 %v1018_v40, %v869_v41 }
  0x22   : > { %v936_v47 = vor.u32 %v1034_v42, %v933_v43 }
  0x24   : > { %507 = vmatpush.bf16.msra.mxu0 %v1037_v12  ;;  %1058 = vmatpush.bf16.msra.mxu2 %v1037_v12  ;;  %v851_v12 = vld [vmem:[%s1160_s18 + $0x50] sm:$0xf] }
  0x25   : > { %596 = vmatpush.bf16.msra.mxu1 %v1045_v13  ;;  %1066 = vmatpush.bf16.msra.mxu3 %v1045_v13  ;;  %v1015_v13 = vld [vmem:[%s1160_s18 + $0x54] sm:$0xf0] }
  0x26   : > { %v852_v20 = vor.u32 %v1015_v13, %v851_v12 }
  0x28   : > { %508 = vmatpush.bf16.msra.mxu0 %v1036_v14  ;;  %1059 = vmatpush.bf16.msra.mxu2 %v1036_v14  ;;  %v915_v14 = vld [vmem:[%s1160_s18 + $0xd0] sm:$0xf] }
  0x29   : > { %597 = vmatpush.bf16.msra.mxu1 %v1044_v15  ;;  %1067 = vmatpush.bf16.msra.mxu3 %v1044_v15  ;;  %v1031_v15 = vld [vmem:[%s1160_s18 + $0xd4] sm:$0xf0] }
  0x2a   : > { %v916_v21 = vor.u32 %v1031_v15, %v915_v14 }
  0x2b   : > { %509 = vmatmul.bf16.vlgmr.msra.gmra.mxu0 %v812_v24  ;;  %549 = vmatmul.bf16.vlgmr.msra.gmra.mxu2 %v876_v25  ;;  %v859_v24 = vld [vmem:[%s1160_s18 + $0x60] sm:$0xf]  ;;  %v1017_v25 = vld [vmem:[%s1160_s18 + $0x64] sm:$0xf0] }
  0x2c   : > { %598 = vmatmul.bf16.vlgmr.msra.gmra.mxu1 %v816_v26  ;;  %638 = vmatmul.bf16.vlgmr.msra.gmra.mxu3 %v880_v27  ;;  %v923_v26 = vld [vmem:[%s1160_s18 + $0xe0] sm:$0xf]  ;;  %v1033_v27 = vld [vmem:[%s1160_s18 + $0xe4] sm:$0xf0]  ;;  %v860_v32 = vor.u32 %v1017_v25, %v859_v24 }
  0x2d   : > { %v924_v33 = vor.u32 %v1033_v27, %v923_v26 }
  0x3b   : > { %514 = vmatmul.bf16.gmra.mxu0 %v820_v36  ;;  %554 = vmatmul.bf16.gmra.mxu2 %v884_v37  ;;  %v867_v36 = vld [vmem:[%s1160_s18 + $0x70] sm:$0xf]  ;;  %v1019_v37 = vld [vmem:[%s1160_s18 + $0x74] sm:$0xf0] }
  0x3c   : > { %603 = vmatmul.bf16.gmra.mxu1 %v824_v38  ;;  %643 = vmatmul.bf16.gmra.mxu3 %v888_v39  ;;  %v931_v38 = vld [vmem:[%s1160_s18 + $0xf0] sm:$0xf]  ;;  %v1035_v39 = vld [vmem:[%s1160_s18 + $0xf4] sm:$0xf0]  ;;  %v868_v44 = vor.u32 %v1019_v37, %v867_v36 }
  0x3d   : > { %v932_v45 = vor.u32 %v1035_v39, %v931_v38 }
  0x4b   : > { %519 = vmatmul.bf16.gmra.mxu0 %v828_v48  ;;  %559 = vmatmul.bf16.gmra.mxu2 %v892_v49  ;;  %v1238_v48 = vld [vmem:[%s1316_s2] ss:$0 sm:$0xff] }
  0x4c   : > { %608 = vmatmul.bf16.gmra.mxu1 %v832_v50  ;;  %648 = vmatmul.bf16.gmra.mxu3 %v896_v51 }
  0x5b   : > { %524 = vmatmul.bf16.gmra.mxu0 %v836_v60  ;;  %564 = vmatmul.bf16.gmra.mxu2 %v900_v61 }
  0x5c   : > { %613 = vmatmul.bf16.gmra.mxu1 %v840_v62  ;;  %653 = vmatmul.bf16.gmra.mxu3 %v904_v63 }
  0x6b   : > { %529 = vmatmul.bf16.gmra.mxu0 %v844_v8  ;;  %569 = vmatmul.bf16.gmra.mxu2 %v908_v9 }
  0x6c   : > { %618 = vmatmul.bf16.gmra.mxu1 %v848_v10  ;;  %658 = vmatmul.bf16.gmra.mxu3 %v912_v11 }
  0x7b   : > { %534 = vmatmul.bf16.gmra.mxu0 %v852_v20  ;;  %574 = vmatmul.bf16.gmra.mxu2 %v916_v21 }
  0x7c   : > { %623 = vmatmul.bf16.gmra.mxu1 %v856_v22  ;;  %663 = vmatmul.bf16.gmra.mxu3 %v920_v23 }
  0x8b   : > { %539 = vmatmul.bf16.gmra.mxu0 %v860_v32  ;;  %579 = vmatmul.bf16.gmra.mxu2 %v924_v33 }
  0x8c   : > { %628 = vmatmul.bf16.gmra.mxu1 %v864_v34  ;;  %668 = vmatmul.bf16.gmra.mxu3 %v928_v35 }
  0x9b   : > { %544 = vmatmul.bf16.gmra.mxu0 %v868_v44  ;;  %584 = vmatmul.bf16.gmra.mxu2 %v932_v45 }
  0x9c   : > { %633 = vmatmul.bf16.gmra.mxu1 %v872_v46  ;;  %673 = vmatmul.bf16.gmra.mxu3 %v936_v47 }
  0xa8   : > { %v510_v49 = vpop.f32.mrf.mxu0 }
  0xa9   : > { %v511_v50 = vadd.f32 %v1238_v48, %v510_v49  ;;  %v599_v51 = vpop.f32.mrf.mxu1 }
  0xab   : > { %v600_v52 = vadd.f32 %v599_v51, %v511_v50 }
  0xad   : > { %v679_v53 = vmax.f32 %v600_v52, 0.0 }
  0xae   : > { %v550_v54 = vpop.f32.mrf.mxu2 }
  0xaf   : > { %711 = vst [vmem:[%s1246_s30] sm:$0xff] %v679_v53  ;;  %v551_v55 = vadd.f32 %v1238_v48, %v550_v54  ;;  %v639_v56 = vpop.f32.mrf.mxu3 }
  0xb0   : > { %v512_v57 = vpop.f32.mrf.mxu0 }
  0xb1   : > { %v640_v58 = vadd.f32 %v639_v56, %v551_v55  ;;  %v513_v59 = vadd.f32 %v1238_v48, %v512_v57  ;;  %v601_v60 = vpop.f32.mrf.mxu1 }
  0xb3   : > { %v695_v61 = vmax.f32 %v640_v58, 0.0  ;;  %v602_v62 = vadd.f32 %v601_v60, %v513_v59 }
  0xb5   : > { %727 = vst [vmem:[%s1246_s30 + $0x80] sm:$0xff] %v695_v61  ;;  %v680_v63 = vmax.f32 %v602_v62, 0.0 }
  0xb6   : > { %v552_v0 = vpop.f32.mrf.mxu2 }
  0xb7   : > { %712 = vst [vmem:[%s1246_s30 + $0x8] sm:$0xff] %v680_v63  ;;  %v553_v1 = vadd.f32 %v1238_v48, %v552_v0  ;;  %v641_v2 = vpop.f32.mrf.mxu3 }
  0xb8   : > { %v515_v3 = vpop.f32.mrf.mxu0 }
  0xb9   : > { %v642_v4 = vadd.f32 %v641_v2, %v553_v1  ;;  %v516_v5 = vadd.f32 %v1238_v48, %v515_v3  ;;  %v604_v6 = vpop.f32.mrf.mxu1 }
  0xbb   : > { %v696_v7 = vmax.f32 %v642_v4, 0.0  ;;  %v605_v8 = vadd.f32 %v604_v6, %v516_v5 }
  0xbd   : > { %728 = vst [vmem:[%s1246_s30 + $0x88] sm:$0xff] %v696_v7  ;;  %v681_v9 = vmax.f32 %v605_v8, 0.0 }
  0xbe   : > { %v555_v10 = vpop.f32.mrf.mxu2 }
  0xbf   : > { %713 = vst [vmem:[%s1246_s30 + $0x10] sm:$0xff] %v681_v9  ;;  %v556_v11 = vadd.f32 %v1238_v48, %v555_v10  ;;  %v644_v12 = vpop.f32.mrf.mxu3 }
  0xc0   : > { %v517_v13 = vpop.f32.mrf.mxu0 }
  0xc1   : > { %v645_v14 = vadd.f32 %v644_v12, %v556_v11  ;;  %v518_v15 = vadd.f32 %v1238_v48, %v517_v13  ;;  %v606_v16 = vpop.f32.mrf.mxu1 }
  0xc3   : > { %v697_v17 = vmax.f32 %v645_v14, 0.0  ;;  %v607_v18 = vadd.f32 %v606_v16, %v518_v15 }
  0xc5   : > { %729 = vst [vmem:[%s1246_s30 + $0x90] sm:$0xff] %v697_v17  ;;  %v682_v19 = vmax.f32 %v607_v18, 0.0 }
  0xc6   : > { %v557_v20 = vpop.f32.mrf.mxu2 }
  0xc7   : > { %714 = vst [vmem:[%s1246_s30 + $0x18] sm:$0xff] %v682_v19  ;;  %v558_v21 = vadd.f32 %v1238_v48, %v557_v20  ;;  %v646_v22 = vpop.f32.mrf.mxu3 }
  0xc8   : > { %v520_v23 = vpop.f32.mrf.mxu0 }
  0xc9   : > { %v647_v24 = vadd.f32 %v646_v22, %v558_v21  ;;  %v521_v25 = vadd.f32 %v1238_v48, %v520_v23  ;;  %v609_v26 = vpop.f32.mrf.mxu1 }
  0xcb   : > { %v698_v27 = vmax.f32 %v647_v24, 0.0  ;;  %v610_v28 = vadd.f32 %v609_v26, %v521_v25 }
  0xcd   : > { %730 = vst [vmem:[%s1246_s30 + $0x98] sm:$0xff] %v698_v27  ;;  %v683_v29 = vmax.f32 %v610_v28, 0.0 }
  0xce   : > { %v560_v30 = vpop.f32.mrf.mxu2 }
  0xcf   : > { %715 = vst [vmem:[%s1246_s30 + $0x20] sm:$0xff] %v683_v29  ;;  %v561_v31 = vadd.f32 %v1238_v48, %v560_v30  ;;  %v649_v32 = vpop.f32.mrf.mxu3 }
  0xd0   : > { %v522_v33 = vpop.f32.mrf.mxu0 }
  0xd1   : > { %v650_v34 = vadd.f32 %v649_v32, %v561_v31  ;;  %v523_v35 = vadd.f32 %v1238_v48, %v522_v33  ;;  %v611_v36 = vpop.f32.mrf.mxu1 }
  0xd3   : > { %v699_v37 = vmax.f32 %v650_v34, 0.0  ;;  %v612_v38 = vadd.f32 %v611_v36, %v523_v35 }
  0xd5   : > { %731 = vst [vmem:[%s1246_s30 + $0xa0] sm:$0xff] %v699_v37  ;;  %v684_v39 = vmax.f32 %v612_v38, 0.0 }
  0xd6   : > { %v562_v40 = vpop.f32.mrf.mxu2 }
  0xd7   : > { %716 = vst [vmem:[%s1246_s30 + $0x28] sm:$0xff] %v684_v39  ;;  %v563_v41 = vadd.f32 %v1238_v48, %v562_v40  ;;  %v651_v42 = vpop.f32.mrf.mxu3 }
  0xd8   : > { %v525_v43 = vpop.f32.mrf.mxu0 }
  0xd9   : > { %v652_v44 = vadd.f32 %v651_v42, %v563_v41  ;;  %v526_v45 = vadd.f32 %v1238_v48, %v525_v43  ;;  %v614_v46 = vpop.f32.mrf.mxu1 }
  0xdb   : > { %v700_v47 = vmax.f32 %v652_v44, 0.0  ;;  %v615_v49 = vadd.f32 %v614_v46, %v526_v45 }
  0xdd   : > { %732 = vst [vmem:[%s1246_s30 + $0xa8] sm:$0xff] %v700_v47  ;;  %v685_v50 = vmax.f32 %v615_v49, 0.0 }
  0xde   : > { %v565_v51 = vpop.f32.mrf.mxu2 }
  0xdf   : > { %717 = vst [vmem:[%s1246_s30 + $0x30] sm:$0xff] %v685_v50  ;;  %v566_v52 = vadd.f32 %v1238_v48, %v565_v51  ;;  %v654_v53 = vpop.f32.mrf.mxu3 }
  0xe0   : > { %v527_v54 = vpop.f32.mrf.mxu0 }
  0xe1   : > { %v655_v55 = vadd.f32 %v654_v53, %v566_v52  ;;  %v528_v56 = vadd.f32 %v1238_v48, %v527_v54  ;;  %v616_v57 = vpop.f32.mrf.mxu1 }
  0xe3   : > { %v701_v58 = vmax.f32 %v655_v55, 0.0  ;;  %v617_v59 = vadd.f32 %v616_v57, %v528_v56 }
  0xe5   : > { %733 = vst [vmem:[%s1246_s30 + $0xb0] sm:$0xff] %v701_v58  ;;  %v686_v60 = vmax.f32 %v617_v59, 0.0 }
  0xe6   : > { %v567_v61 = vpop.f32.mrf.mxu2 }
  0xe7   : > { %718 = vst [vmem:[%s1246_s30 + $0x38] sm:$0xff] %v686_v60  ;;  %v568_v62 = vadd.f32 %v1238_v48, %v567_v61  ;;  %v656_v63 = vpop.f32.mrf.mxu3 }
  0xe8   : > { %v530_v0 = vpop.f32.mrf.mxu0 }
  0xe9   : > { %v657_v1 = vadd.f32 %v656_v63, %v568_v62  ;;  %v531_v2 = vadd.f32 %v1238_v48, %v530_v0  ;;  %v619_v3 = vpop.f32.mrf.mxu1 }
  0xeb   : > { %v702_v4 = vmax.f32 %v657_v1, 0.0  ;;  %v620_v5 = vadd.f32 %v619_v3, %v531_v2 }
  0xed   : > { %734 = vst [vmem:[%s1246_s30 + $0xb8] sm:$0xff] %v702_v4  ;;  %v687_v6 = vmax.f32 %v620_v5, 0.0 }
  0xee   : > { %v570_v7 = vpop.f32.mrf.mxu2 }
  0xef   : > { %719 = vst [vmem:[%s1246_s30 + $0x40] sm:$0xff] %v687_v6  ;;  %v571_v8 = vadd.f32 %v1238_v48, %v570_v7  ;;  %v659_v9 = vpop.f32.mrf.mxu3 }
  0xf0   : > { %v532_v10 = vpop.f32.mrf.mxu0 }
  0xf1   : > { %v660_v11 = vadd.f32 %v659_v9, %v571_v8  ;;  %v533_v12 = vadd.f32 %v1238_v48, %v532_v10  ;;  %v621_v13 = vpop.f32.mrf.mxu1 }
  0xf3   : > { %v703_v14 = vmax.f32 %v660_v11, 0.0  ;;  %v622_v15 = vadd.f32 %v621_v13, %v533_v12 }
  0xf5   : > { %735 = vst [vmem:[%s1246_s30 + $0xc0] sm:$0xff] %v703_v14  ;;  %v688_v16 = vmax.f32 %v622_v15, 0.0 }
  0xf6   : > { %v572_v17 = vpop.f32.mrf.mxu2 }
  0xf7   : > { %720 = vst [vmem:[%s1246_s30 + $0x48] sm:$0xff] %v688_v16  ;;  %v573_v18 = vadd.f32 %v1238_v48, %v572_v17  ;;  %v661_v19 = vpop.f32.mrf.mxu3 }
  0xf8   : > { %v535_v20 = vpop.f32.mrf.mxu0 }
  0xf9   : > { %v662_v21 = vadd.f32 %v661_v19, %v573_v18  ;;  %v536_v22 = vadd.f32 %v1238_v48, %v535_v20  ;;  %v624_v23 = vpop.f32.mrf.mxu1 }
  0xfb   : > { %v704_v24 = vmax.f32 %v662_v21, 0.0  ;;  %v625_v25 = vadd.f32 %v624_v23, %v536_v22 }
  0xfd   : > { %736 = vst [vmem:[%s1246_s30 + $0xc8] sm:$0xff] %v704_v24  ;;  %v689_v26 = vmax.f32 %v625_v25, 0.0 }
  0xfe   : > { %v575_v27 = vpop.f32.mrf.mxu2 }
  0xff   : > { %721 = vst [vmem:[%s1246_s30 + $0x50] sm:$0xff] %v689_v26  ;;  %v576_v28 = vadd.f32 %v1238_v48, %v575_v27  ;;  %v664_v29 = vpop.f32.mrf.mxu3 }
 0x100   : > { %v537_v30 = vpop.f32.mrf.mxu0 }
 0x101   : > { %v665_v31 = vadd.f32 %v664_v29, %v576_v28  ;;  %v538_v32 = vadd.f32 %v1238_v48, %v537_v30  ;;  %v626_v33 = vpop.f32.mrf.mxu1 }
 0x103   : > { %v705_v34 = vmax.f32 %v665_v31, 0.0  ;;  %v627_v35 = vadd.f32 %v626_v33, %v538_v32 }
 0x105   : > { %737 = vst [vmem:[%s1246_s30 + $0xd0] sm:$0xff] %v705_v34  ;;  %v690_v36 = vmax.f32 %v627_v35, 0.0 }
 0x106   : > { %v577_v37 = vpop.f32.mrf.mxu2 }
 0x107   : > { %722 = vst [vmem:[%s1246_s30 + $0x58] sm:$0xff] %v690_v36  ;;  %v578_v38 = vadd.f32 %v1238_v48, %v577_v37  ;;  %v666_v39 = vpop.f32.mrf.mxu3 }
 0x108   : > { %v540_v40 = vpop.f32.mrf.mxu0 }
 0x109   : > { %v667_v41 = vadd.f32 %v666_v39, %v578_v38  ;;  %v541_v42 = vadd.f32 %v1238_v48, %v540_v40  ;;  %v629_v43 = vpop.f32.mrf.mxu1 }
 0x10b   : > { %v706_v44 = vmax.f32 %v667_v41, 0.0  ;;  %v630_v45 = vadd.f32 %v629_v43, %v541_v42 }
 0x10d   : > { %738 = vst [vmem:[%s1246_s30 + $0xd8] sm:$0xff] %v706_v44  ;;  %v691_v46 = vmax.f32 %v630_v45, 0.0 }
 0x10e   : > { %v580_v47 = vpop.f32.mrf.mxu2 }
 0x10f   : > { %723 = vst [vmem:[%s1246_s30 + $0x60] sm:$0xff] %v691_v46  ;;  %v581_v49 = vadd.f32 %v1238_v48, %v580_v47  ;;  %v669_v50 = vpop.f32.mrf.mxu3 }
 0x110   : > { %v542_v51 = vpop.f32.mrf.mxu0 }
 0x111   : > { %v670_v52 = vadd.f32 %v669_v50, %v581_v49  ;;  %v543_v53 = vadd.f32 %v1238_v48, %v542_v51  ;;  %v631_v54 = vpop.f32.mrf.mxu1 }
 0x113   : > { %v707_v55 = vmax.f32 %v670_v52, 0.0  ;;  %v632_v56 = vadd.f32 %v631_v54, %v543_v53 }
 0x115   : > { %739 = vst [vmem:[%s1246_s30 + $0xe0] sm:$0xff] %v707_v55  ;;  %v692_v57 = vmax.f32 %v632_v56, 0.0 }
 0x116   : > { %v582_v58 = vpop.f32.mrf.mxu2 }
 0x117   : > { %724 = vst [vmem:[%s1246_s30 + $0x68] sm:$0xff] %v692_v57  ;;  %v583_v59 = vadd.f32 %v1238_v48, %v582_v58  ;;  %v671_v60 = vpop.f32.mrf.mxu3 }
 0x118   : > { %v545_v61 = vpop.f32.mrf.mxu0 }
 0x119   : > { %v672_v62 = vadd.f32 %v671_v60, %v583_v59  ;;  %v546_v63 = vadd.f32 %v1238_v48, %v545_v61  ;;  %v634_v0 = vpop.f32.mrf.mxu1 }
 0x11b   : > { %v708_v1 = vmax.f32 %v672_v62, 0.0  ;;  %v635_v2 = vadd.f32 %v634_v0, %v546_v63 }
 0x11d   : > { %740 = vst [vmem:[%s1246_s30 + $0xe8] sm:$0xff] %v708_v1  ;;  %v693_v3 = vmax.f32 %v635_v2, 0.0 }
 0x11e   : > { %v585_v4 = vpop.f32.mrf.mxu2 }
 0x11f   : > { %725 = vst [vmem:[%s1246_s30 + $0x70] sm:$0xff] %v693_v3  ;;  %v586_v5 = vadd.f32 %v1238_v48, %v585_v4  ;;  %v674_v6 = vpop.f32.mrf.mxu3 }
 0x120   : > { %v547_v7 = vpop.f32.mrf.mxu0 }
 0x121   : > { %v675_v8 = vadd.f32 %v674_v6, %v586_v5  ;;  %v548_v9 = vadd.f32 %v1238_v48, %v547_v7  ;;  %v636_v10 = vpop.f32.mrf.mxu1 }
 0x123   : > { %v709_v11 = vmax.f32 %v675_v8, 0.0  ;;  %v637_v12 = vadd.f32 %v636_v10, %v548_v9 }
 0x125   : > { %741 = vst [vmem:[%s1246_s30 + $0xf0] sm:$0xff] %v709_v11  ;;  %v694_v13 = vmax.f32 %v637_v12, 0.0 }
 0x126   : > { %v587_v14 = vpop.f32.mrf.mxu2 }
 0x127   : > { %726 = vst [vmem:[%s1246_s30 + $0x78] sm:$0xff] %v694_v13  ;;  %v588_v15 = vadd.f32 %v1238_v48, %v587_v14  ;;  %v676_v16 = vpop.f32.mrf.mxu3 }
 0x129   : > { %v677_v17 = vadd.f32 %v676_v16, %v588_v15 }
 0x12b   : > { %v710_v18 = vmax.f32 %v677_v17, 0.0 }
 0x12d   : > { %742 = vst [vmem:[%s1246_s30 + $0xf8] sm:$0xff] %v710_v18 }
 0x12e PF: > { %s13_s12 = sadd.s32 1, %s1083_s12  }
 0x12f   : > { %p10_p4 = scmp.ge.s32.totalorder %s13_s12, 6  }
 0x131   :  { %12 = sbr.rel (!%p10_p4) target bundleno = 1 (0x1), region = 62 }

</bundles_post_ra>
